<compile_context>
chip_gen: v7x
topology: tpu7x:2x2x1
jax: 0.10.0
libtpu: 0.0.40
codegen_flags: <defaults>
</compile_context>

<pallas_src>
import math
import functools

import jax
import jax.numpy as jnp
from jax import lax
from jax.experimental import pallas as pl
from jax.experimental.pallas import tpu as pltpu

LN_EPS = 1e-5  # torch.nn.LayerNorm default

# Set to jnp.bfloat16 on v6e/v7x for ~2x MXU throughput and half the weight
# DMA bytes (LN/softmax statistics stay f32).  Default f32 keeps the exact
# PyTorch forward numerics.
MATMUL_DTYPE = jnp.float32


# ----------------------------------------------------------------------------
# In-kernel helpers
# ----------------------------------------------------------------------------
def _mm(a, b):
    return jnp.dot(a.astype(MATMUL_DTYPE), b.astype(MATMUL_DTYPE),
                   preferred_element_type=jnp.float32)


def _mm_nt(a, b):
    """a @ b.T without an explicit transpose (contract last dims)."""
    return lax.dot_general(a.astype(MATMUL_DTYPE), b.astype(MATMUL_DTYPE),
                           (((1,), (1,)), ((), ())),
                           preferred_element_type=jnp.float32)


def _layer_norm(x, g, b):
    mu = jnp.mean(x, axis=-1, keepdims=True)
    var = jnp.mean(jnp.square(x - mu), axis=-1, keepdims=True)
    return (x - mu) * lax.rsqrt(var + LN_EPS) * g + b


# ----------------------------------------------------------------------------
# Pallas kernels
# ----------------------------------------------------------------------------
def _encoder_layer_kernel(x_ref, widc_ref, widr_ref,
                          ln1g_ref, ln1b_ref, wqkv_ref, bqkv_ref,
                          wproj_ref, bproj_ref,
                          ln2g_ref, ln2b_ref, w1_ref, fb1_ref, w2_ref, fb2_ref,
                          o_ref, *, num_heads, head_dim):
    """Fused InceptraEncoderLayer on a (rows, C) slab of whole windows."""
    C = num_heads * head_dim
    x = x_ref[...].astype(jnp.float32)                         # (R, C)

    # ---- norm1 + qkv projection (qk scale already folded into wqkv/bqkv) ----
    xn = _layer_norm(x, ln1g_ref[0], ln1b_ref[0])
    qkv = _mm(xn, wqkv_ref[...]) + bqkv_ref[0]                 # (R, 3C)

    # Block-diagonal window mask: rows attend only within their G x G window.
    mask = widc_ref[...] == widr_ref[...]                      # (R,1)==(1,R) -> (R,R)
    neg = jnp.float32(-1e30)

    wproj = wproj_ref[...]
    attn = jnp.zeros_like(x)
    for h in range(num_heads):                                 # static, small
        lo = h * head_dim
        q = qkv[:, lo:lo + head_dim]
        k = qkv[:, C + lo:C + lo + head_dim]
        v = qkv[:, 2 * C + lo:2 * C + lo + head_dim]
        s = _mm_nt(q, k)                                       # (R, R)
        s = jnp.where(mask, s, neg)
        s = s - jnp.max(s, axis=-1, keepdims=True)
        p = jnp.exp(s)
        p = p * pl.reciprocal(jnp.sum(p, axis=-1, keepdims=True), approx=True)
        ctx = _mm(p, v)                                        # (R, hd)
        # Accumulate the output projection per head -> no concat/relayout.
        attn = attn + _mm(ctx, wproj[lo:lo + head_dim, :])
    a = x + attn + bproj_ref[0]                                # attention residual

    # ---- norm2 + FFN (relu) + residual ----
    an = _layer_norm(a, ln2g_ref[0], ln2b_ref[0])
    hid = jnp.maximum(_mm(an, w1_ref[...]) + fb1_ref[0], 0.0)
    ffn = _mm(hid, w2_ref[...]) + fb2_ref[0]
    o_ref[...] = (a + ffn).astype(o_ref.dtype)


def _reduce_kernel(*refs, n_inputs):
    """Block.reduce without materializing the channel concat:
       y = sum_i x_i @ W[i*C:(i+1)*C, :] + b."""
    x_refs = refs[:n_inputs]
    w_ref, b_ref, o_ref = refs[n_inputs], refs[n_inputs + 1], refs[n_inputs + 2]
    C = x_refs[0].shape[-1]
    w = w_ref[...]
    y = None
    for i, xr in enumerate(x_refs):
        part = _mm(xr[...], w[i * C:(i + 1) * C, :])
        y = part if y is None else y + part
    o_ref[...] = (y + b_ref[0]).astype(o_ref.dtype)


# ----------------------------------------------------------------------------
# Tiling helpers
# ----------------------------------------------------------------------------
def _pick_row_block(total_rows, strip, target=512):
    """Largest row tile <= target that divides total_rows, contains whole
    windows (multiple of `strip` = G*W) and obeys TPU tiling; else full slab."""
    if total_rows <= target:
        return total_rows
    best = total_rows
    m = strip
    while m <= target:
        if total_rows % m == 0 and m % 128 == 0:
            best = m
        m += strip
    return best


def _pick_tile_rows(total_rows, target=512):
    if total_rows <= target:
        return total_rows
    best = total_rows
    for m in range(8, target + 1, 8):
        if total_rows % m == 0:
            best = m
    return best


def window_ids(B, H, W, G):
    """Globally-unique window id per token row in (b, h, w) row order."""
    gh = jnp.arange(H, dtype=jnp.int32) // G
    gw = jnp.arange(W, dtype=jnp.int32) // G
    wid = gh[:, None] * (W // G) + gw[None, :]                 # (H, W)
    wid = wid.reshape(1, H * W)
    wid = wid + jnp.arange(B, dtype=jnp.int32)[:, None] * ((H // G) * (W // G))
    wid = wid.reshape(B * H * W)
    return wid.reshape(-1, 1), wid.reshape(1, -1)


# ----------------------------------------------------------------------------
# Kernel wrappers
# ----------------------------------------------------------------------------
def encoder_layer(x_rows, p, wid_col, wid_row, num_heads, row_block):
    R, C = x_rows.shape
    head_dim = C // num_heads
    d_hidden = p['w1'].shape[1]
    kernel = functools.partial(_encoder_layer_kernel,
                               num_heads=num_heads, head_dim=head_dim)
    row_spec = pl.BlockSpec((row_block, C), lambda i: (i, 0))
    full = lambda shape: pl.BlockSpec(shape, lambda i: (0, 0))  # noqa: E731
    return pl.pallas_call(
        kernel,
        out_shape=jax.ShapeDtypeStruct((R, C), x_rows.dtype),
        grid=(R // row_block,),
        in_specs=[
            row_spec,                                           # x rows
            pl.BlockSpec((row_block, 1), lambda i: (i, 0)),     # window id (col)
            pl.BlockSpec((1, row_block), lambda i: (0, i)),     # window id (row)
            full((1, C)), full((1, C)),                         # ln1 gamma / beta
            full((C, 3 * C)), full((1, 3 * C)),                 # Wqkv / bqkv (scaled)
            full((C, C)), full((1, C)),                         # Wproj / bproj
            full((1, C)), full((1, C)),                         # ln2 gamma / beta
            full((C, d_hidden)), full((1, d_hidden)),           # fc1
            full((d_hidden, C)), full((1, C)),                  # fc2
        ],
        out_specs=row_spec,
        compiler_params=pltpu.CompilerParams(
            dimension_semantics=("parallel",)),
    )(x_rows, wid_col, wid_row,
      p['ln1_g'], p['ln1_b'], p['wqkv'], p['bqkv'], p['wproj'], p['bproj'],
      p['ln2_g'], p['ln2_b'], p['w1'], p['b1'], p['w2'], p['b2'])


def reduce_linear(x_list, w, b):
    M, C = x_list[0].shape
    Cout = w.shape[1]
    n = len(x_list)
    tile = _pick_tile_rows(M)
    kernel = functools.partial(_reduce_kernel, n_inputs=n)
    in_specs = [pl.BlockSpec((tile, C), lambda i: (i, 0)) for _ in range(n)]
    in_specs += [pl.BlockSpec((n * C, Cout), lambda i: (0, 0)),
                 pl.BlockSpec((1, Cout), lambda i: (0, 0))]
    return pl.pallas_call(
        kernel,
        out_shape=jax.ShapeDtypeStruct((M, Cout), x_list[0].dtype),
        grid=(M // tile,),
        in_specs=in_specs,
        out_specs=pl.BlockSpec((tile, Cout), lambda i: (i, 0)),
        compiler_params=pltpu.CompilerParams(
            dimension_semantics=("parallel",)),
    )(*x_list, w, b)


# ----------------------------------------------------------------------------
# Model glue (only the stage-boundary transposes / pos-embed stay in XLA)
# ----------------------------------------------------------------------------
def block_forward(x_rows, bp, layer_ctx, num_heads):
    outs = [encoder_layer(x_rows, lp, wc, wr, num_heads, rb)
            for lp, (wc, wr, rb) in zip(bp['layers'], layer_ctx)]
    return reduce_linear(outs, bp['reduce_w'], bp['reduce_b'])


def stage_forward(x_lbc, params, *, H, W, group_list, num_heads):
    """Stage.forward.  x_lbc: (L, B, C) with L = H*W."""
    L, B, C = x_lbc.shape
    x = x_lbc + params['pos']                                   # sine position embedding
    # Canonical row layout for the whole stage: (B*L, C), rows ordered (b, h, w).
    x = jnp.transpose(x, (1, 0, 2)).reshape(B * L, C)
    layer_ctx = []
    for G in group_list:
        wc, wr = window_ids(B, H, W, G)
        layer_ctx.append((wc, wr, _pick_row_block(B * L, G * W)))
    for bp in params['blocks']:
        x = block_forward(x, bp, layer_ctx, num_heads)
    return jnp.transpose(x.reshape(B, L, C), (1, 0, 2))         # back to (L, B, C)


# ----------------------------------------------------------------------------
# Sine position embedding (matches Stage._make_sine_position_embedding)
# ----------------------------------------------------------------------------
def sine_pos_embedding(d_model, h, w, temperature=10000.0, scale=2 * math.pi):
    one = d_model // 2
    area = jnp.ones((1, h, w), jnp.float32)
    y_embed = jnp.cumsum(area, axis=1)
    x_embed = jnp.cumsum(area, axis=2)
    eps = 1e-6
    y_embed = y_embed / (y_embed[:, -1:, :] + eps) * scale
    x_embed = x_embed / (x_embed[:, :, -1:] + eps) * scale
    dim_t = jnp.arange(one, dtype=jnp.float32)
    dim_t = jnp.power(temperature, 2.0 * (dim_t // 2) / one)
    pos_x = x_embed[:, :, :, None] / dim_t
    pos_y = y_embed[:, :, :, None] / dim_t
    pos_x = jnp.stack((jnp.sin(pos_x[:, :, :, 0::2]),
                       jnp.cos(pos_x[:, :, :, 1::2])), axis=4).reshape(1, h, w, -1)
    pos_y = jnp.stack((jnp.sin(pos_y[:, :, :, 0::2]),
                       jnp.cos(pos_y[:, :, :, 1::2])), axis=4).reshape(1, h, w, -1)
    pos = jnp.concatenate((pos_y, pos_x), axis=3)               # (1, h, w, d_model)
    pos = jnp.transpose(pos, (0, 3, 1, 2)).reshape(1, d_model, h * w)
    pos = jnp.transpose(pos, (2, 0, 1))                         # (h*w, 1, d_model)
    return pos


# ----------------------------------------------------------------------------
# Deterministic parameter initialization (synthetic weights, not a checkpoint)
# ----------------------------------------------------------------------------
def init_stage_params(key, d_model, d_hidden, n_blocks, n_layers, n_heads, H, W):
    def dense(k, fin, fout):
        return jax.random.normal(k, (fin, fout), jnp.float32) * 0.02

    scale = (d_model // n_heads) ** (-0.5)                      # Attention qk scale
    keys = jax.random.split(key, n_layers + 1)
    layers = []
    for i in range(n_layers):
        k1, k2, k3, k4 = jax.random.split(keys[i], 4)
        wqkv = dense(k1, d_model, 3 * d_model)
        bqkv = jnp.zeros((1, 3 * d_model), jnp.float32)
        # Fold the q scale into the q columns once (zero runtime cost).
        wqkv = wqkv.at[:, :d_model].multiply(scale)
        bqkv = bqkv.at[:, :d_model].multiply(scale)
        layers.append({
            'ln1_g': jnp.ones((1, d_model), jnp.float32),
            'ln1_b': jnp.zeros((1, d_model), jnp.float32),
            'wqkv': wqkv,
            'bqkv': bqkv,
            'wproj': dense(k2, d_model, d_model),
            'bproj': jnp.zeros((1, d_model), jnp.float32),
            'ln2_g': jnp.ones((1, d_model), jnp.float32),
            'ln2_b': jnp.zeros((1, d_model), jnp.float32),
            'w1': dense(k3, d_model, d_hidden),
            'b1': jnp.zeros((1, d_hidden), jnp.float32),
            'w2': dense(k4, d_hidden, d_model),
            'b2': jnp.zeros((1, d_model), jnp.float32),
        })
    block = {
        'layers': layers,
        'reduce_w': dense(keys[-1], n_layers * d_model, d_model),
        'reduce_b': jnp.zeros((1, d_model), jnp.float32),
    }
    # _get_clones uses copy.deepcopy -> all blocks start with identical weights.
    return {
        'pos': sine_pos_embedding(d_model, H, W),
        'blocks': [block] * n_blocks,
    }


# ----------------------------------------------------------------------------
if __name__ == "__main__":
    d_model, d_hidden = 32, 64
    n_blocks, n_heads = 2, 2
    H, W = 8, 8
    group_list = (2, 4)          # each must divide H and W
    B = 2

    key = jax.random.PRNGKey(0)
    kx, kp = jax.random.split(key)
    # Stage.forward input convention: x = (hw, b, d_model)
    x = jax.random.normal(kx, (H * W, B, d_model), jnp.float32)

    params = init_stage_params(kp, d_model, d_hidden, n_blocks,
                               len(group_list), n_heads, H, W)

    fwd = jax.jit(functools.partial(stage_forward, H=H, W=W,
                                    group_list=group_list, num_heads=n_heads))
    out = jax.block_until_ready(fwd(x, params))
    assert out.shape == (H * W, B, d_model), out.shape
    assert bool(jnp.all(jnp.isfinite(out)))
    print("KERNEL_OK")
</pallas_src>

<mosaic_0001>
module attributes {stable_mosaic.version = 11 : i64} {
  func.func @_reduce_kernel(%arg0: i32, %arg1: memref<128x32xf32, #tpu.memory_space<vmem>>, %arg2: memref<128x32xf32, #tpu.memory_space<vmem>>, %arg3: memref<64x32xf32, #tpu.memory_space<vmem>>, %arg4: memref<1x32xf32, #tpu.memory_space<vmem>>, %arg5: memref<128x32xf32, #tpu.memory_space<vmem>>) attributes {dimension_semantics = [#tpu.dimension_semantics<parallel>], iteration_bounds = array<i64: 1>, scalar_prefetch = 0 : i64, scratch_operands = 0 : i64, tpu.core_type = #tpu.core_type<tc>, window_params = [{transform_indices = @transform_0, window_bounds = array<i64: 128, 32>}, {transform_indices = @transform_1, window_bounds = array<i64: 128, 32>}, {pipeline_mode = #tpu.pipeline_mode<synchronous>, transform_indices = @transform_2, window_bounds = array<i64: 64, 32>}, {pipeline_mode = #tpu.pipeline_mode<synchronous>, transform_indices = @transform_3, window_bounds = array<i64: 1, 32>}, {transform_indices = @transform_4, window_bounds = array<i64: 128, 32>}]} {
    %c0 = arith.constant 0 : index
    %c0_0 = arith.constant 0 : index
    %0 = vector.load %arg3[%c0, %c0_0] : memref<64x32xf32, #tpu.memory_space<vmem>>, vector<64x32xf32>
    %c0_1 = arith.constant 0 : index
    %c0_2 = arith.constant 0 : index
    %1 = vector.load %arg1[%c0_1, %c0_2] : memref<128x32xf32, #tpu.memory_space<vmem>>, vector<128x32xf32>
    %2 = vector.extract_strided_slice %0 {offsets = [0, 0], sizes = [32, 32], strides = [1, 1]} : vector<64x32xf32> to vector<32x32xf32>
    %cst = arith.constant dense<0.000000e+00> : vector<128x32xf32>
    %3 = tpu.matmul %1, %2, %cst {dimension_numbers = #tpu.dot_dimension_numbers<[1], [0], [0], [1], [0, 0, 1, 1], [], []>} : vector<128x32xf32>, vector<32x32xf32>, vector<128x32xf32> -> vector<128x32xf32>
    %c0_3 = arith.constant 0 : index
    %c0_4 = arith.constant 0 : index
    %4 = vector.load %arg2[%c0_3, %c0_4] : memref<128x32xf32, #tpu.memory_space<vmem>>, vector<128x32xf32>
    %5 = vector.extract_strided_slice %0 {offsets = [32, 0], sizes = [32, 32], strides = [1, 1]} : vector<64x32xf32> to vector<32x32xf32>
    %cst_5 = arith.constant dense<0.000000e+00> : vector<128x32xf32>
    %6 = tpu.matmul %4, %5, %cst_5 {dimension_numbers = #tpu.dot_dimension_numbers<[1], [0], [0], [1], [0, 0, 1, 1], [], []>} : vector<128x32xf32>, vector<32x32xf32>, vector<128x32xf32> -> vector<128x32xf32>
    %7 = arith.addf %3, %6 : vector<128x32xf32>
    %c0_6 = arith.constant 0 : index
    %c0_7 = arith.constant 0 : index
    %8 = vector.load %arg4[%c0_6, %c0_7] : memref<1x32xf32, #tpu.memory_space<vmem>>, vector<1x32xf32>
    %9 = vector.shape_cast %8 : vector<1x32xf32> to vector<32xf32>
    %10 = vector.shape_cast %9 : vector<32xf32> to vector<1x32xf32>
    %11 = vector.broadcast %10 : vector<1x32xf32> to vector<128x32xf32>
    %12 = arith.addf %7, %11 : vector<128x32xf32>
    %c0_8 = arith.constant 0 : index
    %c0_9 = arith.constant 0 : index
    %13 = vector.load %arg5[%c0_8, %c0_9] : memref<128x32xf32, #tpu.memory_space<vmem>>, vector<128x32xf32>
    tpu.vector_store %arg5[%c0_8, %c0_9], %12 {strides = array<i32>} : memref<128x32xf32, #tpu.memory_space<vmem>>, vector<128x32xf32>,
    return
  }
  func.func @transform_0(%arg0: i32) -> (i32, i32) {
    %c0_i32 = arith.constant 0 : i32
    %c0_i32_0 = arith.constant 0 : i32
    return %arg0, %c0_i32 : i32, i32
  }
  func.func @transform_1(%arg0: i32) -> (i32, i32) {
    %c0_i32 = arith.constant 0 : i32
    %c0_i32_0 = arith.constant 0 : i32
    return %arg0, %c0_i32 : i32, i32
  }
  func.func @transform_2(%arg0: i32) -> (i32, i32) {
    %c0_i32 = arith.constant 0 : i32
    %c0_i32_0 = arith.constant 0 : i32
    %c0_i32_1 = arith.constant 0 : i32
    return %c0_i32, %c0_i32_0 : i32, i32
  }
  func.func @transform_3(%arg0: i32) -> (i32, i32) {
    %c0_i32 = arith.constant 0 : i32
    %c0_i32_0 = arith.constant 0 : i32
    %c0_i32_1 = arith.constant 0 : i32
    return %c0_i32, %c0_i32_0 : i32, i32
  }
  func.func @transform_4(%arg0: i32) -> (i32, i32) {
    %c0_i32 = arith.constant 0 : i32
    %c0_i32_0 = arith.constant 0 : i32
    return %arg0, %c0_i32 : i32, i32
  }
}

module attributes {stable_mosaic.version = 11 : i64} {
  func.func @_encoder_layer_kernel(%arg0: i32, %arg1: memref<128x32xf32, #tpu.memory_space<vmem>>, %arg2: memref<128x1xi32, #tpu.memory_space<vmem>>, %arg3: memref<1x128xi32, #tpu.memory_space<vmem>>, %arg4: memref<1x32xf32, #tpu.memory_space<vmem>>, %arg5: memref<1x32xf32, #tpu.memory_space<vmem>>, %arg6: memref<32x96xf32, #tpu.memory_space<vmem>>, %arg7: memref<1x96xf32, #tpu.memory_space<vmem>>, %arg8: memref<32x32xf32, #tpu.memory_space<vmem>>, %arg9: memref<1x32xf32, #tpu.memory_space<vmem>>, %arg10: memref<1x32xf32, #tpu.memory_space<vmem>>, %arg11: memref<1x32xf32, #tpu.memory_space<vmem>>, %arg12: memref<32x64xf32, #tpu.memory_space<vmem>>, %arg13: memref<1x64xf32, #tpu.memory_space<vmem>>, %arg14: memref<64x32xf32, #tpu.memory_space<vmem>>, %arg15: memref<1x32xf32, #tpu.memory_space<vmem>>, %arg16: memref<128x32xf32, #tpu.memory_space<vmem>>) attributes {dimension_semantics = [#tpu.dimension_semantics<parallel>], iteration_bounds = array<i64: 1>, scalar_prefetch = 0 : i64, scratch_operands = 0 : i64, tpu.core_type = #tpu.core_type<tc>, window_params = [{transform_indices = @transform_0, window_bounds = array<i64: 128, 32>}, {transform_indices = @transform_1, window_bounds = array<i64: 128, 1>}, {transform_indices = @transform_2, window_bounds = array<i64: 1, 128>}, {pipeline_mode = #tpu.pipeline_mode<synchronous>, transform_indices = @transform_3, window_bounds = array<i64: 1, 32>}, {pipeline_mode = #tpu.pipeline_mode<synchronous>, transform_indices = @transform_4, window_bounds = array<i64: 1, 32>}, {pipeline_mode = #tpu.pipeline_mode<synchronous>, transform_indices = @transform_5, window_bounds = array<i64: 32, 96>}, {pipeline_mode = #tpu.pipeline_mode<synchronous>, transform_indices = @transform_6, window_bounds = array<i64: 1, 96>}, {pipeline_mode = #tpu.pipeline_mode<synchronous>, transform_indices = @transform_7, window_bounds = array<i64: 32, 32>}, {pipeline_mode = #tpu.pipeline_mode<synchronous>, transform_indices = @transform_8, window_bounds = array<i64: 1, 32>}, {pipeline_mode = #tpu.pipeline_mode<synchronous>, transform_indices = @transform_9, window_bounds = array<i64: 1, 32>}, {pipeline_mode = #tpu.pipeline_mode<synchronous>, transform_indices = @transform_10, window_bounds = array<i64: 1, 32>}, {pipeline_mode = #tpu.pipeline_mode<synchronous>, transform_indices = @transform_11, window_bounds = array<i64: 32, 64>}, {pipeline_mode = #tpu.pipeline_mode<synchronous>, transform_indices = @transform_12, window_bounds = array<i64: 1, 64>}, {pipeline_mode = #tpu.pipeline_mode<synchronous>, transform_indices = @transform_13, window_bounds = array<i64: 64, 32>}, {pipeline_mode = #tpu.pipeline_mode<synchronous>, transform_indices = @transform_14, window_bounds = array<i64: 1, 32>}, {transform_indices = @transform_15, window_bounds = array<i64: 128, 32>}]} {
    %c0 = arith.constant 0 : index
    %c0_0 = arith.constant 0 : index
    %0 = vector.load %arg1[%c0, %c0_0] : memref<128x32xf32, #tpu.memory_space<vmem>>, vector<128x32xf32>
    %c0_1 = arith.constant 0 : index
    %c0_2 = arith.constant 0 : index
    %1 = vector.load %arg4[%c0_1, %c0_2] : memref<1x32xf32, #tpu.memory_space<vmem>>, vector<1x32xf32>
    %2 = vector.shape_cast %1 : vector<1x32xf32> to vector<32xf32>
    %c0_3 = arith.constant 0 : index
    %c0_4 = arith.constant 0 : index
    %3 = vector.load %arg5[%c0_3, %c0_4] : memref<1x32xf32, #tpu.memory_space<vmem>>, vector<1x32xf32>
    %4 = vector.shape_cast %3 : vector<1x32xf32> to vector<32xf32>
    %cst = arith.constant dense<0.000000e+00> : vector<128xf32>
    %5 = vector.multi_reduction <add>, %0, %cst [1] : vector<128x32xf32> to vector<128xf32>
    %6 = vector.shape_cast %5 : vector<128xf32> to vector<128x1xf32>
    %cst_5 = arith.constant 3.200000e+01 : f32
    %7 = vector.broadcast %cst_5 : f32 to vector<128x1xf32>
    %8 = arith.divf %6, %7 : vector<128x1xf32>
    %9 = vector.broadcast %8 : vector<128x1xf32> to vector<128x32xf32>
    %10 = arith.subf %0, %9 : vector<128x32xf32>
    %11 = arith.mulf %10, %10 : vector<128x32xf32>
    %cst_6 = arith.constant dense<0.000000e+00> : vector<128xf32>
    %12 = vector.multi_reduction <add>, %11, %cst_6 [1] : vector<128x32xf32> to vector<128xf32>
    %13 = vector.shape_cast %12 : vector<128xf32> to vector<128x1xf32>
    %cst_7 = arith.constant 3.200000e+01 : f32
    %14 = vector.broadcast %cst_7 : f32 to vector<128x1xf32>
    %15 = arith.divf %13, %14 : vector<128x1xf32>
    %16 = vector.broadcast %8 : vector<128x1xf32> to vector<128x32xf32>
    %17 = arith.subf %0, %16 : vector<128x32xf32>
    %cst_8 = arith.constant 9.99999974E-6 : f32
    %18 = vector.broadcast %cst_8 : f32 to vector<128x1xf32>
    %19 = arith.addf %15, %18 : vector<128x1xf32>
    %20 = math.rsqrt %19 : vector<128x1xf32>
    %21 = vector.broadcast %20 : vector<128x1xf32> to vector<128x32xf32>
    %22 = arith.mulf %17, %21 : vector<128x32xf32>
    %23 = vector.shape_cast %2 : vector<32xf32> to vector<1x32xf32>
    %24 = vector.broadcast %23 : vector<1x32xf32> to vector<128x32xf32>
    %25 = arith.mulf %22, %24 : vector<128x32xf32>
    %26 = vector.shape_cast %4 : vector<32xf32> to vector<1x32xf32>
    %27 = vector.broadcast %26 : vector<1x32xf32> to vector<128x32xf32>
    %28 = arith.addf %25, %27 : vector<128x32xf32>
    %c0_9 = arith.constant 0 : index
    %c0_10 = arith.constant 0 : index
    %29 = vector.load %arg6[%c0_9, %c0_10] : memref<32x96xf32, #tpu.memory_space<vmem>>, vector<32x96xf32>
    %cst_11 = arith.constant dense<0.000000e+00> : vector<128x96xf32>
    %30 = tpu.matmul %28, %29, %cst_11 {dimension_numbers = #tpu.dot_dimension_numbers<[1], [0], [0], [1], [0, 0, 1, 1], [], []>} : vector<128x32xf32>, vector<32x96xf32>, vector<128x96xf32> -> vector<128x96xf32>
    %c0_12 = arith.constant 0 : index
    %c0_13 = arith.constant 0 : index
    %31 = vector.load %arg7[%c0_12, %c0_13] : memref<1x96xf32, #tpu.memory_space<vmem>>, vector<1x96xf32>
    %32 = vector.shape_cast %31 : vector<1x96xf32> to vector<96xf32>
    %33 = vector.shape_cast %32 : vector<96xf32> to vector<1x96xf32>
    %34 = vector.broadcast %33 : vector<1x96xf32> to vector<128x96xf32>
    %35 = arith.addf %30, %34 : vector<128x96xf32>
    %c0_14 = arith.constant 0 : index
    %c0_15 = arith.constant 0 : index
    %36 = vector.load %arg2[%c0_14, %c0_15] : memref<128x1xi32, #tpu.memory_space<vmem>>, vector<128x1xi32>
    %c0_16 = arith.constant 0 : index
    %c0_17 = arith.constant 0 : index
    %37 = vector.load %arg3[%c0_16, %c0_17] : memref<1x128xi32, #tpu.memory_space<vmem>>, vector<1x128xi32>
    %38 = vector.broadcast %36 : vector<128x1xi32> to vector<128x128xi32>
    %39 = vector.broadcast %37 : vector<1x128xi32> to vector<128x128xi32>
    %40 = arith.cmpi eq, %38, %39 : vector<128x128xi32>
    %c0_18 = arith.constant 0 : index
    %c0_19 = arith.constant 0 : index
    %41 = vector.load %arg8[%c0_18, %c0_19] : memref<32x32xf32, #tpu.memory_space<vmem>>, vector<32x32xf32>
    %cst_20 = arith.constant 0.000000e+00 : f32
    %42 = vector.broadcast %cst_20 : f32 to vector<128x32xf32>
    %43 = vector.extract_strided_slice %35 {offsets = [0, 0], sizes = [128, 16], strides = [1, 1]} : vector<128x96xf32> to vector<128x16xf32>
    %44 = vector.extract_strided_slice %35 {offsets = [0, 32], sizes = [128, 16], strides = [1, 1]} : vector<128x96xf32> to vector<128x16xf32>
    %45 = vector.extract_strided_slice %35 {offsets = [0, 64], sizes = [128, 16], strides = [1, 1]} : vector<128x96xf32> to vector<128x16xf32>
    %cst_21 = arith.constant dense<0.000000e+00> : vector<128x128xf32>
    %46 = tpu.matmul %43, %44, %cst_21 {dimension_numbers = #tpu.dot_dimension_numbers<[1], [1], [0], [0], [0, 0, 1, 0], [], []>} : vector<128x16xf32>, vector<128x16xf32>, vector<128x128xf32> -> vector<128x128xf32>
    %cst_22 = arith.constant -1.000000e+30 : f32
    %47 = vector.broadcast %cst_22 : f32 to vector<128x128xf32>
    %48 = arith.select %40, %46, %47 : vector<128x128xi1>, vector<128x128xf32>
    %cst_23 = arith.constant dense<0xFF800000> : vector<128xf32>
    %49 = vector.multi_reduction <maximumf>, %48, %cst_23 [1] : vector<128x128xf32> to vector<128xf32>
    %50 = vector.shape_cast %49 : vector<128xf32> to vector<128x1xf32>
    %51 = vector.broadcast %50 : vector<128x1xf32> to vector<128x128xf32>
    %52 = arith.subf %48, %51 : vector<128x128xf32>
    %53 = math.exp %52 : vector<128x128xf32>
    %cst_24 = arith.constant dense<0.000000e+00> : vector<128xf32>
    %54 = vector.multi_reduction <add>, %53, %cst_24 [1] : vector<128x128xf32> to vector<128xf32>
    %55 = vector.shape_cast %54 : vector<128xf32> to vector<128x1xf32>
    %56 = tpu.reciprocal %55 {approx = true} : vector<128x1xf32> -> vector<128x1xf32>
    %57 = vector.broadcast %56 : vector<128x1xf32> to vector<128x128xf32>
    %58 = arith.mulf %53, %57 : vector<128x128xf32>
    %cst_25 = arith.constant dense<0.000000e+00> : vector<128x16xf32>
    %59 = tpu.matmul %58, %45, %cst_25 {dimension_numbers = #tpu.dot_dimension_numbers<[1], [0], [0], [1], [0, 0, 1, 1], [], []>} : vector<128x128xf32>, vector<128x16xf32>, vector<128x16xf32> -> vector<128x16xf32>
    %60 = vector.extract_strided_slice %41 {offsets = [0, 0], sizes = [16, 32], strides = [1, 1]} : vector<32x32xf32> to vector<16x32xf32>
    %cst_26 = arith.constant dense<0.000000e+00> : vector<128x32xf32>
    %61 = tpu.matmul %59, %60, %cst_26 {dimension_numbers = #tpu.dot_dimension_numbers<[1], [0], [0], [1], [0, 0, 1, 1], [], []>} : vector<128x16xf32>, vector<16x32xf32>, vector<128x32xf32> -> vector<128x32xf32>
    %62 = arith.addf %42, %61 : vector<128x32xf32>
    %63 = vector.extract_strided_slice %35 {offsets = [0, 16], sizes = [128, 16], strides = [1, 1]} : vector<128x96xf32> to vector<128x16xf32>
    %64 = vector.extract_strided_slice %35 {offsets = [0, 48], sizes = [128, 16], strides = [1, 1]} : vector<128x96xf32> to vector<128x16xf32>
    %65 = vector.extract_strided_slice %35 {offsets = [0, 80], sizes = [128, 16], strides = [1, 1]} : vector<128x96xf32> to vector<128x16xf32>
    %cst_27 = arith.constant dense<0.000000e+00> : vector<128x128xf32>
    %66 = tpu.matmul %63, %64, %cst_27 {dimension_numbers = #tpu.dot_dimension_numbers<[1], [1], [0], [0], [0, 0, 1, 0], [], []>} : vector<128x16xf32>, vector<128x16xf32>, vector<128x128xf32> -> vector<128x128xf32>
    %cst_28 = arith.constant -1.000000e+30 : f32
    %67 = vector.broadcast %cst_28 : f32 to vector<128x128xf32>
    %68 = arith.select %40, %66, %67 : vector<128x128xi1>, vector<128x128xf32>
    %cst_29 = arith.constant dense<0xFF800000> : vector<128xf32>
    %69 = vector.multi_reduction <maximumf>, %68, %cst_29 [1] : vector<128x128xf32> to vector<128xf32>
    %70 = vector.shape_cast %69 : vector<128xf32> to vector<128x1xf32>
    %71 = vector.broadcast %70 : vector<128x1xf32> to vector<128x128xf32>
    %72 = arith.subf %68, %71 : vector<128x128xf32>
    %73 = math.exp %72 : vector<128x128xf32>
    %cst_30 = arith.constant dense<0.000000e+00> : vector<128xf32>
    %74 = vector.multi_reduction <add>, %73, %cst_30 [1] : vector<128x128xf32> to vector<128xf32>
    %75 = vector.shape_cast %74 : vector<128xf32> to vector<128x1xf32>
    %76 = tpu.reciprocal %75 {approx = true} : vector<128x1xf32> -> vector<128x1xf32>
    %77 = vector.broadcast %76 : vector<128x1xf32> to vector<128x128xf32>
    %78 = arith.mulf %73, %77 : vector<128x128xf32>
    %cst_31 = arith.constant dense<0.000000e+00> : vector<128x16xf32>
    %79 = tpu.matmul %78, %65, %cst_31 {dimension_numbers = #tpu.dot_dimension_numbers<[1], [0], [0], [1], [0, 0, 1, 1], [], []>} : vector<128x128xf32>, vector<128x16xf32>, vector<128x16xf32> -> vector<128x16xf32>
    %80 = vector.extract_strided_slice %41 {offsets = [16, 0], sizes = [16, 32], strides = [1, 1]} : vector<32x32xf32> to vector<16x32xf32>
    %cst_32 = arith.constant dense<0.000000e+00> : vector<128x32xf32>
    %81 = tpu.matmul %79, %80, %cst_32 {dimension_numbers = #tpu.dot_dimension_numbers<[1], [0], [0], [1], [0, 0, 1, 1], [], []>} : vector<128x16xf32>, vector<16x32xf32>, vector<128x32xf32> -> vector<128x32xf32>
    %82 = arith.addf %62, %81 : vector<128x32xf32>
    %83 = arith.addf %0, %82 : vector<128x32xf32>
    %c0_33 = arith.constant 0 : index
    %c0_34 = arith.constant 0 : index
    %84 = vector.load %arg9[%c0_33, %c0_34] : memref<1x32xf32, #tpu.memory_space<vmem>>, vector<1x32xf32>
    %85 = vector.shape_cast %84 : vector<1x32xf32> to vector<32xf32>
    %86 = vector.shape_cast %85 : vector<32xf32> to vector<1x32xf32>
    %87 = vector.broadcast %86 : vector<1x32xf32> to vector<128x32xf32>
    %88 = arith.addf %83, %87 : vector<128x32xf32>
    %c0_35 = arith.constant 0 : index
    %c0_36 = arith.constant 0 : index
    %89 = vector.load %arg10[%c0_35, %c0_36] : memref<1x32xf32, #tpu.memory_space<vmem>>, vector<1x32xf32>
    %90 = vector.shape_cast %89 : vector<1x32xf32> to vector<32xf32>
    %c0_37 = arith.constant 0 : index
    %c0_38 = arith.constant 0 : index
    %91 = vector.load %arg11[%c0_37, %c0_38] : memref<1x32xf32, #tpu.memory_space<vmem>>, vector<1x32xf32>
    %92 = vector.shape_cast %91 : vector<1x32xf32> to vector<32xf32>
    %cst_39 = arith.constant dense<0.000000e+00> : vector<128xf32>
    %93 = vector.multi_reduction <add>, %88, %cst_39 [1] : vector<128x32xf32> to vector<128xf32>
    %94 = vector.shape_cast %93 : vector<128xf32> to vector<128x1xf32>
    %cst_40 = arith.constant 3.200000e+01 : f32
    %95 = vector.broadcast %cst_40 : f32 to vector<128x1xf32>
    %96 = arith.divf %94, %95 : vector<128x1xf32>
    %97 = vector.broadcast %96 : vector<128x1xf32> to vector<128x32xf32>
    %98 = arith.subf %88, %97 : vector<128x32xf32>
    %99 = arith.mulf %98, %98 : vector<128x32xf32>
    %cst_41 = arith.constant dense<0.000000e+00> : vector<128xf32>
    %100 = vector.multi_reduction <add>, %99, %cst_41 [1] : vector<128x32xf32> to vector<128xf32>
    %101 = vector.shape_cast %100 : vector<128xf32> to vector<128x1xf32>
    %cst_42 = arith.constant 3.200000e+01 : f32
    %102 = vector.broadcast %cst_42 : f32 to vector<128x1xf32>
    %103 = arith.divf %101, %102 : vector<128x1xf32>
    %104 = vector.broadcast %96 : vector<128x1xf32> to vector<128x32xf32>
    %105 = arith.subf %88, %104 : vector<128x32xf32>
    %cst_43 = arith.constant 9.99999974E-6 : f32
    %106 = vector.broadcast %cst_43 : f32 to vector<128x1xf32>
    %107 = arith.addf %103, %106 : vector<128x1xf32>
    %108 = math.rsqrt %107 : vector<128x1xf32>
    %109 = vector.broadcast %108 : vector<128x1xf32> to vector<128x32xf32>
    %110 = arith.mulf %105, %109 : vector<128x32xf32>
    %111 = vector.shape_cast %90 : vector<32xf32> to vector<1x32xf32>
    %112 = vector.broadcast %111 : vector<1x32xf32> to vector<128x32xf32>
    %113 = arith.mulf %110, %112 : vector<128x32xf32>
    %114 = vector.shape_cast %92 : vector<32xf32> to vector<1x32xf32>
    %115 = vector.broadcast %114 : vector<1x32xf32> to vector<128x32xf32>
    %116 = arith.addf %113, %115 : vector<128x32xf32>
    %c0_44 = arith.constant 0 : index
    %c0_45 = arith.constant 0 : index
    %117 = vector.load %arg12[%c0_44, %c0_45] : memref<32x64xf32, #tpu.memory_space<vmem>>, vector<32x64xf32>
    %cst_46 = arith.constant dense<0.000000e+00> : vector<128x64xf32>
    %118 = tpu.matmul %116, %117, %cst_46 {dimension_numbers = #tpu.dot_dimension_numbers<[1], [0], [0], [1], [0, 0, 1, 1], [], []>} : vector<128x32xf32>, vector<32x64xf32>, vector<128x64xf32> -> vector<128x64xf32>
    %c0_47 = arith.constant 0 : index
    %c0_48 = arith.constant 0 : index
    %119 = vector.load %arg13[%c0_47, %c0_48] : memref<1x64xf32, #tpu.memory_space<vmem>>, vector<1x64xf32>
    %120 = vector.shape_cast %119 : vector<1x64xf32> to vector<64xf32>
    %121 = vector.shape_cast %120 : vector<64xf32> to vector<1x64xf32>
    %122 = vector.broadcast %121 : vector<1x64xf32> to vector<128x64xf32>
    %123 = arith.addf %118, %122 : vector<128x64xf32>
    %cst_49 = arith.constant 0.000000e+00 : f32
    %124 = vector.broadcast %cst_49 : f32 to vector<128x64xf32>
    %125 = arith.maximumf %123, %124 : vector<128x64xf32>
    %c0_50 = arith.constant 0 : index
    %c0_51 = arith.constant 0 : index
    %126 = vector.load %arg14[%c0_50, %c0_51] : memref<64x32xf32, #tpu.memory_space<vmem>>, vector<64x32xf32>
    %cst_52 = arith.constant dense<0.000000e+00> : vector<128x32xf32>
    %127 = tpu.matmul %125, %126, %cst_52 {dimension_numbers = #tpu.dot_dimension_numbers<[1], [0], [0], [1], [0, 0, 1, 1], [], []>} : vector<128x64xf32>, vector<64x32xf32>, vector<128x32xf32> -> vector<128x32xf32>
    %c0_53 = arith.constant 0 : index
    %c0_54 = arith.constant 0 : index
    %128 = vector.load %arg15[%c0_53, %c0_54] : memref<1x32xf32, #tpu.memory_space<vmem>>, vector<1x32xf32>
    %129 = vector.shape_cast %128 : vector<1x32xf32> to vector<32xf32>
    %130 = vector.shape_cast %129 : vector<32xf32> to vector<1x32xf32>
    %131 = vector.broadcast %130 : vector<1x32xf32> to vector<128x32xf32>
    %132 = arith.addf %127, %131 : vector<128x32xf32>
    %133 = arith.addf %88, %132 : vector<128x32xf32>
    %c0_55 = arith.constant 0 : index
    %c0_56 = arith.constant 0 : index
    %134 = vector.load %arg16[%c0_55, %c0_56] : memref<128x32xf32, #tpu.memory_space<vmem>>, vector<128x32xf32>
    tpu.vector_store %arg16[%c0_55, %c0_56], %133 {strides = array<i32>} : memref<128x32xf32, #tpu.memory_space<vmem>>, vector<128x32xf32>,
    return
  }
  func.func @transform_0(%arg0: i32) -> (i32, i32) {
    %c0_i32 = arith.constant 0 : i32
    %c0_i32_0 = arith.constant 0 : i32
    return %arg0, %c0_i32 : i32, i32
  }
  func.func @transform_1(%arg0: i32) -> (i32, i32) {
    %c0_i32 = arith.constant 0 : i32
    %c0_i32_0 = arith.constant 0 : i32
    return %arg0, %c0_i32 : i32, i32
  }
  func.func @transform_2(%arg0: i32) -> (i32, i32) {
    %c0_i32 = arith.constant 0 : i32
    %c0_i32_0 = arith.constant 0 : i32
    return %c0_i32, %arg0 : i32, i32
  }
  func.func @transform_3(%arg0: i32) -> (i32, i32) {
    %c0_i32 = arith.constant 0 : i32
    %c0_i32_0 = arith.constant 0 : i32
    %c0_i32_1 = arith.constant 0 : i32
    return %c0_i32, %c0_i32_0 : i32, i32
  }
  func.func @transform_4(%arg0: i32) -> (i32, i32) {
    %c0_i32 = arith.constant 0 : i32
    %c0_i32_0 = arith.constant 0 : i32
    %c0_i32_1 = arith.constant 0 : i32
    return %c0_i32, %c0_i32_0 : i32, i32
  }
  func.func @transform_5(%arg0: i32) -> (i32, i32) {
    %c0_i32 = arith.constant 0 : i32
    %c0_i32_0 = arith.constant 0 : i32
    %c0_i32_1 = arith.constant 0 : i32
    return %c0_i32, %c0_i32_0 : i32, i32
  }
  func.func @transform_6(%arg0: i32) -> (i32, i32) {
    %c0_i32 = arith.constant 0 : i32
    %c0_i32_0 = arith.constant 0 : i32
    %c0_i32_1 = arith.constant 0 : i32
    return %c0_i32, %c0_i32_0 : i32, i32
  }
  func.func @transform_7(%arg0: i32) -> (i32, i32) {
    %c0_i32 = arith.constant 0 : i32
    %c0_i32_0 = arith.constant 0 : i32
    %c0_i32_1 = arith.constant 0 : i32
    return %c0_i32, %c0_i32_0 : i32, i32
  }
  func.func @transform_8(%arg0: i32) -> (i32, i32) {
    %c0_i32 = arith.constant 0 : i32
    %c0_i32_0 = arith.constant 0 : i32
    %c0_i32_1 = arith.constant 0 : i32
    return %c0_i32, %c0_i32_0 : i32, i32
  }
  func.func @transform_9(%arg0: i32) -> (i32, i32) {
    %c0_i32 = arith.constant 0 : i32
    %c0_i32_0 = arith.constant 0 : i32
    %c0_i32_1 = arith.constant 0 : i32
    return %c0_i32, %c0_i32_0 : i32, i32
  }
  func.func @transform_10(%arg0: i32) -> (i32, i32) {
    %c0_i32 = arith.constant 0 : i32
    %c0_i32_0 = arith.constant 0 : i32
    %c0_i32_1 = arith.constant 0 : i32
    return %c0_i32, %c0_i32_0 : i32, i32
  }
  func.func @transform_11(%arg0: i32) -> (i32, i32) {
    %c0_i32 = arith.constant 0 : i32
    %c0_i32_0 = arith.constant 0 : i32
    %c0_i32_1 = arith.constant 0 : i32
    return %c0_i32, %c0_i32_0 : i32, i32
  }
  func.func @transform_12(%arg0: i32) -> (i32, i32) {
    %c0_i32 = arith.constant 0 : i32
    %c0_i32_0 = arith.constant 0 : i32
    %c0_i32_1 = arith.constant 0 : i32
    return %c0_i32, %c0_i32_0 : i32, i32
  }
  func.func @transform_13(%arg0: i32) -> (i32, i32) {
    %c0_i32 = arith.constant 0 : i32
    %c0_i32_0 = arith.constant 0 : i32
    %c0_i32_1 = arith.constant 0 : i32
    return %c0_i32, %c0_i32_0 : i32, i32
  }
  func.func @transform_14(%arg0: i32) -> (i32, i32) {
    %c0_i32 = arith.constant 0 : i32
    %c0_i32_0 = arith.constant 0 : i32
    %c0_i32_1 = arith.constant 0 : i32
    return %c0_i32, %c0_i32_0 : i32, i32
  }
  func.func @transform_15(%arg0: i32) -> (i32, i32) {
    %c0_i32 = arith.constant 0 : i32
    %c0_i32_0 = arith.constant 0 : i32
    return %arg0, %c0_i32 : i32, i32
  }
}

</mosaic_0001>

<bundles_post_ra>
// kernel: stage_forward.8
= control target key start
LH: loop header
LB: loop body
LE: loop exit
PB: predicated region body
PF: predicated region fallthrough
CT: control target
= control target key end

     0   :  { %vm57_vm0 = vcmask 261120   ;;  %s918_s2 = inlined_call_operand.vmem [shape: f32[64,32], index: 2, kind: input, shape index: {}]   ;;  %s919_s1 = inlined_call_operand.vmem [shape: f32[128,32], index: 1, kind: input, shape index: {}]   ;;  %s920_s0 = inlined_call_operand.vmem [shape: f32[128,32], index: 0, kind: input, shape index: {}]   ;;  %s921_s3 = inlined_call_operand.vmem [shape: f32[1,32], index: 3, kind: input, shape index: {}]   ;;  %s922_s4 = inlined_call_operand.vmem [shape: f32[128,32], index: 4, kind: output, shape index: {}]  }
   0x1   :  { %v21_v0 = vld [vmem:[%s918_s2 + $0x20] sm:$0xff]  ;;  %v22_v1 = vld [vmem:[%s918_s2 + $0x28] sm:$0xff]  ;;  %v23_v5 = vld [vmem:[%s918_s2 + $0x30] sm:$0xff] }
   0x2   :  { %v17_v2 = vld [vmem:[%s918_s2] sm:$0xff]  ;;  %v624_v3 = vpack.c.bf16 %v22_v1, %v21_v0  ;;  %v18_v4 = vld [vmem:[%s918_s2 + $0x8] sm:$0xff]  ;;  %v24_v6 = vld [vmem:[%s918_s2 + $0x38] sm:$0xff] }
   0x3   :  { %v632_v7 = vpack.c.bf16 %v18_v4, %v17_v2  ;;  %v628_v8 = vpack.c.bf16 %v24_v6, %v23_v5  ;;  %v19_v9 = vld [vmem:[%s918_s2 + $0x10] sm:$0xff]  ;;  %v20_v10 = vld [vmem:[%s918_s2 + $0x18] sm:$0xff]  ;;  %v41_v11 = vld [vmem:[%s919_s1] sm:$0xff] }
   0x4   :  { %625 = vmatprep.subr.bf16.mxu1 %v624_v3  ;;  %v636_v12 = vpack.c.bf16 %v20_v10, %v19_v9  ;;  %568 = vmatprep.mubr.msk.f32.mxu1 %vm57_vm0, %v41_v11  ;;  %v25_v13 = vld [vmem:[%s920_s0] sm:$0xff]  ;;  %v42_v14 = vld [vmem:[%s919_s1 + $0x8] sm:$0xff]  ;;  %v43_v16 = vld [vmem:[%s919_s1 + $0x10] sm:$0xff] }
   0x5   :  { %633 = vmatprep.subr.bf16.mxu0 %v632_v7  ;;  %627 = vmatpush3.bf16.msra.mxu1 %v624_v3  ;;  %v26_v15 = vld [vmem:[%s920_s0 + $0x8] sm:$0xff]  ;;  %v27_v17 = vld [vmem:[%s920_s0 + $0x10] sm:$0xff]  ;;  %v44_v18 = vld [vmem:[%s919_s1 + $0x18] sm:$0xff] }
   0x6   :  { %635 = vmatpush3.bf16.msra.mxu0 %v632_v7  ;;  %629 = vmatprep.subr.bf16.mxu1 %v628_v8  ;;  %v28_v19 = vld [vmem:[%s920_s0 + $0x18] sm:$0xff]  ;;  %v45_v20 = vld [vmem:[%s919_s1 + $0x20] sm:$0xff]  ;;  %v46_v22 = vld [vmem:[%s919_s1 + $0x28] sm:$0xff] }
   0x7   :  { %637 = vmatprep.subr.bf16.mxu0 %v636_v12  ;;  %600 = vmatprep.mubr.msk.f32.mxu0 %vm57_vm0, %v25_v13  ;;  %v29_v21 = vld [vmem:[%s920_s0 + $0x20] sm:$0xff]  ;;  %v30_v23 = vld [vmem:[%s920_s0 + $0x28] sm:$0xff]  ;;  %v47_v24 = vld [vmem:[%s919_s1 + $0x30] sm:$0xff] }
   0x8   :  { %v31_v25 = vld [vmem:[%s920_s0 + $0x30] sm:$0xff]  ;;  %v48_v26 = vld [vmem:[%s919_s1 + $0x38] sm:$0xff]  ;;  %v49_v28 = vld [vmem:[%s919_s1 + $0x40] sm:$0xff] }
   0x9   :  { %631 = vmatpush3.bf16.msra.mxu1 %v628_v8  ;;  %v32_v27 = vld [vmem:[%s920_s0 + $0x38] sm:$0xff]  ;;  %v33_v29 = vld [vmem:[%s920_s0 + $0x40] sm:$0xff]  ;;  %v50_v30 = vld [vmem:[%s919_s1 + $0x48] sm:$0xff] }
   0xa   :  { %639 = vmatpush3.bf16.msra.mxu0 %v636_v12  ;;  %v34_v31 = vld [vmem:[%s920_s0 + $0x48] sm:$0xff]  ;;  %v51_v32 = vld [vmem:[%s919_s1 + $0x50] sm:$0xff]  ;;  %v52_v34 = vld [vmem:[%s919_s1 + $0x58] sm:$0xff] }
   0xb   :  { %v35_v33 = vld [vmem:[%s920_s0 + $0x50] sm:$0xff]  ;;  %v36_v35 = vld [vmem:[%s920_s0 + $0x58] sm:$0xff]  ;;  %v53_v36 = vld [vmem:[%s919_s1 + $0x60] sm:$0xff] }
   0xc   :  { %569 = vmatmul.mubr.msk.f32.vlgmr.msra.gmra.mrb[0].mxu1 %vm57_vm0, %v42_v14  ;;  %v37_v37 = vld [vmem:[%s920_s0 + $0x60] sm:$0xff]  ;;  %v54_v38 = vld [vmem:[%s919_s1 + $0x68] sm:$0xff]  ;;  %v55_v40 = vld [vmem:[%s919_s1 + $0x70] sm:$0xff] }
   0xd   :  { %601 = vmatmul.mubr.msk.f32.vlgmr.msra.gmra.mrb[0].mxu0 %vm57_vm0, %v26_v15  ;;  %571 = vmatprep.mubr.msk.f32.mxu1 %vm57_vm0, %v43_v16  ;;  %v38_v39 = vld [vmem:[%s920_s0 + $0x68] sm:$0xff]  ;;  %v39_v41 = vld [vmem:[%s920_s0 + $0x70] sm:$0xff]  ;;  %v56_v42 = vld [vmem:[%s919_s1 + $0x78] sm:$0xff] }
   0xe   :  { %603 = vmatprep.mubr.msk.f32.mxu0 %vm57_vm0, %v27_v17  ;;  %v40_v43 = vld [vmem:[%s920_s0 + $0x78] sm:$0xff]  ;;  %v836_v46 = vld [vmem:[%s921_s3] ss:$0 sm:$0xff] }
  0x10   :  { %572 = vmatmul.mubr.msk.f32.gmra.mrb[2].mxu1 %vm57_vm0, %v44_v18 }
  0x11   :  { %604 = vmatmul.mubr.msk.f32.gmra.mrb[2].mxu0 %vm57_vm0, %v28_v19  ;;  %574 = vmatprep.mubr.msk.f32.mxu1 %vm57_vm0, %v45_v20 }
  0x12   :  { %606 = vmatprep.mubr.msk.f32.mxu0 %vm57_vm0, %v29_v21 }
  0x14   :  { %575 = vmatmul.mubr.msk.f32.gmra.mrb[4].mxu1 %vm57_vm0, %v46_v22 }
  0x15   :  { %607 = vmatmul.mubr.msk.f32.gmra.mrb[4].mxu0 %vm57_vm0, %v30_v23  ;;  %577 = vmatprep.mubr.msk.f32.mxu1 %vm57_vm0, %v47_v24 }
  0x16   :  { %609 = vmatprep.mubr.msk.f32.mxu0 %vm57_vm0, %v31_v25 }
  0x18   :  { %578 = vmatmul.mubr.msk.f32.gmra.mrb[6].mxu1 %vm57_vm0, %v48_v26 }
  0x19   :  { %610 = vmatmul.mubr.msk.f32.gmra.mrb[6].mxu0 %vm57_vm0, %v32_v27  ;;  %580 = vmatprep.mubr.msk.f32.mxu1 %vm57_vm0, %v49_v28 }
  0x1a   :  { %612 = vmatprep.mubr.msk.f32.mxu0 %vm57_vm0, %v33_v29 }
  0x1c   :  { %581 = vmatmul.mubr.msk.f32.gmra.mrb[8].mxu1 %vm57_vm0, %v50_v30 }
  0x1d   :  { %613 = vmatmul.mubr.msk.f32.gmra.mrb[8].mxu0 %vm57_vm0, %v34_v31  ;;  %583 = vmatprep.mubr.msk.f32.mxu1 %vm57_vm0, %v51_v32 }
  0x1e   :  { %615 = vmatprep.mubr.msk.f32.mxu0 %vm57_vm0, %v35_v33 }
  0x20   :  { %584 = vmatmul.mubr.msk.f32.gmra.mrb[10].mxu1 %vm57_vm0, %v52_v34 }
  0x21   :  { %616 = vmatmul.mubr.msk.f32.gmra.mrb[10].mxu0 %vm57_vm0, %v36_v35  ;;  %586 = vmatprep.mubr.msk.f32.mxu1 %vm57_vm0, %v53_v36 }
  0x22   :  { %618 = vmatprep.mubr.msk.f32.mxu0 %vm57_vm0, %v37_v37 }
  0x24   :  { %587 = vmatmul.mubr.msk.f32.gmra.mrb[12].mxu1 %vm57_vm0, %v54_v38 }
  0x25   :  { %619 = vmatmul.mubr.msk.f32.gmra.mrb[12].mxu0 %vm57_vm0, %v38_v39  ;;  %589 = vmatprep.mubr.msk.f32.mxu1 %vm57_vm0, %v55_v40 }
  0x26   :  { %621 = vmatprep.mubr.msk.f32.mxu0 %vm57_vm0, %v39_v41 }
  0x28   :  { %590 = vmatmul.mubr.msk.f32.gmra.mrb[14].mxu1 %vm57_vm0, %v56_v42 }
  0x29   :  { %622 = vmatmul.mubr.msk.f32.gmra.mrb[14].mxu0 %vm57_vm0, %v40_v43 }
  0xdf   :  { %v570_v44 = vpop.f32.mrb[0].mxu1 }
  0xe0   :  { %v602_v45 = vpop.f32.mrb[0].mxu0  ;;  %v172_v47 = vpop.f32.mrb[1].mxu1 }
  0xe1   :  { %v371_v48 = vadd.f32 %v602_v45, %v570_v44  ;;  %v365_v49 = vpop.f32.mrb[1].mxu0 }
  0xe2   :  { %v366_v50 = vadd.f32 %v365_v49, %v172_v47 }
  0xe3   :  { %v452_v51 = vadd.f32 %v836_v46, %v371_v48  ;;  %v573_v52 = vpop.f32.mrb[2].mxu1 }
  0xe4   :  { %v451_v53 = vadd.f32 %v836_v46, %v366_v50  ;;  %v605_v54 = vpop.f32.mrb[2].mxu0  ;;  %v182_v55 = vpop.f32.mrb[3].mxu1 }
  0xe5   :  { %468 = vst.msk [vmem:[%s922_s4 + $0x8] sm:$0xff] %vm57_vm0, %v452_v51  ;;  %v381_v56 = vadd.f32 %v605_v54, %v573_v52  ;;  %v375_v57 = vpop.f32.mrb[3].mxu0 }
  0xe6   :  { %467 = vst.msk [vmem:[%s922_s4] sm:$0xff] %vm57_vm0, %v451_v53  ;;  %v376_v58 = vadd.f32 %v375_v57, %v182_v55 }
  0xe7   :  { %v454_v59 = vadd.f32 %v836_v46, %v381_v56  ;;  %v576_v60 = vpop.f32.mrb[4].mxu1 }
  0xe8   :  { %v453_v61 = vadd.f32 %v836_v46, %v376_v58  ;;  %v608_v62 = vpop.f32.mrb[4].mxu0  ;;  %v192_v63 = vpop.f32.mrb[5].mxu1 }
  0xe9   :  { %470 = vst.msk [vmem:[%s922_s4 + $0x18] sm:$0xff] %vm57_vm0, %v454_v59  ;;  %v391_v0 = vadd.f32 %v608_v62, %v576_v60  ;;  %v385_v1 = vpop.f32.mrb[5].mxu0 }
  0xea   :  { %469 = vst.msk [vmem:[%s922_s4 + $0x10] sm:$0xff] %vm57_vm0, %v453_v61  ;;  %v386_v2 = vadd.f32 %v385_v1, %v192_v63 }
  0xeb   :  { %v456_v3 = vadd.f32 %v836_v46, %v391_v0  ;;  %v579_v4 = vpop.f32.mrb[6].mxu1 }
  0xec   :  { %v455_v5 = vadd.f32 %v836_v46, %v386_v2  ;;  %v611_v6 = vpop.f32.mrb[6].mxu0  ;;  %v202_v7 = vpop.f32.mrb[7].mxu1 }
  0xed   :  { %472 = vst.msk [vmem:[%s922_s4 + $0x28] sm:$0xff] %vm57_vm0, %v456_v3  ;;  %v401_v8 = vadd.f32 %v611_v6, %v579_v4  ;;  %v395_v9 = vpop.f32.mrb[7].mxu0 }
  0xee   :  { %471 = vst.msk [vmem:[%s922_s4 + $0x20] sm:$0xff] %vm57_vm0, %v455_v5  ;;  %v396_v10 = vadd.f32 %v395_v9, %v202_v7 }
  0xef   :  { %v458_v11 = vadd.f32 %v836_v46, %v401_v8  ;;  %v582_v12 = vpop.f32.mrb[8].mxu1 }
  0xf0   :  { %v457_v13 = vadd.f32 %v836_v46, %v396_v10  ;;  %v614_v14 = vpop.f32.mrb[8].mxu0  ;;  %v212_v15 = vpop.f32.mrb[9].mxu1 }
  0xf1   :  { %474 = vst.msk [vmem:[%s922_s4 + $0x38] sm:$0xff] %vm57_vm0, %v458_v11  ;;  %v411_v16 = vadd.f32 %v614_v14, %v582_v12  ;;  %v405_v17 = vpop.f32.mrb[9].mxu0 }
  0xf2   :  { %473 = vst.msk [vmem:[%s922_s4 + $0x30] sm:$0xff] %vm57_vm0, %v457_v13  ;;  %v406_v18 = vadd.f32 %v405_v17, %v212_v15 }
  0xf3   :  { %v460_v19 = vadd.f32 %v836_v46, %v411_v16  ;;  %v585_v20 = vpop.f32.mrb[10].mxu1 }
  0xf4   :  { %v459_v21 = vadd.f32 %v836_v46, %v406_v18  ;;  %v617_v22 = vpop.f32.mrb[10].mxu0  ;;  %v222_v23 = vpop.f32.mrb[11].mxu1 }
  0xf5   :  { %476 = vst.msk [vmem:[%s922_s4 + $0x48] sm:$0xff] %vm57_vm0, %v460_v19  ;;  %v421_v24 = vadd.f32 %v617_v22, %v585_v20  ;;  %v415_v25 = vpop.f32.mrb[11].mxu0 }
  0xf6   :  { %475 = vst.msk [vmem:[%s922_s4 + $0x40] sm:$0xff] %vm57_vm0, %v459_v21  ;;  %v416_v26 = vadd.f32 %v415_v25, %v222_v23 }
  0xf7   :  { %v462_v27 = vadd.f32 %v836_v46, %v421_v24  ;;  %v588_v28 = vpop.f32.mrb[12].mxu1 }
  0xf8   :  { %v461_v29 = vadd.f32 %v836_v46, %v416_v26  ;;  %v620_v30 = vpop.f32.mrb[12].mxu0  ;;  %v232_v31 = vpop.f32.mrb[13].mxu1 }
  0xf9   :  { %478 = vst.msk [vmem:[%s922_s4 + $0x58] sm:$0xff] %vm57_vm0, %v462_v27  ;;  %v431_v32 = vadd.f32 %v620_v30, %v588_v28  ;;  %v425_v33 = vpop.f32.mrb[13].mxu0 }
  0xfa   :  { %477 = vst.msk [vmem:[%s922_s4 + $0x50] sm:$0xff] %vm57_vm0, %v461_v29  ;;  %v426_v34 = vadd.f32 %v425_v33, %v232_v31 }
  0xfb   :  { %v464_v35 = vadd.f32 %v836_v46, %v431_v32  ;;  %v591_v36 = vpop.f32.mrb[14].mxu1 }
  0xfc   :  { %v463_v37 = vadd.f32 %v836_v46, %v426_v34  ;;  %v623_v38 = vpop.f32.mrb[14].mxu0  ;;  %v242_v39 = vpop.f32.mrb[15].mxu1 }
  0xfd   :  { %480 = vst.msk [vmem:[%s922_s4 + $0x68] sm:$0xff] %vm57_vm0, %v464_v35  ;;  %v441_v40 = vadd.f32 %v623_v38, %v591_v36  ;;  %v435_v41 = vpop.f32.mrb[15].mxu0 }
  0xfe   :  { %479 = vst.msk [vmem:[%s922_s4 + $0x60] sm:$0xff] %vm57_vm0, %v463_v37  ;;  %v436_v42 = vadd.f32 %v435_v41, %v242_v39 }
  0xff   :  { %v466_v43 = vadd.f32 %v836_v46, %v441_v40 }
 0x100   :  { %v465_v44 = vadd.f32 %v836_v46, %v436_v42 }
 0x101   :  { %482 = vst.msk [vmem:[%s922_s4 + $0x78] sm:$0xff] %vm57_vm0, %v466_v43 }
 0x102   :  { %481 = vst.msk [vmem:[%s922_s4 + $0x70] sm:$0xff] %vm57_vm0, %v465_v44 }

// kernel: stage_forward.7
= control target key start
LH: loop header
LB: loop body
LE: loop exit
PB: predicated region body
PF: predicated region fallthrough
CT: control target
= control target key end

     0   :  { %vm5972_vm0 = vcmask 261120   ;;  %vm663_vm1 = vcmask 130048   ;;  %s4359_s28 = smov 64   ;;  %s4360_s29 = smov 80   ;;  %s5956_s0 = inlined_call_operand.vmem [shape: f32[128,32], index: 0, kind: input, shape index: {}]   ;;  %s5957_s5 = inlined_call_operand.vmem [shape: f32[32,96], index: 5, kind: input, shape index: {}]   ;;  %s5958_s3 = inlined_call_operand.vmem [shape: f32[1,32], index: 3, kind: input, shape index: {}]   ;;  %s5959_s4 = inlined_call_operand.vmem [shape: f32[1,32], index: 4, kind: input, shape index: {}]   ;;  %s5960_s6 = inlined_call_operand.vmem [shape: f32[1,96], index: 6, kind: input, shape index: {}]   ;;  %s5961_s1 = inlined_call_operand.vmem [shape: s32[128,1], index: 1, kind: input, shape index: {}]   ;;  %s5962_s2 = inlined_call_operand.vmem [shape: s32[1,128], index: 2, kind: input, shape index: {}]   ;;  %s5963_s7 = inlined_call_operand.vmem [shape: f32[32,32], index: 7, kind: input, shape index: {}]   ;;  %s5964_s8 = inlined_call_operand.vmem [shape: f32[1,32], index: 8, kind: input, shape index: {}]   ;;  %s5965_s11 = inlined_call_operand.vmem [shape: f32[32,64], index: 11, kind: input, shape index: {}]   ;;  %s5966_s13 = inlined_call_operand.vmem [shape: f32[64,32], index: 13, kind: input, shape index: {}]   ;;  %s5967_s9 = inlined_call_operand.vmem [shape: f32[1,32], index: 9, kind: input, shape index: {}]   ;;  %s5968_s10 = inlined_call_operand.vmem [shape: f32[1,32], index: 10, kind: input, shape index: {}]   ;;  %s5969_s12 = inlined_call_operand.vmem [shape: f32[1,64], index: 12, kind: input, shape index: {}]   ;;  %s5970_s14 = inlined_call_operand.vmem [shape: f32[1,32], index: 14, kind: input, shape index: {}]   ;;  %s5971_s15 = inlined_call_operand.vmem [shape: f32[128,32], index: 15, kind: output, shape index: {}]  }
   0x1   :  { %v50_v0 = vld [vmem:[%s5956_s0] sm:$0xff]  ;;  %v52_v1 = vld [vmem:[%s5956_s0 + $0x10] sm:$0xff]  ;;  %v51_v2 = vld [vmem:[%s5956_s0 + $0x8] sm:$0xff] }
   0x2   :  { %v69_v3 = vsel %vm5972_vm0, %v50_v0, 0.0  ;;  %v75_v4 = vsel %vm5972_vm0, %v52_v1, 0.0  ;;  %v53_v5 = vld [vmem:[%s5956_s0 + $0x18] sm:$0xff]  ;;  %v72_v6 = vsel %vm5972_vm0, %v51_v2, 0.0  ;;  %v54_v8 = vld [vmem:[%s5956_s0 + $0x20] sm:$0xff]  ;;  %v55_v9 = vld [vmem:[%s5956_s0 + $0x28] sm:$0xff] }
   0x3   :  { %70 = vadd.xlane.f32.xlu0 %v69_v3  ;;  %76 = vadd.xlane.f32.xlu1 %v75_v4  ;;  %v78_v7 = vsel %vm5972_vm0, %v53_v5, 0.0  ;;  %v81_v10 = vsel %vm5972_vm0, %v54_v8, 0.0  ;;  %v84_v11 = vsel %vm5972_vm0, %v55_v9, 0.0  ;;  %v4470_v12 = vld [vmem:[%s5956_s0 + $0x30] sm:$0xff]  ;;  %v4475_v13 = vld [vmem:[%s5956_s0 + $0x38] sm:$0xff]  ;;  %v4484_v16 = vld [vmem:[%s5956_s0 + $0x40] sm:$0xff] }
   0x4   :  { %v87_v14 = vsel %vm5972_vm0, %v4470_v12, 0.0  ;;  %v90_v15 = vsel %vm5972_vm0, %v4475_v13, 0.0  ;;  %v4489_v17 = vld [vmem:[%s5956_s0 + $0x48] sm:$0xff]  ;;  %v93_v18 = vsel %vm5972_vm0, %v4484_v16, 0.0  ;;  %v4498_v20 = vld [vmem:[%s5956_s0 + $0x50] sm:$0xff]  ;;  %v4503_v21 = vld [vmem:[%s5956_s0 + $0x58] sm:$0xff] }
   0x5   :  { %v96_v19 = vsel %vm5972_vm0, %v4489_v17, 0.0  ;;  %v99_v22 = vsel %vm5972_vm0, %v4498_v20, 0.0  ;;  %v102_v23 = vsel %vm5972_vm0, %v4503_v21, 0.0  ;;  %v4512_v24 = vld [vmem:[%s5956_s0 + $0x60] sm:$0xff]  ;;  %v4517_v25 = vld [vmem:[%s5956_s0 + $0x68] sm:$0xff]  ;;  %v4526_v28 = vld [vmem:[%s5956_s0 + $0x70] sm:$0xff] }
   0x6   :  { %v105_v26 = vsel %vm5972_vm0, %v4512_v24, 0.0  ;;  %v108_v27 = vsel %vm5972_vm0, %v4517_v25, 0.0  ;;  %v4531_v29 = vld [vmem:[%s5956_s0 + $0x78] sm:$0xff]  ;;  %v111_v30 = vsel %vm5972_vm0, %v4526_v28, 0.0  ;;  %vm4862_vm2 = vmpackc.low %vm663_vm1, %vm663_vm1 }
   0x7   :  { %73 = vadd.xlane.f32.xlu0 %v72_v6  ;;  %79 = vadd.xlane.f32.xlu1 %v78_v7  ;;  %v114_v31 = vsel %vm5972_vm0, %v4531_v29, 0.0 }
   0xb   :  { %82 = vadd.xlane.f32.xlu0 %v81_v10  ;;  %85 = vadd.xlane.f32.xlu1 %v84_v11 }
   0xf   :  { %88 = vadd.xlane.f32.xlu0 %v87_v14  ;;  %91 = vadd.xlane.f32.xlu1 %v90_v15 }
  0x13   :  { %94 = vadd.xlane.f32.xlu0 %v93_v18  ;;  %97 = vadd.xlane.f32.xlu1 %v96_v19 }
  0x17   :  { %100 = vadd.xlane.f32.xlu0 %v99_v22  ;;  %103 = vadd.xlane.f32.xlu1 %v102_v23 }
  0x1b   :  { %106 = vadd.xlane.f32.xlu0 %v105_v26  ;;  %109 = vadd.xlane.f32.xlu1 %v108_v27 }
  0x1f   :  { %112 = vadd.xlane.f32.xlu0 %v111_v30  ;;  %115 = vadd.xlane.f32.xlu1 %v114_v31 }
  0x90   :  { %v71_v32 = vpop.xlane.xlu0 %70  ;;  %v77_v33 = vpop.xlane.xlu1 %76 }
  0x91   :  { %v118_v34 = vmul.f32 0.03125, %v71_v32  ;;  %v120_v35 = vmul.f32 0.03125, %v77_v33 }
  0x93   :  { %v4537_v36 = vsub.f32 %v50_v0, %v118_v34  ;;  %v4539_v37 = vsub.f32 %v52_v1, %v120_v35 }
  0x94   :  { %v74_v38 = vpop.xlane.xlu0 %73  ;;  %v80_v39 = vpop.xlane.xlu1 %79 }
  0x95   :  { %v119_v40 = vmul.f32 0.03125, %v74_v38  ;;  %v121_v41 = vmul.f32 0.03125, %v80_v39  ;;  %v150_v42 = vmul.f32 %v4537_v36, %v4537_v36  ;;  %v152_v43 = vmul.f32 %v4539_v37, %v4539_v37 }
  0x97   :  { %v4545_v44 = vsub.f32 %v51_v2, %v119_v40  ;;  %v4547_v45 = vsub.f32 %v53_v5, %v121_v41  ;;  %v166_v46 = vsel %vm5972_vm0, %v150_v42, 0.0  ;;  %v172_v49 = vsel %vm5972_vm0, %v152_v43, 0.0 }
  0x98   :  { %167 = vadd.xlane.f32.xlu0 %v166_v46  ;;  %v83_v47 = vpop.xlane.xlu0 %82  ;;  %v86_v48 = vpop.xlane.xlu1 %85 }
  0x99   :  { %v122_v50 = vmul.f32 0.03125, %v83_v47  ;;  %v123_v51 = vmul.f32 0.03125, %v86_v48  ;;  %v151_v52 = vmul.f32 %v4545_v44, %v4545_v44  ;;  %v153_v53 = vmul.f32 %v4547_v45, %v4547_v45 }
  0x9b   :  { %v4555_v54 = vsub.f32 %v54_v8, %v122_v50  ;;  %v4557_v55 = vsub.f32 %v55_v9, %v123_v51  ;;  %v169_v56 = vsel %vm5972_vm0, %v151_v52, 0.0  ;;  %v175_v59 = vsel %vm5972_vm0, %v153_v53, 0.0  ;;  %v323_v53 = vld [vmem:[%s5957_s5 + $0x8] sm:$0xff] }
  0x9c   :  { %173 = vadd.xlane.f32.xlu0 %v172_v49  ;;  %170 = vadd.xlane.f32.xlu1 %v169_v56  ;;  %v89_v57 = vpop.xlane.xlu0 %88  ;;  %v92_v58 = vpop.xlane.xlu1 %91 }
  0x9d   :  { %v124_v60 = vmul.f32 0.03125, %v89_v57  ;;  %v125_v61 = vmul.f32 0.03125, %v92_v58  ;;  %v154_v62 = vmul.f32 %v4555_v54, %v4555_v54  ;;  %v155_v63 = vmul.f32 %v4557_v55, %v4557_v55  ;;  %v324_v57 = vld [vmem:[%s5957_s5 + $0x10] sm:$0xff]  ;;  %v325_v58 = vld [vmem:[%s5957_s5 + $0x18] sm:$0xff] }
  0x9f   :  { %v4566_v0 = vsub.f32 %v4470_v12, %v124_v60  ;;  %v4569_v1 = vsub.f32 %v4475_v13, %v125_v61  ;;  %v178_v2 = vsel %vm5972_vm0, %v154_v62, 0.0  ;;  %v181_v5 = vsel %vm5972_vm0, %v155_v63, 0.0 }
  0xa0   :  { %176 = vadd.xlane.f32.xlu1 %v175_v59  ;;  %179 = vadd.xlane.f32.xlu0 %v178_v2  ;;  %v95_v3 = vpop.xlane.xlu0 %94  ;;  %v98_v4 = vpop.xlane.xlu1 %97  ;;  %v3765_v59 = vpack.c.bf16 %v325_v58, %v324_v57 }
  0xa1   :  { %v126_v6 = vmul.f32 0.03125, %v95_v3  ;;  %v127_v7 = vmul.f32 0.03125, %v98_v4  ;;  %v156_v8 = vmul.f32 %v4566_v0, %v4566_v0  ;;  %v157_v9 = vmul.f32 %v4569_v1, %v4569_v1 }
  0xa3   :  { %v4578_v10 = vsub.f32 %v4484_v16, %v126_v6  ;;  %v4581_v11 = vsub.f32 %v4489_v17, %v127_v7  ;;  %v184_v12 = vsel %vm5972_vm0, %v156_v8, 0.0  ;;  %v187_v15 = vsel %vm5972_vm0, %v157_v9, 0.0 }
  0xa4   :  { %182 = vadd.xlane.f32.xlu1 %v181_v5  ;;  %185 = vadd.xlane.f32.xlu0 %v184_v12  ;;  %v101_v13 = vpop.xlane.xlu0 %100  ;;  %v104_v14 = vpop.xlane.xlu1 %103 }
  0xa5   :  { %v128_v18 = vmul.f32 0.03125, %v101_v13  ;;  %v129_v19 = vmul.f32 0.03125, %v104_v14  ;;  %v158_v22 = vmul.f32 %v4578_v10, %v4578_v10  ;;  %v159_v16 = vmul.f32 %v4581_v11, %v4581_v11 }
  0xa7   :  { %v4590_v23 = vsub.f32 %v4498_v20, %v128_v18  ;;  %v4593_v17 = vsub.f32 %v4503_v21, %v129_v19  ;;  %v190_v26 = vsel %vm5972_vm0, %v158_v22, 0.0  ;;  %v193_v31 = vsel %vm5972_vm0, %v159_v16, 0.0 }
  0xa8   :  { %188 = vadd.xlane.f32.xlu1 %v187_v15  ;;  %191 = vadd.xlane.f32.xlu0 %v190_v26  ;;  %v107_v27 = vpop.xlane.xlu0 %106  ;;  %v110_v30 = vpop.xlane.xlu1 %109 }
  0xa9   :  { %v130_v32 = vmul.f32 0.03125, %v107_v27  ;;  %v131_v33 = vmul.f32 0.03125, %v110_v30  ;;  %v160_v34 = vmul.f32 %v4590_v23, %v4590_v23  ;;  %v161_v20 = vmul.f32 %v4593_v17, %v4593_v17  ;;  %v4642_v30 = vld [vmem:[%s5958_s3] ss:$0 sm:$0xff]  ;;  %s4362_s3 = smov 48  }
  0xab   :  { %v4602_v35 = vsub.f32 %v4512_v24, %v130_v32  ;;  %v4605_v21 = vsub.f32 %v4517_v25, %v131_v33  ;;  %v196_v38 = vsel %vm5972_vm0, %v160_v34, 0.0  ;;  %v199_v41 = vsel %vm5972_vm0, %v161_v20, 0.0 }
  0xac   :  { %194 = vadd.xlane.f32.xlu1 %v193_v31  ;;  %197 = vadd.xlane.f32.xlu0 %v196_v38  ;;  %v113_v39 = vpop.xlane.xlu0 %112  ;;  %v116_v40 = vpop.xlane.xlu1 %115  ;;  %v4648_v38 = vld [vmem:[%s5959_s4] ss:$0 sm:$0xff] }
  0xad   :  { %v132_v42 = vmul.f32 0.03125, %v113_v39  ;;  %v133_v43 = vmul.f32 0.03125, %v116_v40  ;;  %v162_v46 = vmul.f32 %v4602_v35, %v4602_v35  ;;  %v163_v24 = vmul.f32 %v4605_v21, %v4605_v21 }
  0xaf   :  { %v4614_v47 = vsub.f32 %v4526_v28, %v132_v42  ;;  %v4617_v25 = vsub.f32 %v4531_v29, %v133_v43  ;;  %v202_v48 = vsel %vm5972_vm0, %v162_v46, 0.0  ;;  %v205_v49 = vsel %vm5972_vm0, %v163_v24, 0.0  ;;  %v322_v29 = vld [vmem:[%s5957_s5] sm:$0xff] }
  0xb0   :  { %200 = vadd.xlane.f32.xlu1 %v199_v41  ;;  %203 = vadd.xlane.f32.xlu0 %v202_v48  ;;  %v3761_v56 = vpack.c.bf16 %v323_v53, %v322_v29 }
  0xb1   :  { %v164_v50 = vmul.f32 %v4614_v47, %v4614_v47  ;;  %v165_v51 = vmul.f32 %v4617_v25, %v4617_v25 }
  0xb2   :  { %3762 = vmatprep.subr.bf16.mxu0 %v3761_v56 }
  0xb3   :  { %v208_v52 = vsel %vm5972_vm0, %v164_v50, 0.0  ;;  %v211_v28 = vsel %vm5972_vm0, %v165_v51, 0.0  ;;  %3764 = vmatpush3.bf16.msra.mxu0 %v3761_v56 }
  0xb4   :  { %206 = vadd.xlane.f32.xlu1 %v205_v49  ;;  %209 = vadd.xlane.f32.xlu0 %v208_v52 }
  0xb5   :  { %3766 = vmatprep.subr.bf16.mxu0 %v3765_v59 }
  0xb7   :  { %3768 = vmatpush3.bf16.msra.mxu0 %v3765_v59 }
  0xb8   :  { %212 = vadd.xlane.f32.xlu1 %v211_v28 }
 0x125   :  { %v168_v60 = vpop.xlane.xlu0 %167 }
 0x126   :  { %v214_v61 = vmul.f32 0.03125, %v168_v60 }
 0x128   :  { %v230_v62 = vadd.f32 1e-05, %v214_v61 }
 0x129   :  { %v171_v63 = vpop.xlane.xlu1 %170  ;;  %v174_v2 = vpop.xlane.xlu0 %173 }
 0x12a   :  { %4149 = vrsqrt.f32 %v230_v62  ;;  %v215_v3 = vmul.f32 0.03125, %v171_v63  ;;  %v216_v4 = vmul.f32 0.03125, %v174_v2 }
 0x12c   :  { %v231_v5 = vadd.f32 1e-05, %v215_v3  ;;  %v232_v6 = vadd.f32 1e-05, %v216_v4 }
 0x12d   :  { %v177_v7 = vpop.xlane.xlu1 %176  ;;  %v180_v8 = vpop.xlane.xlu0 %179 }
 0x12e   :  { %4151 = vrsqrt.f32 %v231_v5  ;;  %v217_v9 = vmul.f32 0.03125, %v177_v7  ;;  %v218_v12 = vmul.f32 0.03125, %v180_v8 }
 0x12f   :  { %4153 = vrsqrt.f32 %v232_v6 }
 0x130   :  { %v233_v13 = vadd.f32 1e-05, %v217_v9  ;;  %v234_v14 = vadd.f32 1e-05, %v218_v12 }
 0x131   :  { %v183_v15 = vpop.xlane.xlu1 %182  ;;  %v186_v18 = vpop.xlane.xlu0 %185 }
 0x132   :  { %4155 = vrsqrt.f32 %v233_v13  ;;  %v219_v19 = vmul.f32 0.03125, %v183_v15  ;;  %v220_v22 = vmul.f32 0.03125, %v186_v18 }
 0x133   :  { %4157 = vrsqrt.f32 %v234_v14 }
 0x134   :  { %v4150_v16 = vpop.eup %4149  ;;  %v235_v26 = vadd.f32 1e-05, %v219_v19  ;;  %v236_v27 = vadd.f32 1e-05, %v220_v22 }
 0x135   :  { %v189_v31 = vpop.xlane.xlu1 %188  ;;  %v192_v32 = vpop.xlane.xlu0 %191  ;;  %v262_v33 = vmul.f32 %v4150_v16, %v4537_v36 }
 0x136   :  { %4159 = vrsqrt.f32 %v235_v26  ;;  %v221_v34 = vmul.f32 0.03125, %v189_v31  ;;  %v222_v20 = vmul.f32 0.03125, %v192_v32 }
 0x137   :  { %4161 = vrsqrt.f32 %v236_v27  ;;  %v284_v39 = vmul.f32 %v4642_v30, %v262_v33 }
 0x138   :  { %v4152_v40 = vpop.eup %4151  ;;  %v237_v41 = vadd.f32 1e-05, %v221_v34  ;;  %v238_v42 = vadd.f32 1e-05, %v222_v20 }
 0x139   :  { %v4154_v43 = vpop.eup %4153  ;;  %v195_v46 = vpop.xlane.xlu1 %194  ;;  %v306_v48 = vadd.f32 %v4648_v38, %v284_v39  ;;  %v263_v36 = vmul.f32 %v4152_v40, %v4545_v44 }
 0x13a   :  { %v198_v24 = vpop.xlane.xlu0 %197  ;;  %4163 = vrsqrt.f32 %v237_v41  ;;  %v223_v49 = vmul.f32 0.03125, %v195_v46  ;;  %v264_v51 = vmul.f32 %v4154_v43, %v4539_v37 }
 0x13b   :  { %v224_v50 = vmul.f32 0.03125, %v198_v24  ;;  %4165 = vrsqrt.f32 %v238_v42  ;;  %3385 = vmatprep.mubr.msk.f32.mxu0 %vm5972_vm0, %v306_v48  ;;  %v285_v52 = vmul.f32 %v4642_v30, %v263_v36 }
 0x13c   :  { %v4156_v28 = vpop.eup %4155  ;;  %v239_v29 = vadd.f32 1e-05, %v223_v49  ;;  %v286_v56 = vmul.f32 %v4642_v30, %v264_v51 }
 0x13d   :  { %v240_v53 = vadd.f32 1e-05, %v224_v50  ;;  %v4158_v57 = vpop.eup %4157  ;;  %v201_v58 = vpop.xlane.xlu1 %200  ;;  %v307_v44 = vadd.f32 %v4648_v38, %v285_v52  ;;  %v265_v60 = vmul.f32 %v4156_v28, %v4547_v45 }
 0x13e   :  { %v204_v59 = vpop.xlane.xlu0 %203  ;;  %4167 = vrsqrt.f32 %v239_v29  ;;  %v225_v61 = vmul.f32 0.03125, %v201_v58  ;;  %v308_v62 = vadd.f32 %v4648_v38, %v286_v56  ;;  %v266_v2 = vmul.f32 %v4158_v57, %v4555_v54 }
 0x13f   :  { %v226_v37 = vmul.f32 0.03125, %v204_v59  ;;  %4169 = vrsqrt.f32 %v240_v53  ;;  %3386 = vmatmul.mubr.msk.f32.vlgmr.msra.gmra.mrb[0].mxu0 %vm5972_vm0, %v307_v44  ;;  %v287_v63 = vmul.f32 %v4642_v30, %v265_v60 }
 0x140   :  { %v4160_v3 = vpop.eup %4159  ;;  %v241_v4 = vadd.f32 1e-05, %v225_v61  ;;  %3388 = vmatprep.mubr.msk.f32.mxu0 %vm5972_vm0, %v308_v62  ;;  %v288_v9 = vmul.f32 %v4642_v30, %v266_v2  ;;  %v4357_v62 = vmov 0  }
 0x141   :  { %v242_v5 = vadd.f32 1e-05, %v226_v37  ;;  %v4162_v6 = vpop.eup %4161  ;;  %v207_v7 = vpop.xlane.xlu1 %206  ;;  %v309_v8 = vadd.f32 %v4648_v38, %v287_v63  ;;  %v267_v12 = vmul.f32 %v4160_v3, %v4557_v55  ;;  %4027 = vset.pattern.permute.xlu0 %v4357_v62  ;;  %4028 = vset.pattern.permute.xlu1 %v4357_v62  ;;  %v2998_v63 = vld [vmem:[%s5960_s6] ss:$0 sm:$0xff]  ;;  %s4358_s6 = smov 96  }
 0x142   :  { %v210_v45 = vpop.xlane.xlu0 %209  ;;  %4171 = vrsqrt.f32 %v241_v4  ;;  %v227_v13 = vmul.f32 0.03125, %v207_v7  ;;  %v268_v15 = vmul.f32 %v4162_v6, %v4566_v0  ;;  %v310_v54 = vadd.f32 %v4648_v38, %v288_v9 }
 0x143   :  { %v228_v14 = vmul.f32 0.03125, %v210_v45  ;;  %4173 = vrsqrt.f32 %v242_v5  ;;  %3389 = vmatmul.mubr.msk.f32.gmra.mrb[2].mxu0 %vm5972_vm0, %v309_v8  ;;  %v289_v18 = vmul.f32 %v4642_v30, %v267_v12 }
 0x144   :  { %v4164_v19 = vpop.eup %4163  ;;  %v243_v22 = vadd.f32 1e-05, %v227_v13  ;;  %v290_v26 = vmul.f32 %v4642_v30, %v268_v15  ;;  %3391 = vmatprep.mubr.msk.f32.mxu0 %vm5972_vm0, %v310_v54 }
 0x145   :  { %v244_v16 = vadd.f32 1e-05, %v228_v14  ;;  %v4166_v27 = vpop.eup %4165  ;;  %v213_v55 = vpop.xlane.xlu1 %212  ;;  %v311_v31 = vadd.f32 %v4648_v38, %v289_v18  ;;  %v269_v0 = vmul.f32 %v4164_v19, %v4569_v1 }
 0x146   :  { %4175 = vrsqrt.f32 %v243_v22  ;;  %v229_v32 = vmul.f32 0.03125, %v213_v55  ;;  %v312_v33 = vadd.f32 %v4648_v38, %v290_v26  ;;  %v270_v34 = vmul.f32 %v4166_v27, %v4578_v10 }
 0x147   :  { %4177 = vrsqrt.f32 %v244_v16  ;;  %3392 = vmatmul.mubr.msk.f32.gmra.mrb[4].mxu0 %vm5972_vm0, %v311_v31  ;;  %v291_v20 = vmul.f32 %v4642_v30, %v269_v0 }
 0x148   :  { %v4168_v39 = vpop.eup %4167  ;;  %v245_v40 = vadd.f32 1e-05, %v229_v32  ;;  %3394 = vmatprep.mubr.msk.f32.mxu0 %vm5972_vm0, %v312_v33  ;;  %v292_v41 = vmul.f32 %v4642_v30, %v270_v34 }
 0x149   :  { %v4170_v42 = vpop.eup %4169  ;;  %v313_v1 = vadd.f32 %v4648_v38, %v291_v20  ;;  %v271_v43 = vmul.f32 %v4168_v39, %v4581_v11 }
 0x14a   :  { %4179 = vrsqrt.f32 %v245_v40  ;;  %v314_v46 = vadd.f32 %v4648_v38, %v292_v41  ;;  %v272_v10 = vmul.f32 %v4170_v42, %v4590_v23 }
 0x14b   :  { %3395 = vmatmul.mubr.msk.f32.gmra.mrb[6].mxu0 %vm5972_vm0, %v313_v1  ;;  %v293_v24 = vmul.f32 %v4642_v30, %v271_v43 }
 0x14c   :  { %v4172_v48 = vpop.eup %4171  ;;  %3397 = vmatprep.mubr.msk.f32.mxu0 %vm5972_vm0, %v314_v46  ;;  %v294_v36 = vmul.f32 %v4642_v30, %v272_v10 }
 0x14d   :  { %v4174_v49 = vpop.eup %4173  ;;  %v315_v50 = vadd.f32 %v4648_v38, %v293_v24  ;;  %v273_v51 = vmul.f32 %v4172_v48, %v4593_v17  ;;  %v526_v48 = vld [vmem:[%s5961_s1] sm:$0xff] }
 0x14e   :  { %v316_v11 = vadd.f32 %v4648_v38, %v294_v36  ;;  %v274_v52 = vmul.f32 %v4174_v49, %v4602_v35  ;;  %v529_v49 = vld [vmem:[%s5961_s1 + $0x18] sm:$0xff] }
 0x14f   :  { %3398 = vmatmul.mubr.msk.f32.gmra.mrb[8].mxu0 %vm5972_vm0, %v315_v50  ;;  %v295_v23 = vmul.f32 %v4642_v30, %v273_v51  ;;  %v527_v50 = vld [vmem:[%s5961_s1 + $0x8] sm:$0xff] }
 0x150   :  { %v4176_v28 = vpop.eup %4175  ;;  %3400 = vmatprep.mubr.msk.f32.mxu0 %vm5972_vm0, %v316_v11  ;;  %v296_v29 = vmul.f32 %v4642_v30, %v274_v52  ;;  %v531_v51 = vld [vmem:[%s5961_s1 + $0x28] sm:$0xff]  ;;  %v528_v11 = vld [vmem:[%s5961_s1 + $0x10] sm:$0xff]  ;;  %v533_v52 = vld [vmem:[%s5961_s1 + $0x38] sm:$0xff] }
 0x151   :  { %v4178_v53 = vpop.eup %4177  ;;  %v317_v56 = vadd.f32 %v4648_v38, %v295_v23  ;;  %v275_v57 = vmul.f32 %v4176_v28, %v4605_v21  ;;  %v530_v23 = vld [vmem:[%s5961_s1 + $0x20] sm:$0xff]  ;;  %v535_v28 = vld [vmem:[%s5961_s1 + $0x48] sm:$0xff] }
 0x152   :  { %v318_v17 = vadd.f32 %v4648_v38, %v296_v29  ;;  %v276_v58 = vmul.f32 %v4178_v53, %v4614_v47  ;;  %v532_v29 = vld [vmem:[%s5961_s1 + $0x30] sm:$0xff]  ;;  %v537_v53 = vld [vmem:[%s5961_s1 + $0x58] sm:$0xff] }
 0x153   :  { %3401 = vmatmul.mubr.msk.f32.gmra.mrb[10].mxu0 %vm5972_vm0, %v317_v56  ;;  %v297_v35 = vmul.f32 %v4642_v30, %v275_v57  ;;  %v534_v56 = vld [vmem:[%s5961_s1 + $0x40] sm:$0xff]  ;;  %v539_v57 = vld [vmem:[%s5961_s1 + $0x68] sm:$0xff] }
 0x154   :  { %v4180_v59 = vpop.eup %4179  ;;  %3403 = vmatprep.mubr.msk.f32.mxu0 %vm5972_vm0, %v318_v17  ;;  %v298_v44 = vmul.f32 %v4642_v30, %v276_v58  ;;  %v536_v17 = vld [vmem:[%s5961_s1 + $0x50] sm:$0xff]  ;;  %v541_v58 = vld [vmem:[%s5961_s1 + $0x78] sm:$0xff] }
 0x155   :  { %v319_v60 = vadd.f32 %v4648_v38, %v297_v35  ;;  %v277_v61 = vmul.f32 %v4180_v59, %v4617_v25  ;;  %v538_v35 = vld [vmem:[%s5961_s1 + $0x60] sm:$0xff]  ;;  %v540_v59 = vld [vmem:[%s5961_s1 + $0x70] sm:$0xff] }
 0x156   :  { %v320_v37 = vadd.f32 %v4648_v38, %v298_v44 }
 0x157   :  { %3404 = vmatmul.mubr.msk.f32.gmra.mrb[12].mxu0 %vm5972_vm0, %v319_v60  ;;  %v299_v21 = vmul.f32 %v4642_v30, %v277_v61 }
 0x158   :  { %3406 = vmatprep.mubr.msk.f32.mxu0 %vm5972_vm0, %v320_v37 }
 0x159   :  { %v321_v47 = vadd.f32 %v4648_v38, %v299_v21 }
 0x15b   :  { %3407 = vmatmul.mubr.msk.f32.gmra.mrb[14].mxu0 %vm5972_vm0, %v321_v47 }
 0x212   :  { %v3387_v25 = vpop.f32.mrb[0].mxu0 }
 0x213   :  { %v4716_v2 = vadd.f32 %v3387_v25, %v2998_v63  ;;  %v447_v3 = vpop.f32.mrb[1].mxu0 }
 0x214   :  { %v4718_v4 = vadd.f32 %v2998_v63, %v447_v3 }
 0x216   :  { %v3390_v30 = vpop.f32.mrb[2].mxu0  ;;  %3441 = vmatprep.mubr.msk.f32.mxu1 %vm663_vm1, %v4718_v4  ;;  %v4724_v38 = vpack.i.bf16 %v4716_v2, %v4718_v4 }
 0x217   :  { %v4726_v5 = vadd.f32 %v3390_v30, %v2998_v63  ;;  %v457_v6 = vpop.f32.mrb[3].mxu0 }
 0x218   :  { %v4728_v7 = vadd.f32 %v2998_v63, %v457_v6  ;;  %3988 = vrot.lane.b32.xlu0 %v4724_v38, %s4358_s6 }
 0x21a   :  { %v3393_v45 = vpop.f32.mrb[4].mxu0  ;;  %v4734_v8 = vpack.i.bf16 %v4726_v5, %v4728_v7 }
 0x21b   :  { %v4736_v9 = vadd.f32 %v3393_v45, %v2998_v63  ;;  %v467_v12 = vpop.f32.mrb[5].mxu0 }
 0x21c   :  { %v4738_v13 = vadd.f32 %v2998_v63, %v467_v12  ;;  %3993 = vrot.lane.b32.xlu1 %v4734_v8, %s4358_s6 }
 0x21e   :  { %v3396_v14 = vpop.f32.mrb[6].mxu0  ;;  %v4744_v15 = vpack.i.bf16 %v4736_v9, %v4738_v13 }
 0x21f   :  { %v4746_v54 = vadd.f32 %v3396_v14, %v2998_v63  ;;  %v477_v18 = vpop.f32.mrb[7].mxu0 }
 0x220   :  { %v4748_v19 = vadd.f32 %v2998_v63, %v477_v18  ;;  %3998 = vrot.lane.b32.xlu1 %v4744_v15, %s4358_s6 }
 0x222   :  { %v3399_v22 = vpop.f32.mrb[8].mxu0  ;;  %v4754_v16 = vpack.i.bf16 %v4746_v54, %v4748_v19 }
 0x223   :  { %v4756_v26 = vadd.f32 %v3399_v22, %v2998_v63  ;;  %v487_v27 = vpop.f32.mrb[9].mxu0 }
 0x224   :  { %v4758_v55 = vadd.f32 %v2998_v63, %v487_v27  ;;  %4003 = vrot.lane.b32.xlu1 %v4754_v16, %s4358_s6 }
 0x226   :  { %v3402_v31 = vpop.f32.mrb[10].mxu0  ;;  %v4764_v0 = vpack.i.bf16 %v4756_v26, %v4758_v55 }
 0x227   :  { %v4766_v32 = vadd.f32 %v3402_v31, %v2998_v63  ;;  %v497_v33 = vpop.f32.mrb[11].mxu0 }
 0x228   :  { %v4768_v34 = vadd.f32 %v2998_v63, %v497_v33  ;;  %4008 = vrot.lane.b32.xlu0 %v4764_v0, %s4358_s6 }
 0x22a   :  { %v3405_v20 = vpop.f32.mrb[12].mxu0  ;;  %v4774_v39 = vpack.i.bf16 %v4766_v32, %v4768_v34 }
 0x22b   :  { %v4776_v40 = vadd.f32 %v3405_v20, %v2998_v63  ;;  %v507_v41 = vpop.f32.mrb[13].mxu0 }
 0x22c   :  { %5989 = vst [vmem:[#allocation2_spill] sm:$0xff] %v4774_v39  ;;  %v4778_v42 = vadd.f32 %v2998_v63, %v507_v41  ;;  %4013 = vrot.lane.b32.xlu1 %v4774_v39, %s4358_s6 }
 0x22e   :  { %v3408_v1 = vpop.f32.mrb[14].mxu0  ;;  %v4784_v43 = vpack.i.bf16 %v4776_v40, %v4778_v42 }
 0x22f   :  { %v4786_v46 = vadd.f32 %v3408_v1, %v2998_v63  ;;  %v517_v10 = vpop.f32.mrb[15].mxu0 }
 0x230   :  { %5990 = vst [vmem:[#allocation3_spill] sm:$0xff] %v4784_v43  ;;  %v4788_v24 = vadd.f32 %v2998_v63, %v517_v10  ;;  %4018 = vrot.lane.b32.xlu0 %v4784_v43, %s4358_s6 }
 0x232   :  { %v4797_v36 = vpack.i.bf16 %v4786_v46, %v4788_v24 }
 0x234   :  { %544 = vperm.xlu0 %4027, %v526_v48   ;;  %4023 = vrot.lane.b32.xlu1 %v4797_v36, %s4358_s6 }
 0x238   :  { %553 = vperm.xlu0 %4027, %v529_v49   ;;  %547 = vperm.xlu1 %4028, %v527_v50  }
 0x23c   :  { %559 = vperm.xlu0 %4027, %v531_v51   ;;  %550 = vperm.xlu1 %4028, %v528_v11  }
 0x240   :  { %565 = vperm.xlu0 %4027, %v533_v52   ;;  %556 = vperm.xlu1 %4028, %v530_v23  }
 0x244   :  { %571 = vperm.xlu0 %4027, %v535_v28   ;;  %562 = vperm.xlu1 %4028, %v532_v29  }
 0x248   :  { %577 = vperm.xlu0 %4027, %v537_v53   ;;  %568 = vperm.xlu1 %4028, %v534_v56  }
 0x24c   :  { %583 = vperm.xlu0 %4027, %v539_v57   ;;  %574 = vperm.xlu1 %4028, %v536_v17  }
 0x250   :  { %589 = vperm.xlu0 %4027, %v541_v58   ;;  %580 = vperm.xlu1 %4028, %v538_v35  }
 0x254   :  { %4035 = vrot.lane.b32.xlu0 %v4734_v8, %s4359_s28  ;;  %586 = vperm.xlu1 %4028, %v540_v59  }
 0x258   :  { %4045 = vrot.lane.b32.xlu0 %v4754_v16, %s4359_s28  ;;  %4030 = vrot.lane.b32.xlu1 %v4724_v38, %s4359_s28 }
 0x25c   :  { %4055 = vrot.lane.b32.xlu0 %v4774_v39, %s4359_s28  ;;  %4040 = vrot.lane.b32.xlu1 %v4744_v15, %s4359_s28 }
 0x260   :  { %4050 = vrot.lane.b32.xlu1 %v4764_v0, %s4359_s28 }
 0x264   :  { %4060 = vrot.lane.b32.xlu1 %v4784_v43, %s4359_s28 }
 0x268   :  { %4065 = vrot.lane.b32.xlu1 %v4724_v38, %s4360_s29 }
 0x26c   :  { %4070 = vrot.lane.b32.xlu1 %v4797_v36, %s4359_s28 }
 0x270   :  { %4080 = vrot.lane.b32.xlu1 %v4744_v15, %s4360_s29 }
 0x274   :  { %4085 = vrot.lane.b32.xlu1 %v4754_v16, %s4360_s29 }
 0x28a   :  { %v3989_v44 = vpop.permute.xlu0 %3988 }
 0x28b   :  { %v3991_v60 = vunpack.i.h.bf16 %v3989_v44  ;;  %v3990_v61 = vunpack.i.l.bf16 %v3989_v44 }
 0x28d   :  { %v3769_v21 = vpack.c.bf16 %v3991_v60, %v3990_v61 }
 0x28e   :  { %v3994_v47 = vpop.permute.xlu1 %3993 }
 0x28f   :  { %v3996_v62 = vunpack.i.h.bf16 %v3994_v47  ;;  %v3995_v63 = vunpack.i.l.bf16 %v3994_v47  ;;  %3771 = vmatprep.subr.msk.bf16.mxu1 %vm4862_vm2, %v3769_v21 }
 0x290   :  { %3774 = vmatpush3.bf16.xpose.msk.msra.mxu1 %vm4862_vm2, %v3769_v21 }
 0x291   :  { %v3775_v25 = vpack.c.bf16 %v3996_v62, %v3995_v63 }
 0x292   :  { %v3999_v3 = vpop.permute.xlu1 %3998 }
 0x293   :  { %v4001_v30 = vunpack.i.h.bf16 %v3999_v3  ;;  %v4000_v6 = vunpack.i.l.bf16 %v3999_v3  ;;  %3777 = vmatprep.subr.msk.bf16.mxu1 %vm4862_vm2, %v3775_v25 }
 0x295   :  { %v3781_v45 = vpack.c.bf16 %v4001_v30, %v4000_v6 }
 0x296   :  { %v4004_v12 = vpop.permute.xlu1 %4003 }
 0x297   :  { %v4006_v14 = vunpack.i.h.bf16 %v4004_v12  ;;  %v4005_v18 = vunpack.i.l.bf16 %v4004_v12 }
 0x298   :  { %3780 = vmatpush3.bf16.xpose.msk.msra.mxu1 %vm4862_vm2, %v3775_v25 }
 0x299   :  { %3783 = vmatprep.subr.msk.bf16.mxu1 %vm4862_vm2, %v3781_v45  ;;  %v3787_v22 = vpack.c.bf16 %v4006_v14, %v4005_v18 }
 0x29a   :  { %v4009_v27 = vpop.permute.xlu0 %4008 }
 0x29b   :  { %v4011_v31 = vunpack.i.h.bf16 %v4009_v27  ;;  %v4010_v33 = vunpack.i.l.bf16 %v4009_v27 }
 0x29d   :  { %v3793_v20 = vpack.c.bf16 %v4011_v31, %v4010_v33 }
 0x29e   :  { %v4014_v41 = vpop.permute.xlu1 %4013 }
 0x29f   :  { %v4016_v1 = vunpack.i.h.bf16 %v4014_v41  ;;  %v4015_v10 = vunpack.i.l.bf16 %v4014_v41 }
 0x2a0   :  { %3786 = vmatpush3.bf16.xpose.msk.msra.mxu1 %vm4862_vm2, %v3781_v45 }
 0x2a1   :  { %3789 = vmatprep.subr.msk.bf16.mxu1 %vm4862_vm2, %v3787_v22  ;;  %v3799_v48 = vpack.c.bf16 %v4016_v1, %v4015_v10 }
 0x2a2   :  { %v4019_v49 = vpop.permute.xlu0 %4018 }
 0x2a3   :  { %v4021_v50 = vunpack.i.h.bf16 %v4019_v49  ;;  %v4020_v51 = vunpack.i.l.bf16 %v4019_v49 }
 0x2a5   :  { %v3805_v23 = vpack.c.bf16 %v4021_v50, %v4020_v51 }
 0x2a6   :  { %v4024_v11 = vpop.permute.xlu1 %4023 }
 0x2a7   :  { %v4026_v53 = vunpack.i.h.bf16 %v4024_v11  ;;  %v4025_v56 = vunpack.i.l.bf16 %v4024_v11 }
 0x2a8   :  { %3792 = vmatpush3.bf16.xpose.msk.msra.mxu1 %vm4862_vm2, %v3787_v22 }
 0x2a9   :  { %3795 = vmatprep.subr.msk.bf16.mxu1 %vm4862_vm2, %v3793_v20  ;;  %v3811_v58 = vpack.c.bf16 %v4026_v53, %v4025_v56 }
 0x2b0   :  { %3798 = vmatpush3.bf16.xpose.msk.msra.mxu1 %vm4862_vm2, %v3793_v20 }
 0x2b1   :  { %3801 = vmatprep.subr.msk.bf16.mxu1 %vm4862_vm2, %v3799_v48 }
 0x2b3   :  { %v4888_v52 = vpop.permute.xlu0 %544 }
 0x2b7   :  { %v4890_v28 = vpop.permute.xlu1 %547  ;;  %v4892_v29 = vpop.permute.xlu0 %553 }
 0x2b8   :  { %3804 = vmatpush3.bf16.xpose.msk.msra.mxu1 %vm4862_vm2, %v3799_v48 }
 0x2b9   :  { %3807 = vmatprep.subr.msk.bf16.mxu1 %vm4862_vm2, %v3805_v23 }
 0x2bb   :  { %v4898_v57 = vpop.permute.xlu1 %550  ;;  %v4900_v17 = vpop.permute.xlu0 %559 }
 0x2bc   :  { %5993 = vst [vmem:[#allocation4_spill] sm:$0xff] %v4900_v17 }
 0x2bf   :  { %v4902_v35 = vpop.permute.xlu1 %556  ;;  %v4904_v59 = vpop.permute.xlu0 %565 }
 0x2c0   :  { %5994 = vst [vmem:[#allocation5_spill] sm:$0xff] %v4902_v35  ;;  %5995 = vst [vmem:[#allocation6_spill] sm:$0xff] %v4904_v59  ;;  %3810 = vmatpush3.bf16.xpose.msk.msra.mxu1 %vm4862_vm2, %v3805_v23 }
 0x2c1   :  { %3813 = vmatprep.subr.msk.bf16.mxu1 %vm4862_vm2, %v3811_v58 }
 0x2c3   :  { %v4910_v44 = vpop.permute.xlu1 %562  ;;  %v4912_v60 = vpop.permute.xlu0 %571 }
 0x2c4   :  { %5996 = vst [vmem:[#allocation7_spill] sm:$0xff] %v4910_v44  ;;  %5997 = vst [vmem:[#allocation8_spill] sm:$0xff] %v4912_v60 }
 0x2c7   :  { %v4914_v61 = vpop.permute.xlu1 %568  ;;  %v4916_v21 = vpop.permute.xlu0 %577 }
 0x2c8   :  { %5998 = vst [vmem:[#allocation9_spill] sm:$0xff] %v4914_v61  ;;  %5999 = vst [vmem:[#allocation10_spill] sm:$0xff] %v4916_v21  ;;  %3816 = vmatpush3.bf16.xpose.msk.msra.mxu1 %vm4862_vm2, %v3811_v58 }
 0x2cb   :  { %v4920_v47 = vpop.permute.xlu1 %574  ;;  %v4922_v62 = vpop.permute.xlu0 %583 }
 0x2cc   :  { %6000 = vst [vmem:[#allocation11_spill] sm:$0xff] %v4920_v47  ;;  %6001 = vst [vmem:[#allocation12_spill] sm:$0xff] %v4922_v62 }
 0x2cf   :  { %v4924_v63 = vpop.permute.xlu1 %580  ;;  %v4926_v25 = vpop.permute.xlu0 %589  ;;  %3442 = vmatmul.mubr.msk.f32.vlgmr.msra.gmra.mrb[0].mxu1 %vm663_vm1, %v4716_v2 }
 0x2d0   :  { %6002 = vst [vmem:[#allocation13_spill] sm:$0xff] %v4924_v63  ;;  %6003 = vst [vmem:[#allocation14_spill] sm:$0xff] %v4926_v25  ;;  %3444 = vmatprep.mubr.msk.f32.mxu1 %vm663_vm1, %v4728_v7 }
 0x2d3   :  { %v4932_v3 = vpop.permute.xlu1 %586  ;;  %3445 = vmatmul.mubr.msk.f32.gmra.mrb[2].mxu1 %vm663_vm1, %v4726_v5  ;;  %v4036_v30 = vpop.permute.xlu0 %4035 }
 0x2d4   :  { %6004 = vst [vmem:[#allocation15_spill] sm:$0xff] %v4932_v3  ;;  %3447 = vmatprep.mubr.msk.f32.mxu1 %vm663_vm1, %v4738_v13  ;;  %v4038_v45 = vunpack.i.h.bf16 %v4036_v30  ;;  %v4037_v12 = vunpack.i.l.bf16 %v4036_v30 }
 0x2d6   :  { %v3821_v20 = vpack.c.bf16 %v4038_v45, %v4037_v12 }
 0x2d7   :  { %v4031_v6 = vpop.permute.xlu1 %4030  ;;  %3448 = vmatmul.mubr.msk.f32.gmra.mrb[4].mxu1 %vm663_vm1, %v4736_v9  ;;  %v4046_v41 = vpop.permute.xlu0 %4045 }
 0x2d8   :  { %v4033_v14 = vunpack.i.h.bf16 %v4031_v6  ;;  %v4032_v18 = vunpack.i.l.bf16 %v4031_v6  ;;  %3450 = vmatprep.mubr.msk.f32.mxu1 %vm663_vm1, %v4748_v19  ;;  %v4048_v10 = vunpack.i.h.bf16 %v4046_v41  ;;  %v4047_v48 = vunpack.i.l.bf16 %v4046_v41 }
 0x2da   :  { %v3817_v22 = vpack.c.bf16 %v4033_v14, %v4032_v18  ;;  %v3829_v23 = vpack.c.bf16 %v4048_v10, %v4047_v48  ;;  %v4968_v10 = vld [vmem:[%s5962_s2] ss:$0 sm:$0xff]  ;;  %s4361_s2 = smov 112  }
 0x2db   :  { %v4041_v27 = vpop.permute.xlu1 %4040  ;;  %3451 = vmatmul.mubr.msk.f32.gmra.mrb[6].mxu1 %vm663_vm1, %v4746_v54  ;;  %v4056_v53 = vpop.permute.xlu0 %4055  ;;  %vm596_vm3 = vcmp.eq.s32.totalorder %v4890_v28, %v4968_v10  ;;  %vm595_vm4 = vcmp.eq.s32.totalorder %v4888_v52, %v4968_v10  ;;  %vm599_vm5 = vcmp.eq.s32.totalorder %v4902_v35, %v4968_v10  ;;  %vm601_vm6 = vcmp.eq.s32.totalorder %v4910_v44, %v4968_v10 }
 0x2dc   :  { %v4043_v31 = vunpack.i.h.bf16 %v4041_v27  ;;  %v4042_v33 = vunpack.i.l.bf16 %v4041_v27  ;;  %3453 = vmatprep.mubr.msk.f32.mxu1 %vm663_vm1, %v4758_v55  ;;  %3818 = vmatprep.subr.bf16.mxu0 %v3817_v22  ;;  %v4058_v58 = vunpack.i.h.bf16 %v4056_v53  ;;  %v4057_v30 = vunpack.i.l.bf16 %v4056_v53 }
 0x2dd   :  { %3820 = vmatpush3.bf16.msra.mxu0 %v3817_v22  ;;  %vm603_vm7 = vcmp.eq.s32.totalorder %v4914_v61, %v4968_v10  ;;  %vm605_vm8 = vcmp.eq.s32.totalorder %v4920_v47, %v4968_v10  ;;  %vm5974_vm9 = vcmp.eq.s32.totalorder %v4924_v63, %v4968_v10  ;;  %vm5973_vm10 = vcmp.eq.s32.totalorder %v4932_v3, %v4968_v10 }
 0x2de   :  { %3822 = vmatprep.subr.bf16.mxu0 %v3821_v20  ;;  %v3825_v49 = vpack.c.bf16 %v4043_v31, %v4042_v33  ;;  %v3837_v14 = vpack.c.bf16 %v4058_v58, %v4057_v30  ;;  %vm598_vm11 = vcmp.eq.s32.totalorder %v4892_v29, %v4968_v10  ;;  %vm597_vm12 = vcmp.eq.s32.totalorder %v4898_v57, %v4968_v10 }
 0x2df   :  { %v4051_v1 = vpop.permute.xlu1 %4050  ;;  %3454 = vmatmul.mubr.msk.f32.gmra.mrb[8].mxu1 %vm663_vm1, %v4756_v26  ;;  %vm600_vm13 = vcmp.eq.s32.totalorder %v4900_v17, %v4968_v10  ;;  %vm602_vm14 = vcmp.eq.s32.totalorder %v4904_v59, %v4968_v10  ;;  %vm604_vm15 = vcmp.eq.s32.totalorder %v4912_v60, %v4968_v10  ;;  %vm606_vm0 = vcmp.eq.s32.totalorder %v4916_v21, %v4968_v10 }
 0x2e0   :  { %3456 = vmatprep.mubr.msk.f32.mxu1 %vm663_vm1, %v4768_v34  ;;  %v4053_v51 = vunpack.i.h.bf16 %v4051_v1  ;;  %v4052_v11 = vunpack.i.l.bf16 %v4051_v1 }
 0x2e1   :  { %3824 = vmatpush3.bf16.msra.mxu0 %v3821_v20 }
 0x2e2   :  { %3826 = vmatprep.subr.bf16.mxu0 %v3825_v49  ;;  %v3833_v6 = vpack.c.bf16 %v4053_v51, %v4052_v11 }
 0x2e3   :  { %v4061_v50 = vpop.permute.xlu1 %4060  ;;  %3457 = vmatmul.mubr.msk.f32.gmra.mrb[10].mxu1 %vm663_vm1, %v4766_v32 }
 0x2e4   :  { %3459 = vmatprep.mubr.msk.f32.mxu1 %vm663_vm1, %v4778_v42  ;;  %v4063_v45 = vunpack.i.h.bf16 %v4061_v50  ;;  %v4062_v12 = vunpack.i.l.bf16 %v4061_v50 }
 0x2e5   :  { %3828 = vmatpush3.bf16.msra.mxu0 %v3825_v49 }
 0x2e6   :  { %3830 = vmatprep.subr.bf16.mxu0 %v3829_v23  ;;  %v3841_v31 = vpack.c.bf16 %v4063_v45, %v4062_v12 }
 0x2e7   :  { %v4066_v56 = vpop.permute.xlu1 %4065  ;;  %3460 = vmatmul.mubr.msk.f32.gmra.mrb[12].mxu1 %vm663_vm1, %v4776_v40 }
 0x2e8   :  { %3462 = vmatprep.mubr.msk.f32.mxu1 %vm663_vm1, %v4788_v24  ;;  %v4068_v33 = vunpack.i.h.bf16 %v4066_v56  ;;  %v4067_v20 = vunpack.i.l.bf16 %v4066_v56 }
 0x2e9   :  { %3832 = vmatpush3.bf16.msra.mxu0 %v3829_v23 }
 0x2ea   :  { %3834 = vmatprep.subr.bf16.mxu0 %v3833_v6  ;;  %v4960_v1 = vpack.c.bf16 %v4068_v33, %v4067_v20 }
 0x2eb   :  { %3463 = vmatmul.mubr.msk.f32.gmra.mrb[14].mxu1 %vm663_vm1, %v4786_v46  ;;  %v4071_v18 = vpop.permute.xlu1 %4070 }
 0x2ec   :  { %v4073_v22 = vunpack.i.h.bf16 %v4071_v18  ;;  %v4072_v27 = vunpack.i.l.bf16 %v4071_v18 }
 0x2ed   :  { %3836 = vmatpush3.bf16.msra.mxu0 %v3833_v6 }
 0x2ee   :  { %3838 = vmatprep.subr.bf16.mxu0 %v3837_v14  ;;  %v3845_v41 = vpack.c.bf16 %v4073_v22, %v4072_v27 }
 0x2f1   :  { %3840 = vmatpush3.bf16.msra.mxu0 %v3837_v14 }
 0x2f2   :  { %3842 = vmatprep.subr.bf16.mxu0 %v3841_v31 }
 0x2f5   :  { %3844 = vmatpush3.bf16.msra.mxu0 %v3841_v31 }
 0x2f6   :  { %3846 = vmatprep.subr.bf16.mxu0 %v3845_v41 }
 0x2f9   :  { %3848 = vmatpush3.bf16.msra.mxu0 %v3845_v41 }
 0x2fa   :  { %3851 = vmatprep.subr.msk.bf16.mxu0 %vm4862_vm2, %v4960_v1 }
 0x3a2   :  { %v3443_v48 = vpop.f32.mrb[0].mxu1 }
 0x3a3   :  { %v794_v49 = vpop.f32.mrb[1].mxu1  ;;  %v4977_v50 = vsel %vm596_vm3, %v3443_v48, -1e+30 }
 0x3a4   :  { %891 = vmax.xlane.f32.xlu0 %v4977_v50  ;;  %v4983_v51 = vsel %vm595_vm4, %v794_v49, -1e+30 }
 0x3a5   :  { %889 = vmax.xlane.f32.xlu1 %v4983_v51 }
 0x3a6   :  { %v3446_v11 = vpop.f32.mrb[2].mxu1 }
 0x3a7   :  { %v804_v23 = vpop.f32.mrb[3].mxu1 }
 0x3aa   :  { %v3449_v53 = vpop.f32.mrb[4].mxu1 }
 0x3ab   :  { %v814_v56 = vpop.f32.mrb[5].mxu1 }
 0x3ac   :  { %v4991_v58 = vsel %vm599_vm5, %v814_v56, -1e+30 }
 0x3ad   :  { %897 = vmax.xlane.f32.xlu1 %v4991_v58 }
 0x3ae   :  { %v3452_v30 = vpop.f32.mrb[6].mxu1 }
 0x3af   :  { %v824_v6 = vpop.f32.mrb[7].mxu1 }
 0x3b0   :  { %v4999_v45 = vsel %vm601_vm6, %v824_v6, -1e+30  ;;  %v876_v6 = vsel %vm598_vm11, %v3446_v11, -1e+30  ;;  %v880_v11 = vsel %vm602_vm14, %v3452_v30, -1e+30 }
 0x3b1   :  { %901 = vmax.xlane.f32.xlu1 %v4999_v45 }
 0x3b2   :  { %v3455_v12 = vpop.f32.mrb[8].mxu1 }
 0x3b3   :  { %v834_v14 = vpop.f32.mrb[9].mxu1 }
 0x3b4   :  { %v5007_v18 = vsel %vm603_vm7, %v834_v14, -1e+30  ;;  %v875_v14 = vsel %vm597_vm12, %v804_v23, -1e+30  ;;  %v882_v23 = vsel %vm604_vm15, %v3455_v12, -1e+30 }
 0x3b5   :  { %905 = vmax.xlane.f32.xlu1 %v5007_v18 }
 0x3b6   :  { %v3458_v22 = vpop.f32.mrb[10].mxu1 }
 0x3b7   :  { %v844_v27 = vpop.f32.mrb[11].mxu1 }
 0x3b8   :  { %v5015_v31 = vsel %vm605_vm8, %v844_v27, -1e+30  ;;  %v878_v27 = vsel %vm600_vm13, %v3449_v53, -1e+30  ;;  %v5070_v53 = vsel %vm606_vm0, %v3458_v22, -1e+30  ;;  %v5089_v22 = vpop.permute.xlu1 %4080 }
 0x3b9   :  { %909 = vmax.xlane.f32.xlu1 %v5015_v31 }
 0x3ba   :  { %4075 = vrot.lane.b32.xlu0 %v4734_v8, %s4360_s29  ;;  %v3461_v33 = vpop.f32.mrb[12].mxu1 }
 0x3bb   :  { %v854_v20 = vpop.f32.mrb[13].mxu1 }
 0x3bc   :  { %v5025_v41 = vsel %vm5974_vm9, %v854_v20, -1e+30  ;;  %vm610_vm9 = vcmp.eq.s32.totalorder %v4926_v25, %v4968_v10  ;;  %v5091_v20 = vpop.permute.xlu1 %4085 }
 0x3bd   :  { %913 = vmax.xlane.f32.xlu1 %v5025_v41 }
 0x3be   :  { %v3464_v48 = vpop.f32.mrb[14].mxu1 }
 0x3bf   :  { %v864_v49 = vpop.f32.mrb[15].mxu1  ;;  %v5086_v12 = vsel %vm610_vm9, %v3464_v48, -1e+30 }
 0x3c0   :  { %v5033_v56 = vsel %vm5973_vm10, %v864_v49, -1e+30  ;;  %vm608_vm10 = vcmp.eq.s32.totalorder %v4922_v62, %v4968_v10 }
 0x3c1   :  { %917 = vmax.xlane.f32.xlu1 %v5033_v56  ;;  %v5078_v30 = vsel %vm608_vm10, %v3461_v33, -1e+30 }
 0x3d2   :  { %4095 = vrot.lane.b32.xlu1 %v4774_v39, %s4360_s29 }
 0x3d6   :  { %4100 = vrot.lane.b32.xlu1 %v4784_v43, %s4360_s29 }
 0x3d9   :  { %895 = vmax.xlane.f32.xlu0 %v876_v6 }
 0x3dd   :  { %893 = vmax.xlane.f32.xlu0 %v875_v14 }
 0x3e1   :  { %899 = vmax.xlane.f32.xlu0 %v878_v27 }
 0x3e5   :  { %903 = vmax.xlane.f32.xlu0 %v880_v11 }
 0x3e9   :  { %907 = vmax.xlane.f32.xlu0 %v882_v23 }
 0x3ed   :  { %911 = vmax.xlane.f32.xlu0 %v5070_v53 }
 0x3f1   :  { %915 = vmax.xlane.f32.xlu0 %v5078_v30 }
 0x3f5   :  { %919 = vmax.xlane.f32.xlu0 %v5086_v12 }
 0x431   :  { %v892_v49 = vpop.xlane.xlu0 %891 }
 0x432   :  { %v922_v33 = vsub.f32 %v4977_v50, %v892_v49  ;;  %v890_v43 = vpop.xlane.xlu1 %889 }
 0x433   :  { %v921_v39 = vsub.f32 %v4983_v51, %v890_v43 }
 0x434   :  { %v939_v3 = vmul.f32 1.442695, %v922_v33 }
 0x435   :  { %v937_v62 = vmul.f32 1.442695, %v921_v39  ;;  %v5103_v25 = vpop.permute.xlu0 %4075 }
 0x436   :  { %4181 = vpow2.f32 %v939_v3 }
 0x437   :  { %4183 = vpow2.f32 %v937_v62 }
 0x43a   :  { %v898_v62 = vpop.xlane.xlu1 %897 }
 0x43b   :  { %v925_v21 = vsub.f32 %v4991_v58, %v898_v62 }
 0x43d   :  { %v945_v59 = vmul.f32 1.442695, %v925_v21 }
 0x43e   :  { %v902_v17 = vpop.xlane.xlu1 %901 }
 0x440   :  { %v5095_v63 = vpop.eup %4181 }
 0x441   :  { %v5097_v48 = vpop.eup %4183  ;;  %971 = vadd.xlane.f32.xlu0 %v5095_v63 }
 0x442   :  { %969 = vadd.xlane.f32.xlu1 %v5097_v48  ;;  %v906_v58 = vpop.xlane.xlu1 %905 }
 0x457   :  { %4090 = vrot.lane.b32.xlu0 %v4764_v0, %s4360_s29 }
 0x466   :  { %v896_v50 = vpop.xlane.xlu0 %895 }
 0x467   :  { %v924_v49 = vsub.f32 %v876_v6, %v896_v50  ;;  %v927_v6 = vsub.f32 %v4999_v45, %v902_v17  ;;  %v910_v17 = vpop.xlane.xlu1 %909 }
 0x469   :  { %v943_v43 = vmul.f32 1.442695, %v924_v49 }
 0x46a   :  { %v894_v51 = vpop.xlane.xlu0 %893 }
 0x46b   :  { %4185 = vpow2.f32 %v943_v43  ;;  %v923_v39 = vsub.f32 %v875_v14, %v894_v51  ;;  %v914_v51 = vpop.xlane.xlu1 %913 }
 0x46d   :  { %v941_v3 = vmul.f32 1.442695, %v923_v39 }
 0x46e   :  { %v900_v33 = vpop.xlane.xlu0 %899 }
 0x46f   :  { %4187 = vpow2.f32 %v941_v3  ;;  %v926_v47 = vsub.f32 %v878_v27, %v900_v33  ;;  %v933_v3 = vsub.f32 %v5025_v41, %v914_v51 }
 0x471   :  { %v947_v60 = vmul.f32 1.442695, %v926_v47  ;;  %v949_v47 = vmul.f32 1.442695, %v927_v6 }
 0x472   :  { %v904_v61 = vpop.xlane.xlu0 %903 }
 0x473   :  { %4189 = vpow2.f32 %v947_v60  ;;  %v928_v44 = vsub.f32 %v880_v11, %v904_v61  ;;  %v931_v11 = vsub.f32 %v5015_v31, %v910_v17  ;;  %v918_v31 = vpop.xlane.xlu1 %917 }
 0x474   :  { %4191 = vpow2.f32 %v945_v59  ;;  %v929_v59 = vsub.f32 %v5007_v18, %v906_v58 }
 0x475   :  { %v5106_v35 = vpop.eup %4185  ;;  %v951_v14 = vmul.f32 1.442695, %v928_v44  ;;  %v957_v39 = vmul.f32 1.442695, %v931_v11 }
 0x476   :  { %975 = vadd.xlane.f32.xlu0 %v5106_v35  ;;  %v908_v50 = vpop.xlane.xlu0 %907  ;;  %v953_v45 = vmul.f32 1.442695, %v929_v59 }
 0x477   :  { %4193 = vpow2.f32 %v951_v14  ;;  %v930_v21 = vsub.f32 %v882_v23, %v908_v50  ;;  %v961_v14 = vmul.f32 1.442695, %v933_v3  ;;  %v935_v50 = vsub.f32 %v5033_v56, %v918_v31 }
 0x478   :  { %4195 = vpow2.f32 %v949_v47 }
 0x479   :  { %v5110_v49 = vpop.eup %4187  ;;  %v955_v27 = vmul.f32 1.442695, %v930_v21  ;;  %v965_v58 = vmul.f32 1.442695, %v935_v50 }
 0x47a   :  { %973 = vadd.xlane.f32.xlu1 %v5110_v49  ;;  %v912_v61 = vpop.xlane.xlu0 %911 }
 0x47b   :  { %4197 = vpow2.f32 %v955_v27  ;;  %v932_v21 = vsub.f32 %v5070_v53, %v912_v61 }
 0x47c   :  { %4199 = vpow2.f32 %v953_v45 }
 0x47d   :  { %v5113_v60 = vpop.eup %4189  ;;  %4201 = vpow2.f32 %v957_v39  ;;  %v959_v27 = vmul.f32 1.442695, %v932_v21 }
 0x47e   :  { %979 = vadd.xlane.f32.xlu0 %v5113_v60  ;;  %v5117_v44 = vpop.eup %4191  ;;  %v916_v43 = vpop.xlane.xlu0 %915 }
 0x47f   :  { %v934_v18 = vsub.f32 %v5078_v30, %v916_v43 }
 0x481   :  { %v5121_v23 = vpop.eup %4193  ;;  %v963_v33 = vmul.f32 1.442695, %v934_v18 }
 0x482   :  { %977 = vadd.xlane.f32.xlu0 %v5117_v44  ;;  %v5125_v62 = vpop.eup %4195  ;;  %v920_v56 = vpop.xlane.xlu0 %919 }
 0x483   :  { %4203 = vpow2.f32 %v963_v33  ;;  %v936_v17 = vsub.f32 %v5086_v12, %v920_v56  ;;  %v4096_v12 = vpop.permute.xlu1 %4095 }
 0x484   :  { %4205 = vpow2.f32 %v961_v14 }
 0x485   :  { %v5131_v6 = vpop.eup %4197  ;;  %4207 = vpow2.f32 %v965_v58  ;;  %v967_v11 = vmul.f32 1.442695, %v936_v17 }
 0x486   :  { %983 = vadd.xlane.f32.xlu0 %v5121_v23  ;;  %v5135_v30 = vpop.eup %4199  ;;  %4209 = vpow2.f32 %v959_v27 }
 0x487   :  { %v5138_v41 = vpop.eup %4201  ;;  %4211 = vpow2.f32 %v967_v11 }
 0x48a   :  { %981 = vadd.xlane.f32.xlu0 %v5125_v62 }
 0x48b   :  { %4105 = vrot.lane.b32.xlu1 %v4797_v36, %s4360_s29 }
 0x48d   :  { %v5141_v47 = vpop.eup %4203 }
 0x48e   :  { %987 = vadd.xlane.f32.xlu0 %v5131_v6  ;;  %v5145_v59 = vpop.eup %4205 }
 0x48f   :  { %v5149_v45 = vpop.eup %4207 }
 0x490   :  { %v5152_v43 = vpop.eup %4209 }
 0x491   :  { %v5155_v53 = vpop.eup %4211 }
 0x492   :  { %985 = vadd.xlane.f32.xlu0 %v5135_v30 }
 0x496   :  { %989 = vadd.xlane.f32.xlu0 %v5138_v41 }
 0x49a   :  { %995 = vadd.xlane.f32.xlu0 %v5141_v47 }
 0x49e   :  { %993 = vadd.xlane.f32.xlu0 %v5145_v59 }
 0x4a2   :  { %997 = vadd.xlane.f32.xlu0 %v5149_v45 }
 0x4af   :  { %991 = vadd.xlane.f32.xlu1 %v5152_v43 }
 0x4b3   :  { %999 = vadd.xlane.f32.xlu1 %v5155_v53 }
 0x4b8   :  { %1226 = vrot.lane.b32.xlu0 %v4718_v4, %s4361_s2  ;;  %v4101_v4 = vpop.permute.xlu1 %4100 }
 0x4bc   :  { %1240 = vrot.lane.b32.xlu0 %v4746_v54, %s4361_s2 }
 0x4c0   :  { %1244 = vrot.lane.b32.xlu0 %v4756_v26, %s4361_s2  ;;  %v4078_v26 = vunpack.i.h.bf16 %v5103_v25 }
 0x4c4   :  { %1228 = vrot.lane.b32.xlu1 %v4716_v2, %s4361_s2  ;;  %1248 = vrot.lane.b32.xlu0 %v4766_v32, %s4361_s2  ;;  %v4077_v32 = vunpack.i.l.bf16 %v5103_v25 }
 0x4c8   :  { %1230 = vrot.lane.b32.xlu1 %v4728_v7, %s4361_s2  ;;  %1252 = vrot.lane.b32.xlu0 %v4776_v40, %s4361_s2  ;;  %v4088_v40 = vunpack.i.h.bf16 %v5091_v20 }
 0x4cc   :  { %1232 = vrot.lane.b32.xlu1 %v4726_v5, %s4361_s2  ;;  %1256 = vrot.lane.b32.xlu0 %v4786_v46, %s4361_s2 }
 0x4ce   :  { %v972_v54 = vpop.xlane.xlu0 %971 }
 0x4cf   :  { %4213 = vrcp.f32 %v972_v54  ;;  %v970_v2 = vpop.xlane.xlu1 %969 }
 0x4d0   :  { %4215 = vrcp.f32 %v970_v2  ;;  %1234 = vrot.lane.b32.xlu1 %v4738_v13, %s4361_s2  ;;  %4115 = vrot.lane.b32.xlu0 %v4734_v8, %s4362_s3 }
 0x4d4   :  { %1236 = vrot.lane.b32.xlu1 %v4736_v9, %s4361_s2  ;;  %4125 = vrot.lane.b32.xlu0 %v4754_v16, %s4362_s3  ;;  %v3855_v9 = vpack.c.bf16 %v4078_v26, %v4077_v32  ;;  %v4082_v16 = vunpack.i.l.bf16 %v5089_v22 }
 0x4d8   :  { %1238 = vrot.lane.b32.xlu1 %v4748_v19, %s4361_s2  ;;  %v4083_v19 = vunpack.i.h.bf16 %v5089_v22 }
 0x4d9   :  { %v4214_v5 = vpop.eup %4213 }
 0x4da   :  { %v4216_v7 = vpop.eup %4215  ;;  %v1018_v8 = vmul.f32 %v4214_v5, %v5095_v63  ;;  %v4091_v63 = vpop.permute.xlu0 %4090 }
 0x4db   :  { %v1017_v13 = vmul.f32 %v4216_v7, %v5097_v48 }
 0x4dc   :  { %1242 = vrot.lane.b32.xlu1 %v4758_v55, %s4361_s2  ;;  %v3861_v55 = vpack.c.bf16 %v4083_v19, %v4082_v16 }
 0x4dd   :  { %3497 = vmatprep.mubr.f32.mxu0 %v1017_v13 }
 0x4de   :  { %3498 = vmatmul.mubr.f32.vlgmr.msra.gmra.mrb[16].mxu0 %v1018_v8 }
 0x4df   :  { %3854 = vmatpush3.bf16.xpose.msk.msra.mxu0 %vm4862_vm2, %v4960_v1  ;;  %v4097_v1 = vunpack.i.l.bf16 %v4096_v12 }
 0x4e0   :  { %3857 = vmatprep.subr.msk.bf16.mxu0 %vm4862_vm2, %v3855_v9  ;;  %1246 = vrot.lane.b32.xlu1 %v4768_v34, %s4361_s2  ;;  %v4087_v34 = vunpack.i.l.bf16 %v5091_v20  ;;  %v4102_v20 = vunpack.i.l.bf16 %v4101_v4 }
 0x4e2   :  { %v3867_v46 = vpack.c.bf16 %v4088_v40, %v4087_v34 }
 0x4e4   :  { %1250 = vrot.lane.b32.xlu1 %v4778_v42, %s4361_s2  ;;  %v4093_v42 = vunpack.i.h.bf16 %v4091_v63 }
 0x4e7   :  { %3860 = vmatpush3.bf16.xpose.msk.msra.mxu0 %vm4862_vm2, %v3855_v9 }
 0x4e8   :  { %3863 = vmatprep.subr.msk.bf16.mxu0 %vm4862_vm2, %v3861_v55  ;;  %1254 = vrot.lane.b32.xlu1 %v4788_v24, %s4361_s2  ;;  %v4092_v24 = vunpack.i.l.bf16 %v4091_v63 }
 0x4ea   :  { %v3873_v25 = vpack.c.bf16 %v4093_v42, %v4092_v24 }
 0x4ec   :  { %4110 = vrot.lane.b32.xlu1 %v4724_v38, %s4362_s3  ;;  %v4098_v38 = vunpack.i.h.bf16 %v4096_v12 }
 0x4ee   :  { %v3879_v22 = vpack.c.bf16 %v4098_v38, %v4097_v1 }
 0x4ef   :  { %3866 = vmatpush3.bf16.xpose.msk.msra.mxu0 %vm4862_vm2, %v3861_v55 }
 0x4f0   :  { %3869 = vmatprep.subr.msk.bf16.mxu0 %vm4862_vm2, %v3867_v46  ;;  %4120 = vrot.lane.b32.xlu1 %v4744_v15, %s4362_s3  ;;  %v4103_v15 = vunpack.i.h.bf16 %v4101_v4 }
 0x4f4   :  { %4130 = vrot.lane.b32.xlu1 %v4764_v0, %s4362_s3  ;;  %v3885_v0 = vpack.c.bf16 %v4103_v15, %v4102_v20 }
 0x4f7   :  { %3872 = vmatpush3.bf16.xpose.msk.msra.mxu0 %vm4862_vm2, %v3867_v46 }
 0x4f8   :  { %3875 = vmatprep.subr.msk.bf16.mxu0 %vm4862_vm2, %v3873_v25 }
 0x4ff   :  { %3878 = vmatpush3.bf16.xpose.msk.msra.mxu0 %vm4862_vm2, %v3873_v25 }
 0x500   :  { %3881 = vmatprep.subr.msk.bf16.mxu0 %vm4862_vm2, %v3879_v22 }
 0x503   :  { %v976_v48 = vpop.xlane.xlu0 %975 }
 0x504   :  { %4217 = vrcp.f32 %v976_v48 }
 0x507   :  { %3884 = vmatpush3.bf16.xpose.msk.msra.mxu0 %vm4862_vm2, %v3879_v22  ;;  %v974_v61 = vpop.xlane.xlu1 %973 }
 0x508   :  { %4219 = vrcp.f32 %v974_v61  ;;  %3887 = vmatprep.subr.msk.bf16.mxu0 %vm4862_vm2, %v3885_v0 }
 0x50b   :  { %v980_v51 = vpop.xlane.xlu0 %979  ;;  %v4106_v39 = vpop.permute.xlu1 %4105 }
 0x50c   :  { %v4108_v18 = vunpack.i.h.bf16 %v4106_v39  ;;  %v4107_v3 = vunpack.i.l.bf16 %v4106_v39  ;;  %4221 = vrcp.f32 %v980_v51 }
 0x50e   :  { %v3891_v33 = vpack.c.bf16 %v4108_v18, %v4107_v3  ;;  %v4218_v14 = vpop.eup %4217 }
 0x50f   :  { %3890 = vmatpush3.bf16.xpose.msk.msra.mxu0 %vm4862_vm2, %v3885_v0  ;;  %v978_v31 = vpop.xlane.xlu0 %977  ;;  %v1020_v56 = vmul.f32 %v4218_v14, %v5106_v35 }
 0x510   :  { %4223 = vrcp.f32 %v978_v31  ;;  %3893 = vmatprep.subr.msk.bf16.mxu0 %vm4862_vm2, %v3891_v33 }
 0x512   :  { %v4220_v50 = vpop.eup %4219 }
 0x513   :  { %v984_v58 = vpop.xlane.xlu0 %983  ;;  %v1019_v21 = vmul.f32 %v4220_v50, %v5110_v49 }
 0x514   :  { %4225 = vrcp.f32 %v984_v58 }
 0x515   :  { %3500 = vmatprep.mubr.f32.mxu0 %v1019_v21 }
 0x516   :  { %3501 = vmatmul.mubr.f32.gmra.mrb[18].mxu0 %v1020_v56  ;;  %v4222_v17 = vpop.eup %4221 }
 0x517   :  { %3896 = vmatpush3.bf16.xpose.msk.msra.mxu0 %vm4862_vm2, %v3891_v33  ;;  %v982_v27 = vpop.xlane.xlu0 %981  ;;  %v1022_v54 = vmul.f32 %v4222_v17, %v5113_v60 }
 0x518   :  { %4227 = vrcp.f32 %v982_v27 }
 0x51a   :  { %v4224_v11 = vpop.eup %4223 }
 0x51b   :  { %v988_v12 = vpop.xlane.xlu0 %987  ;;  %v1021_v4 = vmul.f32 %v4224_v11, %v5117_v44 }
 0x51c   :  { %4229 = vrcp.f32 %v988_v12 }
 0x51d   :  { %3503 = vmatprep.mubr.f32.mxu0 %v1021_v4 }
 0x51e   :  { %3504 = vmatmul.mubr.f32.gmra.mrb[20].mxu0 %v1022_v54  ;;  %v4226_v35 = vpop.eup %4225 }
 0x51f   :  { %v986_v49 = vpop.xlane.xlu0 %985  ;;  %v1024_v7 = vmul.f32 %v4226_v35, %v5121_v23 }
 0x520   :  { %4231 = vrcp.f32 %v986_v49 }
 0x522   :  { %v4228_v2 = vpop.eup %4227 }
 0x523   :  { %v990_v5 = vpop.xlane.xlu0 %989  ;;  %v1023_v37 = vmul.f32 %v4228_v2, %v5125_v62 }
 0x524   :  { %4233 = vrcp.f32 %v990_v5 }
 0x525   :  { %3506 = vmatprep.mubr.f32.mxu0 %v1023_v37 }
 0x526   :  { %3507 = vmatmul.mubr.f32.gmra.mrb[22].mxu0 %v1024_v7  ;;  %v4230_v26 = vpop.eup %4229 }
 0x527   :  { %v1026_v60 = vmul.f32 %v4230_v26, %v5131_v6  ;;  %v996_v9 = vpop.xlane.xlu0 %995 }
 0x52a   :  { %v4232_v32 = vpop.eup %4231 }
 0x52b   :  { %v1025_v44 = vmul.f32 %v4232_v32, %v5135_v30  ;;  %v994_v19 = vpop.xlane.xlu0 %993 }
 0x52c   :  { %4235 = vrcp.f32 %v994_v19 }
 0x52d   :  { %3509 = vmatprep.mubr.f32.mxu0 %v1025_v44 }
 0x52e   :  { %v4234_v13 = vpop.eup %4233  ;;  %3510 = vmatmul.mubr.f32.gmra.mrb[24].mxu0 %v1026_v60 }
 0x52f   :  { %v1027_v8 = vmul.f32 %v4234_v13, %v5138_v41  ;;  %v998_v16 = vpop.xlane.xlu0 %997 }
 0x531   :  { %3512 = vmatprep.mubr.f32.mxu0 %v1027_v8 }
 0x533   :  { %v1227_v40 = vpop.permute.xlu0 %1226 }
 0x536   :  { %v4236_v30 = vpop.eup %4235 }
 0x537   :  { %v1029_v41 = vmul.f32 %v4236_v30, %v5145_v59  ;;  %v1241_v24 = vpop.permute.xlu0 %1240 }
 0x53b   :  { %v1245_v48 = vpop.permute.xlu0 %1244 }
 0x53c   :  { %v992_v62 = vpop.xlane.xlu1 %991 }
 0x53d   :  { %4237 = vrcp.f32 %v992_v62 }
 0x53e   :  { %4239 = vrcp.f32 %v996_v9 }
 0x53f   :  { %4241 = vrcp.f32 %v998_v16 }
 0x540   :  { %v1000_v23 = vpop.xlane.xlu1 %999 }
 0x541   :  { %4243 = vrcp.f32 %v1000_v23 }
 0x544   :  { %v1229_v55 = vpop.permute.xlu1 %1228 }
 0x547   :  { %v4238_v6 = vpop.eup %4237 }
 0x548   :  { %v1231_v34 = vpop.permute.xlu1 %1230  ;;  %v1028_v46 = vmul.f32 %v4238_v6, %v5152_v43  ;;  %v4240_v63 = vpop.eup %4239 }
 0x549   :  { %v4242_v42 = vpop.eup %4241  ;;  %v1030_v38 = vmul.f32 %v4240_v63, %v5141_v47  ;;  %v1249_v43 = vpop.permute.xlu0 %1248 }
 0x54a   :  { %3513 = vmatmul.mubr.f32.gmra.mrb[26].mxu0 %v1028_v46  ;;  %v1031_v22 = vmul.f32 %v4242_v42, %v5149_v45 }
 0x54b   :  { %3515 = vmatprep.mubr.f32.mxu0 %v1029_v41  ;;  %v4244_v1 = vpop.eup %4243 }
 0x54c   :  { %v1233_v25 = vpop.permute.xlu1 %1232  ;;  %v1032_v20 = vmul.f32 %v4244_v1, %v5155_v53 }
 0x54d   :  { %v1253_v45 = vpop.permute.xlu0 %1252 }
 0x54e   :  { %3516 = vmatmul.mubr.f32.gmra.mrb[28].mxu0 %v1030_v38 }
 0x54f   :  { %3518 = vmatprep.mubr.f32.mxu0 %v1031_v22 }
 0x550   :  { %v1235_v15 = vpop.permute.xlu1 %1234 }
 0x551   :  { %v1257_v61 = vpop.permute.xlu0 %1256 }
 0x552   :  { %3519 = vmatmul.mubr.f32.gmra.mrb[30].mxu0 %v1032_v20 }
 0x553   :  { %3553 = vmatprep.mubr.msk.f32.mxu0 %vm663_vm1, %v1227_v40 }
 0x554   :  { %v1237_v59 = vpop.permute.xlu1 %1236 }
 0x555   :  { %v4116_v18 = vpop.permute.xlu0 %4115 }
 0x556   :  { %3554 = vmatmul.mubr.msk.f32.vlgmr.msra.gmra.mrb[32].mxu0 %vm663_vm1, %v1229_v55  ;;  %v4118_v33 = vunpack.i.h.bf16 %v4116_v18  ;;  %v4117_v31 = vunpack.i.l.bf16 %v4116_v18 }
 0x557   :  { %3556 = vmatprep.mubr.msk.f32.mxu0 %vm663_vm1, %v1231_v34 }
 0x558   :  { %v1239_v0 = vpop.permute.xlu1 %1238  ;;  %v3901_v56 = vpack.c.bf16 %v4118_v33, %v4117_v31 }
 0x559   :  { %v4126_v11 = vpop.permute.xlu0 %4125 }
 0x55a   :  { %3557 = vmatmul.mubr.msk.f32.gmra.mrb[34].mxu0 %vm663_vm1, %v1233_v25  ;;  %v4128_v12 = vunpack.i.h.bf16 %v4126_v11  ;;  %v4127_v4 = vunpack.i.l.bf16 %v4126_v11 }
 0x55b   :  { %3559 = vmatprep.mubr.msk.f32.mxu0 %vm663_vm1, %v1235_v15 }
 0x55c   :  { %v1243_v47 = vpop.permute.xlu1 %1242  ;;  %v3909_v35 = vpack.c.bf16 %v4128_v12, %v4127_v4 }
 0x55e   :  { %3560 = vmatmul.mubr.msk.f32.gmra.mrb[36].mxu0 %vm663_vm1, %v1237_v59 }
 0x55f   :  { %3562 = vmatprep.mubr.msk.f32.mxu0 %vm663_vm1, %v1239_v0 }
 0x560   :  { %v1247_v53 = vpop.permute.xlu1 %1246 }
 0x562   :  { %3563 = vmatmul.mubr.msk.f32.gmra.mrb[38].mxu0 %vm663_vm1, %v1241_v24 }
 0x563   :  { %3565 = vmatprep.mubr.msk.f32.mxu0 %vm663_vm1, %v1243_v47 }
 0x564   :  { %v1251_v51 = vpop.permute.xlu1 %1250 }
 0x566   :  { %3566 = vmatmul.mubr.msk.f32.gmra.mrb[40].mxu0 %vm663_vm1, %v1245_v48 }
 0x567   :  { %3568 = vmatprep.mubr.msk.f32.mxu0 %vm663_vm1, %v1247_v53 }
 0x568   :  { %v1255_v39 = vpop.permute.xlu1 %1254 }
 0x56a   :  { %3569 = vmatmul.mubr.msk.f32.gmra.mrb[42].mxu0 %vm663_vm1, %v1249_v43 }
 0x56b   :  { %3571 = vmatprep.mubr.msk.f32.mxu0 %vm663_vm1, %v1251_v51 }
 0x56c   :  { %v4111_v3 = vpop.permute.xlu1 %4110 }
 0x56d   :  { %v4113_v14 = vunpack.i.h.bf16 %v4111_v3  ;;  %v4112_v50 = vunpack.i.l.bf16 %v4111_v3 }
 0x56e   :  { %3572 = vmatmul.mubr.msk.f32.gmra.mrb[44].mxu0 %vm663_vm1, %v1253_v45 }
 0x56f   :  { %v3897_v58 = vpack.c.bf16 %v4113_v14, %v4112_v50  ;;  %3574 = vmatprep.mubr.msk.f32.mxu0 %vm663_vm1, %v1255_v39 }
 0x570   :  { %v4121_v21 = vpop.permute.xlu1 %4120 }
 0x571   :  { %v4123_v27 = vunpack.i.h.bf16 %v4121_v21  ;;  %v4122_v17 = vunpack.i.l.bf16 %v4121_v21  ;;  %3898 = vmatprep.subr.bf16.mxu1 %v3897_v58 }
 0x572   :  { %3575 = vmatmul.mubr.msk.f32.gmra.mrb[46].mxu0 %vm663_vm1, %v1257_v61  ;;  %3900 = vmatpush3.bf16.msra.mxu1 %v3897_v58 }
 0x573   :  { %3902 = vmatprep.subr.bf16.mxu1 %v3901_v56  ;;  %v3905_v54 = vpack.c.bf16 %v4123_v27, %v4122_v17 }
 0x574   :  { %v4131_v49 = vpop.permute.xlu1 %4130 }
 0x575   :  { %v4133_v2 = vunpack.i.h.bf16 %v4131_v49  ;;  %v4132_v5 = vunpack.i.l.bf16 %v4131_v49 }
 0x576   :  { %3904 = vmatpush3.bf16.msra.mxu1 %v3901_v56  ;;  %v6013_v56 = vld [vmem:[#allocation13_spill] sm:$0xff] }
 0x577   :  { %3906 = vmatprep.subr.bf16.mxu1 %v3905_v54  ;;  %v3913_v37 = vpack.c.bf16 %v4133_v2, %v4132_v5  ;;  %vm6014_vm2 = vcmp.eq.s32.totalorder %v6013_v56, %v4968_v10  ;;  %v6019_v5 = vld [vmem:[#allocation2_spill] sm:$0xff] }
 0x57a   :  { %3908 = vmatpush3.bf16.msra.mxu1 %v3905_v54  ;;  %v6016_v54 = vld [vmem:[#allocation15_spill] sm:$0xff] }
 0x57b   :  { %3910 = vmatprep.subr.bf16.mxu1 %v3909_v35 }
 0x57e   :  { %3912 = vmatpush3.bf16.msra.mxu1 %v3909_v35 }
 0x57f   :  { %3914 = vmatprep.subr.bf16.mxu1 %v3913_v37 }
 0x582   :  { %3916 = vmatpush3.bf16.msra.mxu1 %v3913_v37  ;;  %v6020_v37 = vld [vmem:[#allocation3_spill] sm:$0xff] }
 0x5b1   :  { %v5269_v7 = vpop.f32.mrb[16].mxu0 }
 0x5b2   :  { %v5271_v26 = vpop.f32.mrb[17].mxu0 }
 0x5e9   :  { %v5273_v32 = vpop.f32.mrb[18].mxu0 }
 0x5ea   :  { %v5275_v44 = vpop.f32.mrb[19].mxu0 }
 0x5f1   :  { %v5277_v60 = vpop.f32.mrb[20].mxu0 }
 0x5f2   :  { %v5279_v13 = vpop.f32.mrb[21].mxu0 }
 0x5f9   :  { %v5281_v8 = vpop.f32.mrb[22].mxu0 }
 0x5fa   :  { %v5283_v9 = vpop.f32.mrb[23].mxu0 }
 0x601   :  { %v5285_v19 = vpop.f32.mrb[24].mxu0 }
 0x602   :  { %v5287_v62 = vpop.f32.mrb[25].mxu0 }
 0x61d   :  { %v5289_v16 = vpop.f32.mrb[26].mxu0 }
 0x61e   :  { %v5291_v23 = vpop.f32.mrb[27].mxu0 }
 0x621   :  { %v5293_v55 = vpop.f32.mrb[28].mxu0 }
 0x622   :  { %v5295_v30 = vpop.f32.mrb[29].mxu0 }
 0x625   :  { %v5297_v40 = vpop.f32.mrb[30].mxu0 }
 0x626   :  { %v5299_v6 = vpop.f32.mrb[31].mxu0 }
 0x629   :  { %v3555_v34 = vpop.f32.mrb[32].mxu0 }
 0x62a   :  { %v1500_v46 = vsel %vm596_vm3, %v3555_v34, -1e+30  ;;  %v1420_v63 = vpop.f32.mrb[33].mxu0 }
 0x62b   :  { %v1499_v41 = vsel %vm595_vm4, %v1420_v63, -1e+30  ;;  %1517 = vmax.xlane.f32.xlu0 %v1500_v46 }
 0x62c   :  { %1515 = vmax.xlane.f32.xlu1 %v1499_v41 }
 0x62d   :  { %v3558_v42 = vpop.f32.mrb[34].mxu0 }
 0x62e   :  { %v1502_v24 = vsel %vm598_vm11, %v3558_v42, -1e+30  ;;  %v1430_v25 = vpop.f32.mrb[35].mxu0 }
 0x62f   :  { %1521 = vmax.xlane.f32.xlu0 %v1502_v24  ;;  %v1501_v28 = vsel %vm597_vm12, %v1430_v25, -1e+30 }
 0x631   :  { %v3561_v38 = vpop.f32.mrb[36].mxu0 }
 0x632   :  { %v1440_v1 = vpop.f32.mrb[37].mxu0  ;;  %v1504_v29 = vsel %vm600_vm13, %v3561_v38, -1e+30 }
 0x633   :  { %v1503_v52 = vsel %vm599_vm5, %v1440_v1, -1e+30  ;;  %1519 = vmax.xlane.f32.xlu0 %v1501_v28 }
 0x634   :  { %1523 = vmax.xlane.f32.xlu1 %v1503_v52 }
 0x635   :  { %v3564_v15 = vpop.f32.mrb[38].mxu0 }
 0x636   :  { %v1450_v48 = vpop.f32.mrb[39].mxu0  ;;  %v1506_v47 = vsel %vm602_vm14, %v3564_v15, -1e+30 }
 0x637   :  { %v5322_v43 = vsel %vm601_vm6, %v1450_v48, -1e+30  ;;  %1525 = vmax.xlane.f32.xlu0 %v1504_v29 }
 0x638   :  { %1527 = vmax.xlane.f32.xlu1 %v5322_v43 }
 0x639   :  { %v3567_v57 = vpop.f32.mrb[40].mxu0 }
 0x63a   :  { %v1460_v45 = vpop.f32.mrb[41].mxu0  ;;  %v5337_v18 = vsel %vm604_vm15, %v3567_v57, -1e+30 }
 0x63b   :  { %v5331_v61 = vsel %vm603_vm7, %v1460_v45, -1e+30  ;;  %1529 = vmax.xlane.f32.xlu0 %v1506_v47 }
 0x63c   :  { %1531 = vmax.xlane.f32.xlu1 %v5331_v61 }
 0x63d   :  { %v3570_v51 = vpop.f32.mrb[42].mxu0 }
 0x63e   :  { %v1470_v3 = vpop.f32.mrb[43].mxu0  ;;  %v5349_v58 = vsel %vm606_vm0, %v3570_v51, -1e+30  ;;  %vm6017_vm0 = vcmp.eq.s32.totalorder %v6016_v54, %v4968_v10 }
 0x63f   :  { %v5342_v31 = vsel %vm605_vm8, %v1470_v3, -1e+30  ;;  %1533 = vmax.xlane.f32.xlu0 %v5337_v18 }
 0x640   :  { %1535 = vmax.xlane.f32.xlu1 %v5342_v31 }
 0x641   :  { %v3573_v14 = vpop.f32.mrb[44].mxu0 }
 0x642   :  { %v1480_v21 = vpop.f32.mrb[45].mxu0  ;;  %v5361_v12 = vsel %vm608_vm10, %v3573_v14, -1e+30 }
 0x643   :  { %v5354_v27 = vsel %vm6014_vm2, %v1480_v21, -1e+30  ;;  %1537 = vmax.xlane.f32.xlu0 %v5349_v58 }
 0x644   :  { %1539 = vmax.xlane.f32.xlu1 %v5354_v27 }
 0x645   :  { %v3576_v17 = vpop.f32.mrb[46].mxu0 }
 0x646   :  { %v1490_v4 = vpop.f32.mrb[47].mxu0  ;;  %v5373_v2 = vsel %vm610_vm9, %v3576_v17, -1e+30 }
 0x647   :  { %v5366_v49 = vsel %vm6017_vm0, %v1490_v4, -1e+30  ;;  %1541 = vmax.xlane.f32.xlu0 %v5361_v12 }
 0x648   :  { %1543 = vmax.xlane.f32.xlu1 %v5366_v49 }
 0x64b   :  { %1545 = vmax.xlane.f32.xlu0 %v5373_v2 }
 0x659   :  { %4135 = vrot.lane.b32.xlu1 %v6019_v5, %s4362_s3 }
 0x661   :  { %4140 = vrot.lane.b32.xlu0 %v6020_v37, %s4362_s3 }
 0x6b8   :  { %v1518_v34 = vpop.xlane.xlu0 %1517 }
 0x6b9   :  { %v1548_v63 = vsub.f32 %v1500_v46, %v1518_v34  ;;  %v1516_v42 = vpop.xlane.xlu1 %1515 }
 0x6ba   :  { %v1547_v25 = vsub.f32 %v1499_v41, %v1516_v42 }
 0x6bb   :  { %v1565_v38 = vmul.f32 1.442695, %v1548_v63 }
 0x6bc   :  { %v1563_v1 = vmul.f32 1.442695, %v1547_v25  ;;  %v1522_v22 = vpop.xlane.xlu0 %1521 }
 0x6bd   :  { %4245 = vpow2.f32 %v1565_v38  ;;  %v1550_v15 = vsub.f32 %v1502_v24, %v1522_v22 }
 0x6be   :  { %4247 = vpow2.f32 %v1563_v1 }
 0x6bf   :  { %v1569_v10 = vmul.f32 1.442695, %v1550_v15 }
 0x6c0   :  { %v1520_v20 = vpop.xlane.xlu0 %1519 }
 0x6c1   :  { %4249 = vpow2.f32 %v1569_v10  ;;  %v1549_v48 = vsub.f32 %v1501_v28, %v1520_v20  ;;  %v1524_v59 = vpop.xlane.xlu1 %1523 }
 0x6c2   :  { %v1551_v57 = vsub.f32 %v1503_v52, %v1524_v59 }
 0x6c3   :  { %v1567_v0 = vmul.f32 1.442695, %v1549_v48 }
 0x6c4   :  { %v1571_v45 = vmul.f32 1.442695, %v1551_v57  ;;  %v1526_v53 = vpop.xlane.xlu0 %1525 }
 0x6c5   :  { %4251 = vpow2.f32 %v1567_v0  ;;  %v1552_v51 = vsub.f32 %v1504_v29, %v1526_v53  ;;  %v1528_v46 = vpop.xlane.xlu1 %1527 }
 0x6c6   :  { %4253 = vpow2.f32 %v1571_v45  ;;  %v1553_v28 = vsub.f32 %v5322_v43, %v1528_v46 }
 0x6c7   :  { %v5380_v41 = vpop.eup %4245  ;;  %v1573_v39 = vmul.f32 1.442695, %v1552_v51 }
 0x6c8   :  { %v5382_v3 = vpop.eup %4247  ;;  %v1530_v24 = vpop.xlane.xlu0 %1529  ;;  %1597 = vadd.xlane.f32.xlu0 %v5380_v41  ;;  %v1575_v21 = vmul.f32 1.442695, %v1553_v28 }
 0x6c9   :  { %4255 = vpow2.f32 %v1573_v39  ;;  %v1554_v33 = vsub.f32 %v1506_v47, %v1530_v24  ;;  %v1532_v52 = vpop.xlane.xlu1 %1531  ;;  %1595 = vadd.xlane.f32.xlu1 %v5382_v3 }
 0x6ca   :  { %v1555_v56 = vsub.f32 %v5331_v61, %v1532_v52 }
 0x6cb   :  { %v5387_v14 = vpop.eup %4249  ;;  %v1577_v29 = vmul.f32 1.442695, %v1554_v33 }
 0x6cc   :  { %v1534_v50 = vpop.xlane.xlu0 %1533  ;;  %1601 = vadd.xlane.f32.xlu0 %v5387_v14  ;;  %v1579_v47 = vmul.f32 1.442695, %v1555_v56 }
 0x6cd   :  { %4257 = vpow2.f32 %v1577_v29  ;;  %v1536_v17 = vpop.xlane.xlu1 %1535 }
 0x6ce   :  { %4259 = vpow2.f32 %v1575_v21  ;;  %v1557_v54 = vsub.f32 %v5342_v31, %v1536_v17 }
 0x6cf   :  { %v5391_v11 = vpop.eup %4251  ;;  %4261 = vpow2.f32 %v1579_v47 }
 0x6d0   :  { %v5393_v4 = vpop.eup %4253  ;;  %v1538_v43 = vpop.xlane.xlu0 %1537  ;;  %1599 = vadd.xlane.f32.xlu0 %v5391_v11  ;;  %v1583_v34 = vmul.f32 1.442695, %v1557_v54 }
 0x6d1   :  { %v1540_v35 = vpop.xlane.xlu1 %1539  ;;  %1603 = vadd.xlane.f32.xlu1 %v5393_v4  ;;  %v1558_v28 = vsub.f32 %v5349_v58, %v1538_v43 }
 0x6d2   :  { %v1559_v37 = vsub.f32 %v5354_v27, %v1540_v35  ;;  %4263 = vpow2.f32 %v1583_v34  ;;  %v614_v34 = vld [vmem:[%s5963_s7 + $0x18] sm:$0xff] }
 0x6d3   :  { %v5398_v5 = vpop.eup %4255  ;;  %v1585_v33 = vmul.f32 1.442695, %v1558_v28 }
 0x6d4   :  { %v1542_v61 = vpop.xlane.xlu0 %1541  ;;  %1605 = vadd.xlane.f32.xlu0 %v5398_v5  ;;  %v1587_v25 = vmul.f32 1.442695, %v1559_v37 }
 0x6d5   :  { %v1544_v63 = vpop.xlane.xlu1 %1543  ;;  %v1560_v52 = vsub.f32 %v5361_v12, %v1542_v61  ;;  %v613_v61 = vld [vmem:[%s5963_s7 + $0x10] sm:$0xff] }
 0x6d6   :  { %v1561_v31 = vsub.f32 %v5366_v49, %v1544_v63  ;;  %4265 = vpow2.f32 %v1587_v25 }
 0x6d7   :  { %v5402_v42 = vpop.eup %4257  ;;  %v1589_v29 = vmul.f32 1.442695, %v1560_v52 }
 0x6d8   :  { %1609 = vadd.xlane.f32.xlu0 %v5402_v42  ;;  %v1546_v38 = vpop.xlane.xlu0 %1545  ;;  %v5406_v10 = vpop.eup %4259  ;;  %v1591_v48 = vmul.f32 1.442695, %v1561_v31 }
 0x6d9   :  { %v4136_v1 = vpop.permute.xlu1 %4135  ;;  %v1562_v59 = vsub.f32 %v5373_v2, %v1546_v38  ;;  %v5410_v45 = vpop.eup %4261 }
 0x6da   :  { %v4138_v22 = vunpack.i.h.bf16 %v4136_v1  ;;  %v4137_v15 = vunpack.i.l.bf16 %v4136_v1  ;;  %4267 = vpow2.f32 %v1591_v48  ;;  %v3929_v1 = vpack.c.bf16 %v614_v34, %v613_v61 }
 0x6db   :  { %v1593_v49 = vmul.f32 1.442695, %v1562_v59 }
 0x6dc   :  { %v3917_v27 = vpack.c.bf16 %v4138_v22, %v4137_v15  ;;  %1607 = vadd.xlane.f32.xlu0 %v5406_v10  ;;  %v4141_v20 = vpop.permute.xlu0 %4140  ;;  %v5415_v51 = vpop.eup %4263 }
 0x6dd   :  { %v4143_v57 = vunpack.i.h.bf16 %v4141_v20  ;;  %v4142_v0 = vunpack.i.l.bf16 %v4141_v20  ;;  %4269 = vpow2.f32 %v1593_v49 }
 0x6de   :  { %3918 = vmatprep.subr.bf16.mxu1 %v3917_v27 }
 0x6df   :  { %v3921_v53 = vpack.c.bf16 %v4143_v57, %v4142_v0  ;;  %3920 = vmatpush3.bf16.msra.mxu1 %v3917_v27 }
 0x6e0   :  { %1611 = vadd.xlane.f32.xlu0 %v5410_v45  ;;  %v5418_v2 = vpop.eup %4265 }
 0x6e1   :  { %3922 = vmatprep.subr.bf16.mxu1 %v3921_v53 }
 0x6e2   :  { %4145 = vrot.lane.b32.xlu1 %v4797_v36, %s4362_s3  ;;  %v1556_v36 = vsub.f32 %v5337_v18, %v1534_v50 }
 0x6e3   :  { %3924 = vmatpush3.bf16.msra.mxu1 %v3921_v53 }
 0x6e4   :  { %1615 = vadd.xlane.f32.xlu0 %v5415_v51  ;;  %v5421_v46 = vpop.eup %4267  ;;  %v1581_v24 = vmul.f32 1.442695, %v1556_v36 }
 0x6e6   :  { %4271 = vpow2.f32 %v1581_v24 }
 0x6e7   :  { %v5424_v39 = vpop.eup %4269  ;;  %4273 = vpow2.f32 %v1585_v33 }
 0x6e8   :  { %1619 = vadd.xlane.f32.xlu0 %v5418_v2  ;;  %4275 = vpow2.f32 %v1589_v29 }
 0x6ec   :  { %1623 = vadd.xlane.f32.xlu0 %v5421_v46 }
 0x6f0   :  { %1625 = vadd.xlane.f32.xlu0 %v5424_v39  ;;  %v5430_v21 = vpop.eup %4271 }
 0x6f1   :  { %v5433_v56 = vpop.eup %4273 }
 0x6f2   :  { %v5436_v17 = vpop.eup %4275 }
 0x706   :  { %1613 = vadd.xlane.f32.xlu1 %v5430_v21 }
 0x70a   :  { %1617 = vadd.xlane.f32.xlu1 %v5433_v56 }
 0x70e   :  { %1621 = vadd.xlane.f32.xlu1 %v5436_v17 }
 0x755   :  { %v1598_v18 = vpop.xlane.xlu0 %1597 }
 0x756   :  { %v1596_v58 = vpop.xlane.xlu1 %1595 }
 0x757   :  { %4277 = vrcp.f32 %v1596_v58 }
 0x758   :  { %4279 = vrcp.f32 %v1598_v18 }
 0x759   :  { %v1602_v50 = vpop.xlane.xlu0 %1601 }
 0x75d   :  { %v1600_v12 = vpop.xlane.xlu0 %1599 }
 0x75e   :  { %4281 = vrcp.f32 %v1600_v12  ;;  %v1604_v43 = vpop.xlane.xlu1 %1603 }
 0x75f   :  { %4283 = vrcp.f32 %v1602_v50 }
 0x760   :  { %4285 = vrcp.f32 %v1604_v43 }
 0x761   :  { %v4278_v47 = vpop.eup %4277  ;;  %v1606_v54 = vpop.xlane.xlu0 %1605 }
 0x762   :  { %v4146_v35 = vpop.permute.xlu1 %4145  ;;  %v1643_v37 = vmul.f32 %v4278_v47, %v5382_v3  ;;  %4287 = vrcp.f32 %v1606_v54  ;;  %v4280_v22 = vpop.eup %4279 }
 0x763   :  { %v4148_v63 = vunpack.i.h.bf16 %v4146_v35  ;;  %v4147_v25 = vunpack.i.l.bf16 %v4146_v35  ;;  %v1644_v3 = vmul.f32 %v4280_v22, %v5380_v41 }
 0x764   :  { %3609 = vmatprep.mubr.f32.mxu1 %v1643_v37 }
 0x765   :  { %v3925_v38 = vpack.c.bf16 %v4148_v63, %v4147_v25  ;;  %v1610_v31 = vpop.xlane.xlu0 %1609 }
 0x766   :  { %4289 = vrcp.f32 %v1610_v31 }
 0x767   :  { %3926 = vmatprep.subr.bf16.mxu1 %v3925_v38 }
 0x768   :  { %v4282_v15 = vpop.eup %4281  ;;  %3928 = vmatpush3.bf16.msra.mxu1 %v3925_v38 }
 0x769   :  { %v1608_v27 = vpop.xlane.xlu0 %1607  ;;  %v1645_v20 = vmul.f32 %v4282_v15, %v5391_v11  ;;  %3930 = vmatprep.subr.bf16.mxu1 %v3929_v1  ;;  %v4284_v48 = vpop.eup %4283 }
 0x76a   :  { %4291 = vrcp.f32 %v1608_v27  ;;  %v4286_v59 = vpop.eup %4285  ;;  %v1646_v0 = vmul.f32 %v4284_v48, %v5387_v14 }
 0x76b   :  { %3610 = vmatmul.mubr.f32.vlgmr.msra.gmra.mrb[16].mxu1 %v1644_v3  ;;  %v1647_v49 = vmul.f32 %v4286_v59, %v5393_v4 }
 0x76c   :  { %3612 = vmatprep.mubr.f32.mxu1 %v1645_v20  ;;  %3932 = vmatpush3.bf16.msra.mxu1 %v3929_v1  ;;  %v4288_v53 = vpop.eup %4287 }
 0x76d   :  { %v1612_v57 = vpop.xlane.xlu0 %1611  ;;  %v1648_v41 = vmul.f32 %v4288_v53, %v5398_v5 }
 0x76e   :  { %4293 = vrcp.f32 %v1612_v57 }
 0x76f   :  { %3613 = vmatmul.mubr.f32.gmra.mrb[18].mxu1 %v1646_v0 }
 0x770   :  { %3615 = vmatprep.mubr.f32.mxu1 %v1647_v49  ;;  %v4290_v36 = vpop.eup %4289  ;;  %v4344_v49 = vld [vmem:[%s5956_s0 + $0x10] sm:$0xff] }
 0x771   :  { %v1650_v28 = vmul.f32 %v4290_v36, %v5402_v42  ;;  %v1616_v52 = vpop.xlane.xlu0 %1615 }
 0x772   :  { %4295 = vrcp.f32 %v1616_v52  ;;  %v4346_v52 = vld [vmem:[%s5956_s0 + $0x38] sm:$0xff] }
 0x773   :  { %3616 = vmatmul.mubr.f32.gmra.mrb[20].mxu1 %v1648_v41 }
 0x774   :  { %v4292_v11 = vpop.eup %4291 }
 0x775   :  { %v1649_v24 = vmul.f32 %v4292_v11, %v5406_v10  ;;  %v1620_v29 = vpop.xlane.xlu0 %1619 }
 0x777   :  { %3618 = vmatprep.mubr.f32.mxu1 %v1649_v24 }
 0x778   :  { %v4294_v33 = vpop.eup %4293  ;;  %3619 = vmatmul.mubr.f32.gmra.mrb[22].mxu1 %v1650_v28 }
 0x779   :  { %v1651_v14 = vmul.f32 %v4294_v33, %v5410_v45  ;;  %v1624_v18 = vpop.xlane.xlu0 %1623  ;;  %v4345_v33 = vld [vmem:[%s5956_s0 + $0x28] sm:$0xff] }
 0x77b   :  { %3621 = vmatprep.mubr.f32.mxu1 %v1651_v14 }
 0x77c   :  { %v4296_v42 = vpop.eup %4295 }
 0x77d   :  { %v1626_v58 = vpop.xlane.xlu0 %1625  ;;  %v1653_v45 = vmul.f32 %v4296_v42, %v5415_v51 }
 0x793   :  { %v1614_v4 = vpop.xlane.xlu1 %1613 }
 0x794   :  { %4297 = vrcp.f32 %v1614_v4 }
 0x795   :  { %4299 = vrcp.f32 %v1620_v29 }
 0x797   :  { %v1618_v5 = vpop.xlane.xlu1 %1617 }
 0x798   :  { %4301 = vrcp.f32 %v1618_v5 }
 0x799   :  { %4303 = vrcp.f32 %v1624_v18 }
 0x79b   :  { %v1622_v10 = vpop.xlane.xlu1 %1621 }
 0x79c   :  { %4305 = vrcp.f32 %v1622_v10 }
 0x79d   :  { %4307 = vrcp.f32 %v1626_v58  ;;  %v4347_v58 = vld [vmem:[%s5956_s0 + $0x20] sm:$0xff] }
 0x79e   :  { %v4298_v50 = vpop.eup %4297 }
 0x79f   :  { %v1652_v12 = vmul.f32 %v4298_v50, %v5430_v21  ;;  %v4300_v43 = vpop.eup %4299  ;;  %v611_v21 = vld [vmem:[%s5963_s7] sm:$0xff] }
 0x7a0   :  { %v1655_v35 = vmul.f32 %v4300_v43, %v5418_v2  ;;  %v612_v2 = vld [vmem:[%s5963_s7 + $0x8] sm:$0xff] }
 0x7a1   :  { %3622 = vmatmul.mubr.f32.gmra.mrb[24].mxu1 %v1652_v12  ;;  %v4348_v12 = vld [vmem:[%s5956_s0 + $0x48] sm:$0xff] }
 0x7a2   :  { %v4302_v47 = vpop.eup %4301  ;;  %3624 = vmatprep.mubr.f32.mxu1 %v1653_v45 }
 0x7a3   :  { %v1654_v54 = vmul.f32 %v4302_v47, %v5433_v56  ;;  %v4304_v37 = vpop.eup %4303  ;;  %v3933_v56 = vpack.c.bf16 %v612_v2, %v611_v21 }
 0x7a4   :  { %v1657_v25 = vmul.f32 %v4304_v37, %v5421_v46  ;;  %v4349_v37 = vld [vmem:[%s5956_s0 + $0x30] sm:$0xff] }
 0x7a5   :  { %3625 = vmatmul.mubr.f32.gmra.mrb[26].mxu1 %v1654_v54  ;;  %3934 = vmatprep.subr.bf16.mxu1 %v3933_v56 }
 0x7a6   :  { %v4306_v61 = vpop.eup %4305  ;;  %3627 = vmatprep.mubr.f32.mxu1 %v1655_v35 }
 0x7a7   :  { %v1656_v34 = vmul.f32 %v4306_v61, %v5436_v17  ;;  %v4308_v63 = vpop.eup %4307 }
 0x7a8   :  { %v1658_v51 = vmul.f32 %v4308_v63, %v5424_v39 }
 0x7a9   :  { %3628 = vmatmul.mubr.f32.gmra.mrb[28].mxu1 %v1656_v34 }
 0x7aa   :  { %3630 = vmatprep.mubr.f32.mxu1 %v1657_v25  ;;  %v4350_v25 = vld [vmem:[%s5956_s0 + $0x58] sm:$0xff] }
 0x7ad   :  { %3631 = vmatmul.mubr.f32.gmra.mrb[30].mxu1 %v1658_v51 }
 0x83e   :  { %v3611_v38 = vpop.f32.mrb[16].mxu1 }
 0x83f   :  { %v1773_v17 = vpop.f32.mrb[17].mxu1 }
 0x840   :  { %3637 = vmatprep.mubr.msk.f32.mxu1 %vm663_vm1, %v1773_v17 }
 0x841   :  { %3638 = vmatmul.mubr.msk.f32.vlgmr.msra.gmra.mrb[32].mxu1 %vm663_vm1, %v3611_v38 }
 0x842   :  { %v3614_v46 = vpop.f32.mrb[18].mxu1  ;;  %3936 = vmatpush3.bf16.msra.mxu1 %v3933_v56 }
 0x843   :  { %v1783_v39 = vpop.f32.mrb[19].mxu1 }
 0x844   :  { %3640 = vmatprep.mubr.msk.f32.mxu1 %vm663_vm1, %v1783_v39  ;;  %v4351_v39 = vld [vmem:[%s5956_s0 + $0x40] sm:$0xff] }
 0x845   :  { %3641 = vmatmul.mubr.msk.f32.gmra.mrb[34].mxu1 %vm663_vm1, %v3614_v46 }
 0x846   :  { %v3617_v31 = vpop.f32.mrb[20].mxu1 }
 0x847   :  { %v1793_v1 = vpop.f32.mrb[21].mxu1 }
 0x848   :  { %3643 = vmatprep.mubr.msk.f32.mxu1 %vm663_vm1, %v1793_v1  ;;  %v4352_v1 = vld [vmem:[%s5956_s0 + $0x68] sm:$0xff] }
 0x849   :  { %3644 = vmatmul.mubr.msk.f32.gmra.mrb[36].mxu1 %vm663_vm1, %v3617_v31 }
 0x84b   :  { %v3620_v22 = vpop.f32.mrb[22].mxu1 }
 0x84c   :  { %v1803_v15 = vpop.f32.mrb[23].mxu1 }
 0x84d   :  { %3646 = vmatprep.mubr.msk.f32.mxu1 %vm663_vm1, %v1803_v15 }
 0x84e   :  { %3647 = vmatmul.mubr.msk.f32.gmra.mrb[38].mxu1 %vm663_vm1, %v3620_v22 }
 0x874   :  { %v3623_v3 = vpop.f32.mrb[24].mxu1 }
 0x875   :  { %v1813_v27 = vpop.f32.mrb[25].mxu1 }
 0x876   :  { %3649 = vmatprep.mubr.msk.f32.mxu1 %vm663_vm1, %v1813_v27 }
 0x877   :  { %3650 = vmatmul.mubr.msk.f32.gmra.mrb[40].mxu1 %vm663_vm1, %v3623_v3 }
 0x878   :  { %v3626_v20 = vpop.f32.mrb[26].mxu1 }
 0x879   :  { %v1823_v48 = vpop.f32.mrb[27].mxu1 }
 0x87a   :  { %3652 = vmatprep.mubr.msk.f32.mxu1 %vm663_vm1, %v1823_v48 }
 0x87b   :  { %3653 = vmatmul.mubr.msk.f32.gmra.mrb[42].mxu1 %vm663_vm1, %v3626_v20 }
 0x87c   :  { %v3629_v59 = vpop.f32.mrb[28].mxu1 }
 0x87d   :  { %v1833_v57 = vpop.f32.mrb[29].mxu1 }
 0x87e   :  { %3655 = vmatprep.mubr.msk.f32.mxu1 %vm663_vm1, %v1833_v57 }
 0x87f   :  { %3656 = vmatmul.mubr.msk.f32.gmra.mrb[44].mxu1 %vm663_vm1, %v3629_v59 }
 0x880   :  { %v3632_v0 = vpop.f32.mrb[30].mxu1 }
 0x881   :  { %v1843_v53 = vpop.f32.mrb[31].mxu1 }
 0x882   :  { %3658 = vmatprep.mubr.msk.f32.mxu1 %vm663_vm1, %v1843_v53 }
 0x883   :  { %3659 = vmatmul.mubr.msk.f32.gmra.mrb[46].mxu1 %vm663_vm1, %v3632_v0  ;;  %v4353_v0 = vld [vmem:[%s5956_s0 + $0x50] sm:$0xff] }
 0x884   :  { %3665 = vmatprep.mubr.msk.f32.mxu1 %vm663_vm1, %v5271_v26  ;;  %v5518_v26 = vld [vmem:[%s5964_s8] ss:$0 sm:$0xff] }
 0x887   :  { %3666 = vmatmul.mubr.msk.f32.vlgmr.msra.gmra.mrb[32].mxu1 %vm663_vm1, %v5269_v7 }
 0x888   :  { %3668 = vmatprep.mubr.msk.f32.mxu1 %vm663_vm1, %v5275_v44 }
 0x88b   :  { %3669 = vmatmul.mubr.msk.f32.gmra.mrb[34].mxu1 %vm663_vm1, %v5273_v32  ;;  %v4341_v32 = vld [vmem:[%s5956_s0 + $0x8] sm:$0xff] }
 0x88c   :  { %3671 = vmatprep.mubr.msk.f32.mxu1 %vm663_vm1, %v5279_v13  ;;  %v4342_v13 = vld [vmem:[%s5956_s0] sm:$0xff] }
 0x88f   :  { %3672 = vmatmul.mubr.msk.f32.gmra.mrb[36].mxu1 %vm663_vm1, %v5277_v60 }
 0x890   :  { %3674 = vmatprep.mubr.msk.f32.mxu1 %vm663_vm1, %v5283_v9 }
 0x893   :  { %3675 = vmatmul.mubr.msk.f32.gmra.mrb[38].mxu1 %vm663_vm1, %v5281_v8 }
 0x894   :  { %3677 = vmatprep.mubr.msk.f32.mxu1 %vm663_vm1, %v5287_v62 }
 0x897   :  { %3678 = vmatmul.mubr.msk.f32.gmra.mrb[40].mxu1 %vm663_vm1, %v5285_v19 }
 0x898   :  { %3680 = vmatprep.mubr.msk.f32.mxu1 %vm663_vm1, %v5291_v23 }
 0x89b   :  { %3681 = vmatmul.mubr.msk.f32.gmra.mrb[42].mxu1 %vm663_vm1, %v5289_v16  ;;  %v4343_v16 = vld [vmem:[%s5956_s0 + $0x18] sm:$0xff] }
 0x89c   :  { %3683 = vmatprep.mubr.msk.f32.mxu1 %vm663_vm1, %v5295_v30 }
 0x89f   :  { %3684 = vmatmul.mubr.msk.f32.gmra.mrb[44].mxu1 %vm663_vm1, %v5293_v55 }
 0x8a0   :  { %3686 = vmatprep.mubr.msk.f32.mxu1 %vm663_vm1, %v5299_v6 }
 0x8a3   :  { %3687 = vmatmul.mubr.msk.f32.gmra.mrb[46].mxu1 %vm663_vm1, %v5297_v40  ;;  %vm6021_vm1 = vcmask 261120  }
 0x8a4   :  { %vm6022_vm3 = vmmov %vm6021_vm1 }
 0x8a5   :  { %vm6023_vm4 = vmmov %vm6021_vm1 }
 0x8a6   :  { %vm6024_vm5 = vmmov %vm6021_vm1 }
 0x8a7   :  { %vm6025_vm6 = vmmov %vm6021_vm1 }
 0x8a8   :  { %vm6026_vm7 = vmmov %vm6021_vm1 }
 0x8a9   :  { %vm6027_vm8 = vmmov %vm6021_vm1 }
 0x8aa   :  { %vm6028_vm9 = vmmov %vm6021_vm1 }
 0x8ab   :  { %vm6029_vm10 = vmmov %vm6021_vm1 }
 0x8ac   :  { %vm6030_vm11 = vmmov %vm6021_vm1 }
 0x8ad   :  { %vm6031_vm12 = vmmov %vm6021_vm1 }
 0x8ae   :  { %vm6032_vm13 = vmmov %vm6021_vm1 }
 0x8af   :  { %vm6033_vm14 = vmmov %vm6021_vm1 }
 0x8b0   :  { %vm6034_vm15 = vmmov %vm6021_vm1 }
 0x8b1   :  { %vm6035_vm2 = vmmov %vm6021_vm1 }
 0x8b2   :  { %vm6036_vm0 = vmmov %vm6021_vm1 }
 0x95a   :  { %v3667_v7 = vpop.f32.mrb[32].mxu1 }
 0x95b   :  { %v2239_v44 = vadd.f32 %v4341_v32, %v3667_v7  ;;  %v2159_v60 = vpop.f32.mrb[33].mxu1  ;;  %v4354_v7 = vld [vmem:[%s5956_s0 + $0x78] sm:$0xff] }
 0x95c   :  { %v2238_v8 = vadd.f32 %v4342_v13, %v2159_v60 }
 0x95d   :  { %v5527_v9 = vadd.f32 %v5518_v26, %v2239_v44 }
 0x95e   :  { %v3670_v19 = vpop.f32.mrb[34].mxu1  ;;  %v5530_v62 = vadd.f32 %v5518_v26, %v2238_v8 }
 0x95f   :  { %v2241_v23 = vadd.f32 %v4343_v16, %v3670_v19  ;;  %v2169_v55 = vpop.f32.mrb[35].mxu1  ;;  %v2282_v30 = vsel %vm6021_vm1, %v5527_v9, 0.0  ;;  %v4355_v19 = vld [vmem:[%s5956_s0 + $0x60] sm:$0xff]  ;;  %vm6037_vm1 = vmmov %vm6036_vm0 }
 0x960   :  { %2283 = vadd.xlane.f32.xlu0 %v2282_v30  ;;  %v2240_v41 = vadd.f32 %v4344_v49, %v2169_v55  ;;  %v2279_v11 = vsel %vm6022_vm3, %v5530_v62, 0.0  ;;  %vm6038_vm3 = vmmov %vm6036_vm0 }
 0x961   :  { %v5538_v6 = vadd.f32 %v5518_v26, %v2241_v23 }
 0x962   :  { %v3673_v40 = vpop.f32.mrb[36].mxu1  ;;  %v5546_v28 = vadd.f32 %v5518_v26, %v2240_v41 }
 0x963   :  { %v2179_v36 = vpop.f32.mrb[37].mxu1  ;;  %v2243_v14 = vadd.f32 %v4345_v33, %v3673_v40  ;;  %v2288_v18 = vsel %vm6023_vm4, %v5538_v6, 0.0  ;;  %v4356_v40 = vld [vmem:[%s5956_s0 + $0x70] sm:$0xff]  ;;  %vm6039_vm4 = vmmov %vm6036_vm0 }
 0x964   :  { %2280 = vadd.xlane.f32.xlu0 %v2279_v11  ;;  %v2242_v10 = vadd.f32 %v4347_v58, %v2179_v36  ;;  %v2285_v47 = vsel %vm6024_vm5, %v5546_v28, 0.0  ;;  %vm6040_vm5 = vmmov %vm6036_vm0 }
 0x965   :  { %v5563_v50 = vadd.f32 %v5518_v26, %v2243_v14 }
 0x966   :  { %v3676_v24 = vpop.f32.mrb[38].mxu1  ;;  %v5579_v63 = vadd.f32 %v5518_v26, %v2242_v10 }
 0x967   :  { %v2245_v29 = vadd.f32 %v4346_v52, %v3676_v24  ;;  %v2189_v4 = vpop.f32.mrb[39].mxu1  ;;  %v2294_v2 = vsel %vm6026_vm7, %v5563_v50, 0.0  ;;  %vm6042_vm7 = vmmov %vm6036_vm0 }
 0x968   :  { %2289 = vadd.xlane.f32.xlu0 %v2288_v18  ;;  %v2244_v61 = vadd.f32 %v4349_v37, %v2189_v4  ;;  %v2291_v3 = vsel %vm6028_vm9, %v5579_v63, 0.0  ;;  %vm6044_vm9 = vmmov %vm6036_vm0 }
 0x969   :  { %v5557_v5 = vadd.f32 %v5518_v26, %v2245_v29 }
 0x96a   :  { %v3679_v42 = vpop.f32.mrb[40].mxu1  ;;  %v5592_v17 = vadd.f32 %v5518_v26, %v2244_v61 }
 0x96b   :  { %v2247_v45 = vadd.f32 %v4348_v12, %v3679_v42  ;;  %v2199_v43 = vpop.f32.mrb[41].mxu1  ;;  %v2300_v54 = vsel %vm6025_vm6, %v5557_v5, 0.0  ;;  %vm6041_vm6 = vmmov %vm6036_vm0 }
 0x96c   :  { %2286 = vadd.xlane.f32.xlu0 %v2285_v47  ;;  %2301 = vadd.xlane.f32.xlu1 %v2300_v54  ;;  %v2246_v31 = vadd.f32 %v4351_v39, %v2199_v43  ;;  %v2297_v59 = vsel %vm6030_vm11, %v5592_v17, 0.0  ;;  %vm6046_vm11 = vmmov %vm6036_vm0 }
 0x96d   :  { %v5573_v35 = vadd.f32 %v5518_v26, %v2247_v45 }
 0x96e   :  { %v3682_v34 = vpop.f32.mrb[42].mxu1  ;;  %v5610_v57 = vadd.f32 %v5518_v26, %v2246_v31 }
 0x96f   :  { %v2249_v51 = vadd.f32 %v4350_v25, %v3682_v34  ;;  %v2209_v21 = vpop.f32.mrb[43].mxu1  ;;  %v2306_v56 = vsel %vm6027_vm8, %v5573_v35, 0.0  ;;  %vm6043_vm8 = vmmov %vm6036_vm0 }
 0x970   :  { %2295 = vadd.xlane.f32.xlu0 %v2294_v2  ;;  %2307 = vadd.xlane.f32.xlu1 %v2306_v56  ;;  %v2248_v53 = vadd.f32 %v4353_v0, %v2209_v21  ;;  %v2303_v23 = vsel %vm6032_vm13, %v5610_v57, 0.0  ;;  %vm6048_vm13 = vmmov %vm6036_vm0 }
 0x971   :  { %v5589_v38 = vadd.f32 %v5518_v26, %v2249_v51 }
 0x972   :  { %v3685_v46 = vpop.f32.mrb[44].mxu1  ;;  %v5624_v8 = vadd.f32 %v5518_v26, %v2248_v53 }
 0x973   :  { %v2251_v22 = vadd.f32 %v4352_v1, %v3685_v46  ;;  %v2219_v15 = vpop.f32.mrb[45].mxu1  ;;  %v2312_v27 = vsel %vm6029_vm10, %v5589_v38, 0.0  ;;  %vm6045_vm10 = vmmov %vm6036_vm0 }
 0x974   :  { %2292 = vadd.xlane.f32.xlu0 %v2291_v3  ;;  %2313 = vadd.xlane.f32.xlu1 %v2312_v27  ;;  %v2250_v16 = vadd.f32 %v4355_v19, %v2219_v15  ;;  %v2309_v41 = vsel %vm6034_vm15, %v5624_v8, 0.0  ;;  %vm6050_vm15 = vmmov %vm6036_vm0 }
 0x975   :  { %v5605_v20 = vadd.f32 %v5518_v26, %v2251_v22 }
 0x976   :  { %v3688_v48 = vpop.f32.mrb[46].mxu1  ;;  %v5634_v30 = vadd.f32 %v5518_v26, %v2250_v16 }
 0x977   :  { %v2253_v32 = vadd.f32 %v4354_v7, %v3688_v48  ;;  %v2229_v44 = vpop.f32.mrb[47].mxu1  ;;  %v2318_v60 = vsel %vm6031_vm12, %v5605_v20, 0.0  ;;  %vm6047_vm12 = vmmov %vm6036_vm0 }
 0x978   :  { %2298 = vadd.xlane.f32.xlu0 %v2297_v59  ;;  %2319 = vadd.xlane.f32.xlu1 %v2318_v60  ;;  %v2252_v49 = vadd.f32 %v4356_v40, %v2229_v44  ;;  %v2315_v11 = vsel %vm6035_vm2, %v5634_v30, 0.0  ;;  %vm6051_vm2 = vmmov %vm6036_vm0 }
 0x979   :  { %v5621_v13 = vadd.f32 %v5518_v26, %v2253_v32 }
 0x97a   :  { %v5642_v36 = vadd.f32 %v5518_v26, %v2252_v49 }
 0x97b   :  { %v2324_v55 = vsel %vm6033_vm14, %v5621_v13, 0.0  ;;  %vm6049_vm14 = vmmov %vm6036_vm0 }
 0x97c   :  { %2304 = vadd.xlane.f32.xlu0 %v2303_v23  ;;  %2325 = vadd.xlane.f32.xlu1 %v2324_v55  ;;  %v2321_v24 = vsel %vm6036_vm0, %v5642_v36, 0.0 }
 0x980   :  { %2310 = vadd.xlane.f32.xlu0 %v2309_v41 }
 0x984   :  { %2316 = vadd.xlane.f32.xlu0 %v2315_v11 }
 0x988   :  { %2322 = vadd.xlane.f32.xlu0 %v2321_v24 }
 0x9ed   :  { %v2284_v33 = vpop.xlane.xlu0 %2283 }
 0x9ee   :  { %v2328_v14 = vmul.f32 0.03125, %v2284_v33 }
 0x9f0   :  { %v5649_v52 = vsub.f32 %v5527_v9, %v2328_v14 }
 0x9f1   :  { %v2281_v29 = vpop.xlane.xlu0 %2280 }
 0x9f2   :  { %v2327_v4 = vmul.f32 0.03125, %v2281_v29  ;;  %v2360_v18 = vmul.f32 %v5649_v52, %v5649_v52 }
 0x9f4   :  { %v5654_v26 = vsub.f32 %v5530_v62, %v2327_v4  ;;  %v2378_v58 = vsel %vm6037_vm1, %v2360_v18, 0.0  ;;  %vm6052_vm1 = vmmov %vm6036_vm0 }
 0x9f5   :  { %v2290_v10 = vpop.xlane.xlu0 %2289  ;;  %2379 = vadd.xlane.f32.xlu1 %v2378_v58 }
 0x9f6   :  { %v2330_v42 = vmul.f32 0.03125, %v2290_v10  ;;  %v2359_v12 = vmul.f32 %v5654_v26, %v5654_v26 }
 0x9f8   :  { %v5660_v45 = vsub.f32 %v5538_v6, %v2330_v42  ;;  %v2375_v43 = vsel %vm6038_vm3, %v2359_v12, 0.0  ;;  %vm6053_vm3 = vmmov %vm6036_vm0 }
 0x9f9   :  { %v2287_v47 = vpop.xlane.xlu0 %2286  ;;  %v2302_v54 = vpop.xlane.xlu1 %2301  ;;  %2376 = vadd.xlane.f32.xlu0 %v2375_v43 }
 0x9fa   :  { %v2329_v37 = vmul.f32 0.03125, %v2287_v47  ;;  %v2362_v61 = vmul.f32 %v5660_v45, %v5660_v45  ;;  %v2334_v25 = vmul.f32 0.03125, %v2302_v54 }
 0x9fc   :  { %v5666_v34 = vsub.f32 %v5546_v28, %v2329_v37  ;;  %v2384_v51 = vsel %vm6039_vm4, %v2362_v61, 0.0  ;;  %v5672_v31 = vsub.f32 %v5557_v5, %v2334_v25  ;;  %vm6054_vm4 = vmmov %vm6036_vm0 }
 0x9fd   :  { %v2296_v21 = vpop.xlane.xlu0 %2295  ;;  %v2308_v2 = vpop.xlane.xlu1 %2307  ;;  %2385 = vadd.xlane.f32.xlu1 %v2384_v51 }
 0x9fe   :  { %v2332_v56 = vmul.f32 0.03125, %v2296_v21  ;;  %v2361_v46 = vmul.f32 %v5666_v34, %v5666_v34  ;;  %v2336_v39 = vmul.f32 0.03125, %v2308_v2  ;;  %v2366_v32 = vmul.f32 %v5672_v31, %v5672_v31 }
 0xa00   :  { %v5675_v1 = vsub.f32 %v5563_v50, %v2332_v56  ;;  %v2381_v22 = vsel %vm6040_vm5, %v2361_v46, 0.0  ;;  %v5681_v59 = vsub.f32 %v5573_v35, %v2336_v39  ;;  %v2396_v41 = vsel %vm6042_vm7, %v2366_v32, 0.0  ;;  %vm6055_vm5 = vmmov %vm6036_vm0 }
 0xa01   :  { %v2293_v15 = vpop.xlane.xlu0 %2292  ;;  %v2314_v3 = vpop.xlane.xlu1 %2313  ;;  %2382 = vadd.xlane.f32.xlu0 %v2381_v22  ;;  %vm6057_vm7 = vmmov %vm6036_vm0 }
 0xa02   :  { %v2331_v27 = vmul.f32 0.03125, %v2293_v15  ;;  %v2364_v48 = vmul.f32 %v5675_v1, %v5675_v1  ;;  %v2338_v0 = vmul.f32 0.03125, %v2314_v3  ;;  %v2368_v55 = vmul.f32 %v5681_v59, %v5681_v59 }
 0xa04   :  { %v5684_v53 = vsub.f32 %v5579_v63, %v2331_v27  ;;  %v2390_v7 = vsel %vm6041_vm6, %v2364_v48, 0.0  ;;  %v5692_v23 = vsub.f32 %v5589_v38, %v2338_v0  ;;  %v2402_v4 = vsel %vm6044_vm9, %v2368_v55, 0.0  ;;  %v2531_v27 = vld [vmem:[%s5965_s11] sm:$0xff]  ;;  %v2532_v48 = vld [vmem:[%s5965_s11 + $0x8] sm:$0xff]  ;;  %vm6056_vm6 = vmmov %vm6036_vm0 }
 0xa05   :  { %v2299_v44 = vpop.xlane.xlu0 %2298  ;;  %v2320_v60 = vpop.xlane.xlu1 %2319  ;;  %2391 = vadd.xlane.f32.xlu1 %v2390_v7  ;;  %v3937_v7 = vpack.c.bf16 %v2532_v48, %v2531_v27  ;;  %vm6059_vm9 = vmmov %vm6036_vm0 }
 0xa06   :  { %v2333_v19 = vmul.f32 0.03125, %v2299_v44  ;;  %v2363_v16 = vmul.f32 %v5684_v53, %v5684_v53  ;;  %v2340_v49 = vmul.f32 0.03125, %v2320_v60  ;;  %v2370_v18 = vmul.f32 %v5692_v23, %v5692_v23  ;;  %v2533_v60 = vld [vmem:[%s5965_s11 + $0x10] sm:$0xff] }
 0xa07   :  { %3938 = vmatprep.subr.bf16.mxu0 %v3937_v7  ;;  %3961 = vmatprep.subr.bf16.mxu1 %v3937_v7 }
 0xa08   :  { %v5697_v40 = vsub.f32 %v5592_v17, %v2333_v19  ;;  %v2387_v11 = vsel %vm6043_vm8, %v2363_v16, 0.0  ;;  %v5707_v58 = vsub.f32 %v5605_v20, %v2340_v49  ;;  %v2408_v37 = vsel %vm6046_vm11, %v2370_v18, 0.0  ;;  %v2534_v19 = vld [vmem:[%s5965_s11 + $0x18] sm:$0xff]  ;;  %3940 = vmatpush3.bf16.msra.mxu0 %v3937_v7  ;;  %3963 = vmatpush3.bf16.msra.mxu1 %v3937_v7  ;;  %vm6058_vm8 = vmmov %vm6036_vm0 }
 0xa09   :  { %v2305_v24 = vpop.xlane.xlu0 %2304  ;;  %2397 = vadd.xlane.f32.xlu1 %v2396_v41  ;;  %v2326_v33 = vpop.xlane.xlu1 %2325  ;;  %2388 = vadd.xlane.f32.xlu0 %v2387_v11  ;;  %v3941_v41 = vpack.c.bf16 %v2534_v19, %v2533_v60  ;;  %vm6061_vm11 = vmmov %vm6036_vm0 }
 0xa0a   :  { %v2335_v14 = vmul.f32 0.03125, %v2305_v24  ;;  %v2365_v29 = vmul.f32 %v5697_v40, %v5697_v40  ;;  %v2342_v42 = vmul.f32 0.03125, %v2326_v33  ;;  %v2372_v21 = vmul.f32 %v5707_v58, %v5707_v58  ;;  %v2751_v33 = vld [vmem:[%s5966_s13] sm:$0xff] }
 0xa0b   :  { %3942 = vmatprep.subr.bf16.mxu0 %v3941_v41  ;;  %3962 = vmatprep.subr.bf16.mxu1 %v3941_v41 }
 0xa0c   :  { %v5710_v10 = vsub.f32 %v5610_v57, %v2335_v14  ;;  %v2393_v12 = vsel %vm6045_vm10, %v2365_v29, 0.0  ;;  %v5717_v61 = vsub.f32 %v5621_v13, %v2342_v42  ;;  %v2414_v22 = vsel %vm6048_vm13, %v2372_v21, 0.0  ;;  %3944 = vmatpush3.bf16.msra.mxu0 %v3941_v41  ;;  %3964 = vmatpush3.bf16.msra.mxu1 %v3941_v41  ;;  %v2752_v14 = vld [vmem:[%s5966_s13 + $0x8] sm:$0xff]  ;;  %v2754_v41 = vld [vmem:[%s5966_s13 + $0x18] sm:$0xff]  ;;  %vm6060_vm10 = vmmov %vm6036_vm0 }
 0xa0d   :  { %v2311_v43 = vpop.xlane.xlu0 %2310  ;;  %2403 = vadd.xlane.f32.xlu1 %v2402_v4  ;;  %2394 = vadd.xlane.f32.xlu0 %v2393_v12  ;;  %v3945_v29 = vpack.c.bf16 %v2752_v14, %v2751_v33  ;;  %vm6063_vm13 = vmmov %vm6036_vm0 }
 0xa0e   :  { %v2337_v47 = vmul.f32 0.03125, %v2311_v43  ;;  %v2367_v54 = vmul.f32 %v5710_v10, %v5710_v10  ;;  %v2374_v3 = vmul.f32 %v5717_v61, %v5717_v61 }
 0xa0f   :  { %3946 = vmatprep.subr.bf16.mxu0 %v3945_v29 }
 0xa10   :  { %v5720_v25 = vsub.f32 %v5624_v8, %v2337_v47  ;;  %v2399_v51 = vsel %vm6047_vm12, %v2367_v54, 0.0  ;;  %v2420_v55 = vsel %vm6050_vm15, %v2374_v3, 0.0  ;;  %v5766_v3 = vld [vmem:[%s5967_s9] ss:$0 sm:$0xff]  ;;  %vm6062_vm12 = vmmov %vm6036_vm0 }
 0xa11   :  { %v2317_v2 = vpop.xlane.xlu0 %2316  ;;  %2409 = vadd.xlane.f32.xlu1 %v2408_v37  ;;  %2400 = vadd.xlane.f32.xlu0 %v2399_v51  ;;  %vm6065_vm15 = vmmov %vm6036_vm0 }
 0xa12   :  { %v2339_v56 = vmul.f32 0.03125, %v2317_v2  ;;  %v2369_v46 = vmul.f32 %v5720_v25, %v5720_v25 }
 0xa14   :  { %v5728_v39 = vsub.f32 %v5634_v30, %v2339_v56  ;;  %v2405_v15 = vsel %vm6049_vm14, %v2369_v46, 0.0  ;;  %vm6064_vm14 = vmmov %vm6036_vm0 }
 0xa15   :  { %2415 = vadd.xlane.f32.xlu1 %v2414_v22  ;;  %2406 = vadd.xlane.f32.xlu0 %v2405_v15  ;;  %v2323_v0 = vpop.xlane.xlu0 %2322 }
 0xa16   :  { %v2341_v32 = vmul.f32 0.03125, %v2323_v0  ;;  %v2371_v44 = vmul.f32 %v5728_v39, %v5728_v39 }
 0xa18   :  { %v5749_v16 = vsub.f32 %v5642_v36, %v2341_v32  ;;  %v2411_v49 = vsel %vm6051_vm2, %v2371_v44, 0.0  ;;  %vm6066_vm2 = vmmov %vm6036_vm0 }
 0xa19   :  { %2421 = vadd.xlane.f32.xlu1 %v2420_v55  ;;  %2412 = vadd.xlane.f32.xlu0 %v2411_v49  ;;  %v2753_v49 = vld [vmem:[%s5966_s13 + $0x10] sm:$0xff] }
 0xa1a   :  { %v2373_v11 = vmul.f32 %v5749_v16, %v5749_v16 }
 0xa1c   :  { %v2417_v24 = vsel %vm6036_vm0, %v2373_v11, 0.0 }
 0xa1d   :  { %2418 = vadd.xlane.f32.xlu0 %v2417_v24 }
 0xa82   :  { %v2380_v4 = vpop.xlane.xlu1 %2379 }
 0xa83   :  { %v2424_v18 = vmul.f32 0.03125, %v2380_v4 }
 0xa85   :  { %v2440_v42 = vadd.f32 1e-05, %v2424_v18 }
 0xa86   :  { %v2377_v12 = vpop.xlane.xlu0 %2376 }
 0xa87   :  { %4309 = vrsqrt.f32 %v2440_v42  ;;  %v2423_v43 = vmul.f32 0.03125, %v2377_v12  ;;  %v3949_v12 = vpack.c.bf16 %v2754_v41, %v2753_v49 }
 0xa89   :  { %v2439_v47 = vadd.f32 1e-05, %v2423_v43 }
 0xa8a   :  { %v2386_v54 = vpop.xlane.xlu1 %2385 }
 0xa8b   :  { %4311 = vrsqrt.f32 %v2439_v47  ;;  %v2426_v37 = vmul.f32 0.03125, %v2386_v54 }
 0xa8d   :  { %v2442_v51 = vadd.f32 1e-05, %v2426_v37  ;;  %v2755_v37 = vld [vmem:[%s5966_s13 + $0x20] sm:$0xff] }
 0xa8e   :  { %v2383_v21 = vpop.xlane.xlu0 %2382 }
 0xa8f   :  { %4313 = vrsqrt.f32 %v2442_v51  ;;  %v2425_v2 = vmul.f32 0.03125, %v2383_v21  ;;  %v2756_v51 = vld [vmem:[%s5966_s13 + $0x28] sm:$0xff] }
 0xa91   :  { %v4310_v56 = vpop.eup %4309  ;;  %v2441_v46 = vadd.f32 1e-05, %v2425_v2 }
 0xa92   :  { %v2472_v22 = vmul.f32 %v4310_v56, %v5649_v52  ;;  %v2392_v15 = vpop.xlane.xlu1 %2391  ;;  %v5773_v52 = vld [vmem:[%s5968_s10] ss:$0 sm:$0xff] }
 0xa93   :  { %4315 = vrsqrt.f32 %v2441_v46  ;;  %v2428_v27 = vmul.f32 0.03125, %v2392_v15  ;;  %v3953_v15 = vpack.c.bf16 %v2756_v51, %v2755_v37 }
 0xa94   :  { %v2494_v7 = vmul.f32 %v5766_v3, %v2472_v22 }
 0xa95   :  { %v4312_v48 = vpop.eup %4311  ;;  %v2444_v0 = vadd.f32 1e-05, %v2428_v27 }
 0xa96   :  { %v2398_v32 = vpop.xlane.xlu1 %2397  ;;  %v2389_v44 = vpop.xlane.xlu0 %2388  ;;  %v2471_v60 = vmul.f32 %v4312_v48, %v5654_v26  ;;  %v2516_v14 = vadd.f32 %v5773_v52, %v2494_v7 }
 0xa97   :  { %4317 = vrsqrt.f32 %v2444_v0  ;;  %v2430_v19 = vmul.f32 0.03125, %v2398_v32  ;;  %v2427_v55 = vmul.f32 0.03125, %v2389_v44 }
 0xa98   :  { %v2493_v11 = vmul.f32 %v5766_v3, %v2471_v60 }
 0xa99   :  { %v4314_v24 = vpop.eup %4313  ;;  %v2446_v26 = vadd.f32 1e-05, %v2430_v19  ;;  %v2443_v33 = vadd.f32 1e-05, %v2427_v55 }
 0xa9a   :  { %v2404_v4 = vpop.xlane.xlu1 %2403  ;;  %v2395_v18 = vpop.xlane.xlu0 %2394  ;;  %v2515_v42 = vadd.f32 %v5773_v52, %v2493_v11  ;;  %v2474_v54 = vmul.f32 %v4314_v24, %v5660_v45 }
 0xa9b   :  { %4319 = vrsqrt.f32 %v2446_v26  ;;  %v2432_v43 = vmul.f32 0.03125, %v2404_v4  ;;  %v2429_v47 = vmul.f32 0.03125, %v2395_v18 }
 0xa9c   :  { %4321 = vrsqrt.f32 %v2443_v33  ;;  %3697 = vmatprep.mubr.msk.f32.mxu0 %vm6052_vm1, %v2515_v42  ;;  %v2496_v0 = vmul.f32 %v5766_v3, %v2474_v54  ;;  %vm2766_vm1 = vcmask 523264  }
 0xa9d   :  { %v4316_v21 = vpop.eup %4315  ;;  %v2448_v2 = vadd.f32 1e-05, %v2432_v43  ;;  %v2445_v56 = vadd.f32 1e-05, %v2429_v47  ;;  %3698 = vmatmul.mubr.msk.f32.vlgmr.msra.gmra.mrb[48].mxu0 %vm6053_vm3, %v2516_v14  ;;  %vm6067_vm3 = vmmov %vm6036_vm0 }
 0xa9e   :  { %v2410_v46 = vpop.xlane.xlu1 %2409  ;;  %v2401_v22 = vpop.xlane.xlu0 %2400  ;;  %v2473_v45 = vmul.f32 %v4316_v21, %v5666_v34  ;;  %3948 = vmatpush3.bf16.msra.mxu0 %v3945_v29  ;;  %v2518_v41 = vadd.f32 %v5773_v52, %v2496_v0 }
 0xa9f   :  { %4323 = vrsqrt.f32 %v2448_v2  ;;  %v2434_v27 = vmul.f32 0.03125, %v2410_v46  ;;  %v2431_v48 = vmul.f32 0.03125, %v2401_v22  ;;  %3950 = vmatprep.subr.bf16.mxu0 %v3949_v12 }
 0xaa0   :  { %4325 = vrsqrt.f32 %v2445_v56  ;;  %v2495_v7 = vmul.f32 %v5766_v3, %v2473_v45 }
 0xaa1   :  { %v4318_v32 = vpop.eup %4317  ;;  %v2450_v44 = vadd.f32 1e-05, %v2434_v27  ;;  %v2447_v60 = vadd.f32 1e-05, %v2431_v48 }
 0xaa2   :  { %v2416_v19 = vpop.xlane.xlu1 %2415  ;;  %v2407_v55 = vpop.xlane.xlu0 %2406  ;;  %v2517_v49 = vadd.f32 %v5773_v52, %v2495_v7  ;;  %3952 = vmatpush3.bf16.msra.mxu0 %v3949_v12  ;;  %v2476_v11 = vmul.f32 %v4318_v32, %v5675_v1 }
 0xaa3   :  { %4327 = vrsqrt.f32 %v2450_v44  ;;  %v2436_v34 = vmul.f32 0.03125, %v2416_v19  ;;  %v2433_v29 = vmul.f32 0.03125, %v2407_v55  ;;  %3954 = vmatprep.subr.bf16.mxu0 %v3953_v15 }
 0xaa4   :  { %4329 = vrsqrt.f32 %v2447_v60  ;;  %3700 = vmatprep.mubr.msk.f32.mxu0 %vm6054_vm4, %v2517_v49  ;;  %v2498_v47 = vmul.f32 %v5766_v3, %v2476_v11  ;;  %vm6068_vm4 = vmmov %vm6036_vm0 }
 0xaa5   :  { %v4320_v24 = vpop.eup %4319  ;;  %v2452_v26 = vadd.f32 1e-05, %v2436_v34  ;;  %v2449_v33 = vadd.f32 1e-05, %v2433_v29  ;;  %3701 = vmatmul.mubr.msk.f32.gmra.mrb[50].mxu0 %vm6055_vm5, %v2518_v41  ;;  %vm6069_vm5 = vmmov %vm6036_vm0 }
 0xaa6   :  { %v4322_v14 = vpop.eup %4321  ;;  %v2422_v4 = vpop.xlane.xlu1 %2421  ;;  %3956 = vmatpush3.bf16.msra.mxu0 %v3953_v15  ;;  %v2478_v54 = vmul.f32 %v4320_v24, %v5672_v31 }
 0xaa7   :  { %v2413_v18 = vpop.xlane.xlu0 %2412  ;;  %4331 = vrsqrt.f32 %v2452_v26  ;;  %v2438_v42 = vmul.f32 0.03125, %v2422_v4  ;;  %v2475_v43 = vmul.f32 %v4322_v14, %v5684_v53  ;;  %v2520_v53 = vadd.f32 %v5773_v52, %v2498_v47 }
 0xaa8   :  { %v2435_v12 = vmul.f32 0.03125, %v2413_v18  ;;  %4333 = vrsqrt.f32 %v2449_v33  ;;  %v2500_v15 = vmul.f32 %v5766_v3, %v2478_v54 }
 0xaa9   :  { %v4324_v1 = vpop.eup %4323  ;;  %v2454_v37 = vadd.f32 1e-05, %v2438_v42  ;;  %v2497_v21 = vmul.f32 %v5766_v3, %v2475_v43 }
 0xaaa   :  { %v2451_v51 = vadd.f32 1e-05, %v2435_v12  ;;  %v4326_v2 = vpop.eup %4325  ;;  %v2480_v31 = vmul.f32 %v4324_v1, %v5681_v59  ;;  %v2522_v44 = vadd.f32 %v5773_v52, %v2500_v15 }
 0xaab   :  { %v2419_v56 = vpop.xlane.xlu0 %2418  ;;  %4335 = vrsqrt.f32 %v2454_v37  ;;  %v2519_v22 = vadd.f32 %v5773_v52, %v2497_v21  ;;  %v2477_v45 = vmul.f32 %v4326_v2, %v5697_v40 }
 0xaac   :  { %v2437_v46 = vmul.f32 0.03125, %v2419_v56  ;;  %4337 = vrsqrt.f32 %v2451_v51  ;;  %v2502_v60 = vmul.f32 %v5766_v3, %v2480_v31  ;;  %v3115_v51 = vld [vmem:[%s5969_s12] ss:$0 sm:$0xff] }
 0xaad   :  { %v4328_v27 = vpop.eup %4327  ;;  %3703 = vmatprep.mubr.msk.f32.mxu0 %vm6056_vm6, %v2519_v22  ;;  %v2499_v0 = vmul.f32 %v5766_v3, %v2477_v45  ;;  %vm6070_vm6 = vmmov %vm6036_vm0 }
 0xaae   :  { %v2453_v48 = vadd.f32 1e-05, %v2437_v46  ;;  %v4330_v7 = vpop.eup %4329  ;;  %3704 = vmatmul.mubr.msk.f32.gmra.mrb[52].mxu0 %vm6057_vm7, %v2520_v53  ;;  %v2482_v59 = vmul.f32 %v4328_v27, %v5692_v23  ;;  %vm6071_vm7 = vmmov %vm6036_vm0 }
 0xaaf   :  { %v2521_v32 = vadd.f32 %v5773_v52, %v2499_v0  ;;  %v2479_v40 = vmul.f32 %v4330_v7, %v5710_v10  ;;  %v2524_v10 = vadd.f32 %v5773_v52, %v2502_v60 }
 0xab0   :  { %4339 = vrsqrt.f32 %v2453_v48  ;;  %v2504_v41 = vmul.f32 %v5766_v3, %v2482_v59 }
 0xab1   :  { %v4332_v19 = vpop.eup %4331  ;;  %3706 = vmatprep.mubr.msk.f32.mxu0 %vm6058_vm8, %v2521_v32  ;;  %v2501_v55 = vmul.f32 %v5766_v3, %v2479_v40  ;;  %vm6072_vm8 = vmmov %vm6036_vm0 }
 0xab2   :  { %v4334_v49 = vpop.eup %4333  ;;  %3707 = vmatmul.mubr.msk.f32.gmra.mrb[54].mxu0 %vm6059_vm9, %v2522_v44  ;;  %v2484_v11 = vmul.f32 %v4332_v19, %v5707_v58  ;;  %v2526_v4 = vadd.f32 %v5773_v52, %v2504_v41  ;;  %vm6073_vm9 = vmmov %vm6036_vm0 }
 0xab3   :  { %v2523_v34 = vadd.f32 %v5773_v52, %v2501_v55  ;;  %v2481_v29 = vmul.f32 %v4334_v49, %v5720_v25 }
 0xab4   :  { %v2506_v18 = vmul.f32 %v5766_v3, %v2484_v11 }
 0xab5   :  { %v4336_v24 = vpop.eup %4335  ;;  %3709 = vmatprep.mubr.msk.f32.mxu0 %vm6060_vm10, %v2523_v34  ;;  %v2503_v23 = vmul.f32 %v5766_v3, %v2481_v29  ;;  %vm6074_vm10 = vmmov %vm6036_vm0 }
 0xab6   :  { %v4338_v26 = vpop.eup %4337  ;;  %3710 = vmatmul.mubr.msk.f32.gmra.mrb[56].mxu0 %vm6061_vm11, %v2524_v10  ;;  %v2486_v33 = vmul.f32 %v4336_v24, %v5717_v61  ;;  %v2528_v47 = vadd.f32 %v5773_v52, %v2506_v18  ;;  %vm6075_vm11 = vmmov %vm6036_vm0 }
 0xab7   :  { %v2525_v14 = vadd.f32 %v5773_v52, %v2503_v23  ;;  %v2483_v25 = vmul.f32 %v4338_v26, %v5728_v39 }
 0xab8   :  { %v2508_v43 = vmul.f32 %v5766_v3, %v2486_v33 }
 0xab9   :  { %3712 = vmatprep.mubr.msk.f32.mxu0 %vm6062_vm12, %v2525_v14  ;;  %v2505_v58 = vmul.f32 %v5766_v3, %v2483_v25  ;;  %vm6076_vm12 = vmmov %vm6036_vm0 }
 0xaba   :  { %v4340_v42 = vpop.eup %4339  ;;  %3713 = vmatmul.mubr.msk.f32.gmra.mrb[58].mxu0 %vm6063_vm13, %v2526_v4  ;;  %v2530_v1 = vadd.f32 %v5773_v52, %v2508_v43  ;;  %vm6077_vm13 = vmmov %vm6036_vm0 }
 0xabb   :  { %v2485_v12 = vmul.f32 %v4340_v42, %v5749_v16  ;;  %v2527_v61 = vadd.f32 %v5773_v52, %v2505_v58  ;;  %v2757_v16 = vld [vmem:[%s5966_s13 + $0x30] sm:$0xff] }
 0xabd   :  { %v2507_v39 = vmul.f32 %v5766_v3, %v2485_v12  ;;  %3715 = vmatprep.mubr.msk.f32.mxu0 %vm6064_vm14, %v2527_v61  ;;  %v2758_v3 = vld [vmem:[%s5966_s13 + $0x38] sm:$0xff]  ;;  %vm6078_vm14 = vmmov %vm6036_vm0 }
 0xabe   :  { %3716 = vmatmul.mubr.msk.f32.gmra.mrb[60].mxu0 %vm6065_vm15, %v2528_v47  ;;  %v3957_v37 = vpack.c.bf16 %v2758_v3, %v2757_v16  ;;  %vm6079_vm15 = vmmov %vm6036_vm0 }
 0xabf   :  { %v2529_v54 = vadd.f32 %v5773_v52, %v2507_v39 }
 0xac0   :  { %3958 = vmatprep.subr.bf16.mxu0 %v3957_v37 }
 0xac1   :  { %3718 = vmatprep.mubr.msk.f32.mxu1 %vm6066_vm2, %v2529_v54  ;;  %3960 = vmatpush3.bf16.msra.mxu0 %v3957_v37  ;;  %vm6080_vm2 = vmmov %vm6036_vm0 }
 0xac2   :  { %3719 = vmatmul.mubr.msk.f32.vlgmr.msra.gmra.mrb[48].mxu1 %vm6036_vm0, %v2530_v1 }
 0xb70   :  { %v3699_v52 = vpop.f32.mrb[48].mxu0 }
 0xb71   :  { %v2662_v21 = vadd.f32 %v3699_v52, %v3115_v51  ;;  %v2656_v2 = vpop.f32.mrb[49].mxu0 }
 0xb72   :  { %v2657_v56 = vadd.f32 %v3115_v51, %v2656_v2 }
 0xb73   :  { %v2736_v22 = vmax.f32 %v2662_v21, 0.0  ;;  %v3132_v21 = vld [vmem:[%s5970_s14] ss:$0 sm:$0xff] }
 0xb74   :  { %v2735_v46 = vmax.f32 %v2657_v56, 0.0 }
 0xb76   :  { %3737 = vmatprep.mubr.msk.f32.mxu0 %vm2766_vm1, %v2735_v46 }
 0xb77   :  { %3738 = vmatmul.mubr.msk.f32.vlgmr.msra.gmra.mrb[62].mxu0 %vm2766_vm1, %v2736_v22 }
 0xb78   :  { %v3702_v45 = vpop.f32.mrb[50].mxu0 }
 0xb79   :  { %v2672_v53 = vadd.f32 %v3702_v45, %v3115_v51  ;;  %v2666_v15 = vpop.f32.mrb[51].mxu0 }
 0xb7a   :  { %v2667_v31 = vadd.f32 %v3115_v51, %v2666_v15 }
 0xb7b   :  { %v2738_v48 = vmax.f32 %v2672_v53, 0.0 }
 0xb7c   :  { %v2737_v27 = vmax.f32 %v2667_v31, 0.0 }
 0xb7e   :  { %3740 = vmatprep.mubr.msk.f32.mxu0 %vm2766_vm1, %v2737_v27 }
 0xb7f   :  { %3741 = vmatmul.mubr.msk.f32.gmra.mrb[64].mxu0 %vm2766_vm1, %v2738_v48 }
 0xb81   :  { %v3705_v0 = vpop.f32.mrb[52].mxu0 }
 0xb82   :  { %v2682_v7 = vadd.f32 %v3705_v0, %v3115_v51  ;;  %v2676_v32 = vpop.f32.mrb[53].mxu0 }
 0xb83   :  { %v2677_v40 = vadd.f32 %v3115_v51, %v2676_v32 }
 0xb84   :  { %v2740_v59 = vmax.f32 %v2682_v7, 0.0 }
 0xb85   :  { %v2739_v44 = vmax.f32 %v2677_v40, 0.0  ;;  %v3708_v60 = vpop.f32.mrb[54].mxu0 }
 0xb86   :  { %v2692_v19 = vadd.f32 %v3708_v60, %v3115_v51  ;;  %v2686_v55 = vpop.f32.mrb[55].mxu0 }
 0xb87   :  { %v2687_v49 = vadd.f32 %v3115_v51, %v2686_v55  ;;  %3743 = vmatprep.mubr.msk.f32.mxu0 %vm2766_vm1, %v2739_v44 }
 0xb88   :  { %3744 = vmatmul.mubr.msk.f32.gmra.mrb[66].mxu0 %vm2766_vm1, %v2740_v59  ;;  %v2742_v10 = vmax.f32 %v2692_v19, 0.0 }
 0xb89   :  { %v2741_v34 = vmax.f32 %v2687_v49, 0.0  ;;  %v3711_v29 = vpop.f32.mrb[56].mxu0 }
 0xb8a   :  { %v2702_v41 = vadd.f32 %v3711_v29, %v3115_v51  ;;  %v2696_v11 = vpop.f32.mrb[57].mxu0 }
 0xb8b   :  { %v2697_v24 = vadd.f32 %v3115_v51, %v2696_v11  ;;  %3746 = vmatprep.mubr.msk.f32.mxu0 %vm2766_vm1, %v2741_v34 }
 0xb8c   :  { %3747 = vmatmul.mubr.msk.f32.gmra.mrb[68].mxu0 %vm2766_vm1, %v2742_v10  ;;  %v2744_v33 = vmax.f32 %v2702_v41, 0.0 }
 0xb8d   :  { %v2743_v23 = vmax.f32 %v2697_v24, 0.0  ;;  %v3714_v26 = vpop.f32.mrb[58].mxu0 }
 0xb8e   :  { %v2712_v14 = vadd.f32 %v3714_v26, %v3115_v51  ;;  %v2706_v25 = vpop.f32.mrb[59].mxu0 }
 0xb8f   :  { %v2707_v4 = vadd.f32 %v3115_v51, %v2706_v25  ;;  %3749 = vmatprep.mubr.msk.f32.mxu0 %vm2766_vm1, %v2743_v23 }
 0xb90   :  { %3750 = vmatmul.mubr.msk.f32.gmra.mrb[70].mxu0 %vm2766_vm1, %v2744_v33  ;;  %v2746_v58 = vmax.f32 %v2712_v14, 0.0 }
 0xb91   :  { %v2745_v18 = vmax.f32 %v2707_v4, 0.0  ;;  %v3717_v42 = vpop.f32.mrb[60].mxu0 }
 0xb92   :  { %v2722_v12 = vadd.f32 %v3717_v42, %v3115_v51  ;;  %v2716_v43 = vpop.f32.mrb[61].mxu0 }
 0xb93   :  { %v2717_v61 = vadd.f32 %v3115_v51, %v2716_v43  ;;  %3752 = vmatprep.mubr.msk.f32.mxu0 %vm2766_vm1, %v2745_v18 }
 0xb94   :  { %3753 = vmatmul.mubr.msk.f32.gmra.mrb[72].mxu0 %vm2766_vm1, %v2746_v58  ;;  %v2748_v1 = vmax.f32 %v2722_v12, 0.0 }
 0xb95   :  { %v3720_v47 = vpop.f32.mrb[48].mxu1  ;;  %v2747_v39 = vmax.f32 %v2717_v61, 0.0 }
 0xb96   :  { %v2726_v54 = vpop.f32.mrb[49].mxu1  ;;  %v2732_v16 = vadd.f32 %v3720_v47, %v3115_v51 }
 0xb97   :  { %v2727_v3 = vadd.f32 %v3115_v51, %v2726_v54  ;;  %3755 = vmatprep.mubr.msk.f32.mxu0 %vm2766_vm1, %v2747_v39 }
 0xb98   :  { %3756 = vmatmul.mubr.msk.f32.gmra.mrb[74].mxu0 %vm2766_vm1, %v2748_v1  ;;  %v2750_v52 = vmax.f32 %v2732_v16, 0.0 }
 0xb99   :  { %v2749_v37 = vmax.f32 %v2727_v3, 0.0 }
 0xb9b   :  { %3758 = vmatprep.mubr.msk.f32.mxu0 %vm2766_vm1, %v2749_v37 }
 0xb9c   :  { %3759 = vmatmul.mubr.msk.f32.gmra.mrb[76].mxu0 %vm2766_vm1, %v2750_v52  ;;  %vm6081_vm1 = vmmov %vm6036_vm0 }
 0xc4a   :  { %v3739_v2 = vpop.f32.mrb[62].mxu0 }
 0xc4b   :  { %v2887_v56 = vadd.f32 %v3739_v2, %v3132_v21  ;;  %v2881_v46 = vpop.f32.mrb[63].mxu0 }
 0xc4c   :  { %v2882_v22 = vadd.f32 %v3132_v21, %v2881_v46 }
 0xc4d   :  { %v2961_v51 = vadd.f32 %v2887_v56, %v5527_v9 }
 0xc4e   :  { %v2960_v45 = vadd.f32 %v2882_v22, %v5530_v62 }
 0xc4f   :  { %2977 = vst.msk [vmem:[%s5971_s15 + $0x8] sm:$0xff] %vm6067_vm3, %v2961_v51 }
 0xc50   :  { %2976 = vst.msk [vmem:[%s5971_s15] sm:$0xff] %vm6068_vm4, %v2960_v45 }
 0xc52   :  { %v3742_v53 = vpop.f32.mrb[64].mxu0 }
 0xc53   :  { %v2897_v15 = vadd.f32 %v3742_v53, %v3132_v21  ;;  %v2891_v31 = vpop.f32.mrb[65].mxu0 }
 0xc54   :  { %v2892_v27 = vadd.f32 %v3132_v21, %v2891_v31 }
 0xc55   :  { %v2963_v48 = vadd.f32 %v2897_v15, %v5538_v6 }
 0xc56   :  { %v2962_v9 = vadd.f32 %v2892_v27, %v5546_v28 }
 0xc57   :  { %2979 = vst.msk [vmem:[%s5971_s15 + $0x18] sm:$0xff] %vm6069_vm5, %v2963_v48 }
 0xc58   :  { %2978 = vst.msk [vmem:[%s5971_s15 + $0x10] sm:$0xff] %vm6070_vm6, %v2962_v9 }
 0xc5b   :  { %v3745_v62 = vpop.f32.mrb[66].mxu0 }
 0xc5c   :  { %v2907_v0 = vadd.f32 %v3745_v62, %v3132_v21  ;;  %v2901_v7 = vpop.f32.mrb[67].mxu0 }
 0xc5d   :  { %v2902_v32 = vadd.f32 %v3132_v21, %v2901_v7 }
 0xc5e   :  { %v2965_v40 = vadd.f32 %v2907_v0, %v5563_v50 }
 0xc5f   :  { %v2964_v6 = vadd.f32 %v2902_v32, %v5579_v63  ;;  %v3748_v44 = vpop.f32.mrb[68].mxu0 }
 0xc60   :  { %2981 = vst.msk [vmem:[%s5971_s15 + $0x28] sm:$0xff] %vm6071_vm7, %v2965_v40  ;;  %v2917_v28 = vadd.f32 %v3748_v44, %v3132_v21  ;;  %v2911_v60 = vpop.f32.mrb[69].mxu0 }
 0xc61   :  { %2980 = vst.msk [vmem:[%s5971_s15 + $0x20] sm:$0xff] %vm6072_vm8, %v2964_v6  ;;  %v2912_v59 = vadd.f32 %v3132_v21, %v2911_v60 }
 0xc62   :  { %v2967_v19 = vadd.f32 %v2917_v28, %v5557_v5 }
 0xc63   :  { %v2966_v50 = vadd.f32 %v2912_v59, %v5592_v17  ;;  %v3751_v55 = vpop.f32.mrb[70].mxu0 }
 0xc64   :  { %2983 = vst.msk [vmem:[%s5971_s15 + $0x38] sm:$0xff] %vm6073_vm9, %v2967_v19  ;;  %v2927_v63 = vadd.f32 %v3751_v55, %v3132_v21  ;;  %v2921_v49 = vpop.f32.mrb[71].mxu0 }
 0xc65   :  { %2982 = vst.msk [vmem:[%s5971_s15 + $0x30] sm:$0xff] %vm6074_vm10, %v2966_v50  ;;  %v2922_v34 = vadd.f32 %v3132_v21, %v2921_v49 }
 0xc66   :  { %v2969_v29 = vadd.f32 %v2927_v63, %v5573_v35 }
 0xc67   :  { %v2968_v5 = vadd.f32 %v2922_v34, %v5610_v57  ;;  %v3754_v10 = vpop.f32.mrb[72].mxu0 }
 0xc68   :  { %2985 = vst.msk [vmem:[%s5971_s15 + $0x48] sm:$0xff] %vm6075_vm11, %v2969_v29  ;;  %v2937_v17 = vadd.f32 %v3754_v10, %v3132_v21  ;;  %v2931_v41 = vpop.f32.mrb[73].mxu0 }
 0xc69   :  { %2984 = vst.msk [vmem:[%s5971_s15 + $0x40] sm:$0xff] %vm6076_vm12, %v2968_v5  ;;  %v2932_v11 = vadd.f32 %v3132_v21, %v2931_v41 }
 0xc6a   :  { %v2971_v24 = vadd.f32 %v2937_v17, %v5589_v38 }
 0xc6b   :  { %v2970_v35 = vadd.f32 %v2932_v11, %v5624_v8  ;;  %v3757_v23 = vpop.f32.mrb[74].mxu0 }
 0xc6c   :  { %2987 = vst.msk [vmem:[%s5971_s15 + $0x58] sm:$0xff] %vm6077_vm13, %v2971_v24  ;;  %v2947_v57 = vadd.f32 %v3757_v23, %v3132_v21  ;;  %v2941_v26 = vpop.f32.mrb[75].mxu0 }
 0xc6d   :  { %2986 = vst.msk [vmem:[%s5971_s15 + $0x50] sm:$0xff] %vm6078_vm14, %v2970_v35  ;;  %v2942_v33 = vadd.f32 %v3132_v21, %v2941_v26 }
 0xc6e   :  { %v2973_v14 = vadd.f32 %v2947_v57, %v5605_v20 }
 0xc6f   :  { %v2972_v38 = vadd.f32 %v2942_v33, %v5634_v30  ;;  %v3760_v25 = vpop.f32.mrb[76].mxu0 }
 0xc70   :  { %2989 = vst.msk [vmem:[%s5971_s15 + $0x68] sm:$0xff] %vm6079_vm15, %v2973_v14  ;;  %v2957_v8 = vadd.f32 %v3760_v25, %v3132_v21  ;;  %v2951_v4 = vpop.f32.mrb[77].mxu0 }
 0xc71   :  { %2988 = vst.msk [vmem:[%s5971_s15 + $0x60] sm:$0xff] %vm6080_vm2, %v2972_v38  ;;  %v2952_v18 = vadd.f32 %v3132_v21, %v2951_v4 }
 0xc72   :  { %v2975_v42 = vadd.f32 %v2957_v8, %v5621_v13 }
 0xc73   :  { %v2974_v20 = vadd.f32 %v2952_v18, %v5642_v36 }
 0xc74   :  { %2991 = vst.msk [vmem:[%s5971_s15 + $0x78] sm:$0xff] %vm6036_vm0, %v2975_v42 }
 0xc75   :  { %2990 = vst.msk [vmem:[%s5971_s15 + $0x70] sm:$0xff] %vm6081_vm1, %v2974_v20 }

</bundles_post_ra>
